<compile_context>
chip_gen: v5e
topology: v5e:2x2
jax: 0.10.0
libtpu: 0.0.40
codegen_flags: <defaults>
</compile_context>

<pallas_src>
import math

import jax
import jax.numpy as jnp
from jax.experimental import pallas as pl
from jax.experimental.pallas import tpu as pltpu

# ----------------------------- configuration --------------------------------
N_HEAD = 4
N_EMBD = 16
CHANNELS = N_HEAD * N_EMBD          # 64  (must be divisible by 32 for GroupNorm(32, .))
D_HEAD = CHANNELS // N_HEAD         # 16
D_CONTEXT = 64                      # small synthetic "context" width (module default is 768)
N_GROUPS = 32
GN_EPS = 1e-6
LN_EPS = 1e-5

MATMUL_DTYPE = jnp.bfloat16         # MXU operand dtype; accumulation stays f32

# Parameters as seen by the kernel (after host-side folding).
PARAM_NAMES = (
    "gn_gmat",
    "conv_in_w", "conv_in_b",
    "attn1_in_w", "attn1_in_b",
    "attn1_out_w", "attn1_out_b",
    "attn2_q_w", "attn2_q_b",
    "attn2_kv_w",
    "attn2_out_w", "attn2_out_b",
    "geglu1_w", "geglu1_b",
    "geglu2_w", "geglu2_b",
    "conv_out_w", "conv_out_b",
)

# weight matrices shipped to the kernel in bf16 (biases stay f32)
_BF16_PARAMS = frozenset({
    "gn_gmat", "conv_in_w", "attn1_in_w", "attn1_out_w",
    "attn2_q_w", "attn2_kv_w", "attn2_out_w",
    "geglu1_w", "geglu2_w", "conv_out_w",
})


# --------------------------- per-batch math (traced inside the kernel) ------
def _mm(w, x):
    """Channel-major linear: (out,in) @ (in,T), bf16 operands, f32 accumulation."""
    return jnp.dot(w, x.astype(MATMUL_DTYPE), preferred_element_type=jnp.float32)


def _layernorm_cm(x):
    # x: (C, T); per-token stats over channels (sublane reduction). Affine folded out.
    mean = jnp.mean(x, axis=0, keepdims=True)
    d = x - mean
    var = jnp.mean(d * d, axis=0, keepdims=True)
    return d * jax.lax.rsqrt(var + LN_EPS)


def _groupnorm_cm(x, gmat):
    # x: (C, T).  GroupNorm(32, C) stats per group over (channels-in-group, spatial).
    # Two-pass (center first, no E[x^2]-E[x]^2 cancellation); group averaging via a tiny
    # bf16 (C, C) matrix (entries exactly 1/cg = 0.5).  Affine folded into conv_input.
    mean_c = jnp.mean(x, axis=1, keepdims=True)                        # (C, 1)
    mean_g = jnp.dot(gmat, mean_c.astype(MATMUL_DTYPE),
                     preferred_element_type=jnp.float32)               # (C, 1)
    d = x - mean_g
    var_c = jnp.mean(d * d, axis=1, keepdims=True)                     # (C, 1)
    var_g = jnp.dot(gmat, var_c.astype(MATMUL_DTYPE),
                    preferred_element_type=jnp.float32)                # (C, 1)
    return d * jax.lax.rsqrt(var_g + GN_EPS)


def _mha_cm(q, k, v):
    # q: (C, Tq), k/v: (C, Tk), channel-major.  Head split is a free leading-axis reshape
    # (D_HEAD = 16 is sublane-tile aligned).  1/sqrt(D_HEAD) is folded into the q weights.
    c, tq = q.shape
    q3 = q.reshape(N_HEAD, D_HEAD, tq)                                 # (H, Dh, Tq)
    k3 = k.reshape(N_HEAD, D_HEAD, -1)                                 # (H, Dh, Tk)
    v3 = v.reshape(N_HEAD, D_HEAD, -1)                                 # (H, Dh, Tk)
    # Scores emitted pre-transposed: s[h, kpos, qpos].
    s = jnp.einsum("hdk,hdq->hkq",
                   k3.astype(MATMUL_DTYPE), q3.astype(MATMUL_DTYPE),
                   preferred_element_type=jnp.float32)                 # (H, Tk, Tq)
    s = s - jnp.max(s, axis=1, keepdims=True)
    p = jnp.exp(s)
    p = p * pl.reciprocal(jnp.sum(p, axis=1, keepdims=True), approx=True)
    # PV: natural (Dh,Tk)@(Tk,Tq) per head -- no transposed operand, output (H, Dh, Tq).
    o = jnp.einsum("hdk,hkq->hdq",
                   v3.astype(MATMUL_DTYPE), p.astype(MATMUL_DTYPE),
                   preferred_element_type=jnp.float32)                 # (H, Dh, Tq)
    return o.reshape(c, tq)                                            # free leading-axis merge


def _forward_cm(x, ctx, p):
    # x: (C, HW) channel-major tokens; ctx: (D_CONTEXT, S_ctx) channel-major.
    c = CHANNELS
    residue_long = x

    # groupnorm (+ folded affine) + conv_input (1x1 conv == per-token linear)
    x = _groupnorm_cm(x, p["gn_gmat"])
    x = _mm(p["conv_in_w"], x) + p["conv_in_b"]

    # --- self attention (ln1 affine + 1/sqrt(Dh) folded into attn1_in_w / attn1_in_b) ---
    res = x
    xn = _layernorm_cm(x)
    qkv = _mm(p["attn1_in_w"], xn) + p["attn1_in_b"]                   # (3C, HW)
    q, k, v = qkv[:c], qkv[c:2 * c], qkv[2 * c:]
    x = _mha_cm(q, k, v)
    x = _mm(p["attn1_out_w"], x) + p["attn1_out_b"]
    x = x + res

    # --- cross attention (ln2 affine + scale folded into q proj; K/V fused) ---
    res = x
    xn = _layernorm_cm(x)
    q = _mm(p["attn2_q_w"], xn) + p["attn2_q_b"]
    kv = _mm(p["attn2_kv_w"], ctx)                                     # (2C, S_ctx)
    k, v = kv[:c], kv[c:]
    x = _mha_cm(q, k, v)
    x = _mm(p["attn2_out_w"], x) + p["attn2_out_b"]
    x = x + res

    # --- GeGLU feed-forward (ln3 affine folded into geglu1) ---
    res = x
    xn = _layernorm_cm(x)
    hg = _mm(p["geglu1_w"], xn) + p["geglu1_b"]                        # (8C, HW)
    h_, gate = hg[:4 * c], hg[4 * c:]
    x = h_ * jax.nn.gelu(gate, approximate=True)                       # tanh GELU (EUP)
    x = _mm(p["geglu2_w"], x) + p["geglu2_b"]
    x = x + res

    # conv_output (1x1) + long residual
    x = _mm(p["conv_out_w"], x) + p["conv_out_b"]
    return x + residue_long


# ------------------------------- Pallas kernel -------------------------------
def _unet_attn_kernel(x_ref, ctx_ref, *refs):
    param_refs, out_ref = refs[:-1], refs[-1]
    p = {name: r[...] for name, r in zip(PARAM_NAMES, param_refs)}
    out_ref[0] = _forward_cm(x_ref[0], ctx_ref[0], p)


@jax.jit
def unet_attention_block(x_nchw, context, kparams):
    n, c, h, w = x_nchw.shape
    hw = h * w
    s_ctx, d_ctx = context.shape[1], context.shape[2]

    # NCHW is already channel-major tokens: just collapse the spatial dims (no transpose).
    x_cm = x_nchw.reshape(n, c, hw)
    # context -> channel-major (n, d_ctx, s_ctx)
    ctx_cm = context.transpose(0, 2, 1)

    param_list = [kparams[k] for k in PARAM_NAMES]

    in_specs = [
        pl.BlockSpec((1, c, hw), lambda b: (b, 0, 0)),
        pl.BlockSpec((1, d_ctx, s_ctx), lambda b: (b, 0, 0)),
    ] + [pl.BlockSpec(pp.shape, lambda b: (0, 0)) for pp in param_list]

    out_cm = pl.pallas_call(
        _unet_attn_kernel,
        out_shape=jax.ShapeDtypeStruct((n, c, hw), jnp.float32),
        grid_spec=pltpu.PrefetchScalarGridSpec(
            num_scalar_prefetch=0,
            grid=(n,),
            in_specs=in_specs,
            out_specs=pl.BlockSpec((1, c, hw), lambda b: (b, 0, 0)),
        ),
        compiler_params=pltpu.CompilerParams(
            dimension_semantics=("parallel",),
        ),
    )(x_cm, ctx_cm, *param_list)

    # channel-major tokens -> NCHW is again just a reshape
    return out_cm.reshape(n, c, h, w)


# ------------------------------ raw (PyTorch-layout) parameters ---------------
def init_raw_params(key):
    c = CHANNELS
    ks = iter(jax.random.split(key, 32))

    def rnd(shape, scale=0.05):
        return jax.random.normal(next(ks), shape, dtype=jnp.float32) * scale

    # Norm affines randomized (not the PyTorch init of ones/zeros) so the host-side
    # folds below are actually exercised by the correctness check.
    return {
        "gn_g": 1.0 + rnd((c,), 0.1), "gn_b": rnd((c,), 0.02),
        "conv_in_w": rnd((c, c)),                      # 1x1 conv weight, (out,in,1,1) squeezed
        "conv_in_b": rnd((c,), 0.02),
        "ln1_g": 1.0 + rnd((c,), 0.1), "ln1_b": rnd((c,), 0.02),
        "attn1_in_w": rnd((3 * c, c)),                 # SelfAttention in_proj (no bias)
        "attn1_out_w": rnd((c, c)), "attn1_out_b": rnd((c,), 0.02),
        "ln2_g": 1.0 + rnd((c,), 0.1), "ln2_b": rnd((c,), 0.02),
        "attn2_q_w": rnd((c, c)),                      # CrossAttention projections (no bias)
        "attn2_k_w": rnd((c, D_CONTEXT)),
        "attn2_v_w": rnd((c, D_CONTEXT)),
        "attn2_out_w": rnd((c, c)), "attn2_out_b": rnd((c,), 0.02),
        "ln3_g": 1.0 + rnd((c,), 0.1), "ln3_b": rnd((c,), 0.02),
        "geglu1_w": rnd((8 * c, c)), "geglu1_b": rnd((8 * c,), 0.02),
        "geglu2_w": rnd((c, 4 * c)), "geglu2_b": rnd((c,), 0.02),
        "conv_out_w": rnd((c, c)), "conv_out_b": rnd((c,), 0.02),
    }


def prepare_kernel_params(rp):
    """Host-side folding (all in f32) + bf16 cast of the weight matrices."""
    c = CHANNELS
    scale = 1.0 / math.sqrt(D_HEAD)

    def fold_norm(w, gamma, beta):
        # W @ (xhat * gamma + beta) == (W * gamma_row) @ xhat + W @ beta
        return w * gamma.reshape(1, -1), w @ beta.reshape(-1, 1)

    # GroupNorm affine -> conv_input
    conv_in_w, gn_bias = fold_norm(rp["conv_in_w"], rp["gn_g"], rp["gn_b"])
    conv_in_b = rp["conv_in_b"].reshape(-1, 1) + gn_bias

    # LayerNorm1 -> attn1 in_proj (creates a bias; the module's in_proj has none)
    attn1_in_w, attn1_in_b = fold_norm(rp["attn1_in_w"], rp["ln1_g"], rp["ln1_b"])
    attn1_in_w = attn1_in_w.at[:c].multiply(scale)      # fold 1/sqrt(Dh) into the q rows
    attn1_in_b = attn1_in_b.at[:c].multiply(scale)

    # LayerNorm2 -> attn2 q_proj (+ 1/sqrt(Dh) fold)
    attn2_q_w, attn2_q_b = fold_norm(rp["attn2_q_w"], rp["ln2_g"], rp["ln2_b"])
    attn2_q_w = attn2_q_w * scale
    attn2_q_b = attn2_q_b * scale

    # Fused K/V projection
    attn2_kv_w = jnp.concatenate([rp["attn2_k_w"], rp["attn2_v_w"]], axis=0)

    # LayerNorm3 -> geglu1
    geglu1_w, ln3_bias = fold_norm(rp["geglu1_w"], rp["ln3_g"], rp["ln3_b"])
    geglu1_b = rp["geglu1_b"].reshape(-1, 1) + ln3_bias

    # Group-average matrix (entries 1/cg = 0.5, exactly representable in bf16)
    cg = c // N_GROUPS
    ch = jnp.arange(c)
    gmat = (ch[:, None] // cg == ch[None, :] // cg).astype(jnp.float32) / cg

    kp = {
        "gn_gmat": gmat,
        "conv_in_w": conv_in_w, "conv_in_b": conv_in_b,
        "attn1_in_w": attn1_in_w, "attn1_in_b": attn1_in_b,
        "attn1_out_w": rp["attn1_out_w"], "attn1_out_b": rp["attn1_out_b"].reshape(-1, 1),
        "attn2_q_w": attn2_q_w, "attn2_q_b": attn2_q_b,
        "attn2_kv_w": attn2_kv_w,
        "attn2_out_w": rp["attn2_out_w"], "attn2_out_b": rp["attn2_out_b"].reshape(-1, 1),
        "geglu1_w": geglu1_w, "geglu1_b": geglu1_b,
        "geglu2_w": rp["geglu2_w"], "geglu2_b": rp["geglu2_b"].reshape(-1, 1),
        "conv_out_w": rp["conv_out_w"], "conv_out_b": rp["conv_out_b"].reshape(-1, 1),
    }
    return {k: (v.astype(jnp.bfloat16) if k in _BF16_PARAMS else v.astype(jnp.float32))
            for k, v in kp.items()}


# ------------------------------ pure-JAX reference ----------------------------
def reference(x_nchw, context, rp):
    """f32, unfolded, token-major mirror of the PyTorch module (tanh GELU like the kernel)."""
    n, c, h, w = x_nchw.shape
    hw = h * w

    def groupnorm(x):
        xg = x.reshape(n, N_GROUPS, c // N_GROUPS, h, w)
        mean = jnp.mean(xg, axis=(2, 3, 4), keepdims=True)
        var = jnp.mean((xg - mean) ** 2, axis=(2, 3, 4), keepdims=True)
        xh = ((xg - mean) / jnp.sqrt(var + GN_EPS)).reshape(n, c, h, w)
        return xh * rp["gn_g"].reshape(1, c, 1, 1) + rp["gn_b"].reshape(1, c, 1, 1)

    def layernorm(x, g, b):                              # x: (n, t, c)
        mean = jnp.mean(x, axis=-1, keepdims=True)
        var = jnp.mean((x - mean) ** 2, axis=-1, keepdims=True)
        return (x - mean) / jnp.sqrt(var + LN_EPS) * g + b

    def linear(x, wt, b=None):                           # wt: (out, in)
        y = x @ wt.T
        return y if b is None else y + b

    def conv1x1(x, wt, b):                               # x: (n, c, h, w)
        return jnp.einsum("oc,nchw->nohw", wt, x) + b.reshape(1, -1, 1, 1)

    def attention(q, k, v):                              # q: (n, tq, c); k, v: (n, tk, c)
        def split(t):
            return t.reshape(t.shape[0], t.shape[1], N_HEAD, D_HEAD).transpose(0, 2, 1, 3)
        qh, kh, vh = split(q), split(k), split(v)        # (n, H, t, Dh)
        s = jnp.einsum("nhqd,nhkd->nhqk", qh, kh) / math.sqrt(D_HEAD)
        p = jax.nn.softmax(s, axis=-1)
        o = jnp.einsum("nhqk,nhkd->nhqd", p, vh)
        return o.transpose(0, 2, 1, 3).reshape(q.shape[0], q.shape[1], c)

    residue_long = x_nchw
    x = conv1x1(groupnorm(x_nchw), rp["conv_in_w"], rp["conv_in_b"])
    x = x.reshape(n, c, hw).transpose(0, 2, 1)           # (n, hw, c) token-major

    res = x
    xn = layernorm(x, rp["ln1_g"], rp["ln1_b"])
    q, k, v = jnp.split(linear(xn, rp["attn1_in_w"]), 3, axis=-1)
    x = linear(attention(q, k, v), rp["attn1_out_w"], rp["attn1_out_b"]) + res

    res = x
    xn = layernorm(x, rp["ln2_g"], rp["ln2_b"])
    q = linear(xn, rp["attn2_q_w"])
    k = linear(context, rp["attn2_k_w"])
    v = linear(context, rp["attn2_v_w"])
    x = linear(attention(q, k, v), rp["attn2_out_w"], rp["attn2_out_b"]) + res

    res = x
    xn = layernorm(x, rp["ln3_g"], rp["ln3_b"])
    hh, gate = jnp.split(linear(xn, rp["geglu1_w"], rp["geglu1_b"]), 2, axis=-1)
    x = linear(hh * jax.nn.gelu(gate, approximate=True), rp["geglu2_w"], rp["geglu2_b"]) + res

    x = x.transpose(0, 2, 1).reshape(n, c, h, w)
    return conv1x1(x, rp["conv_out_w"], rp["conv_out_b"]) + residue_long


# ----------------------------------- main -------------------------------------
if __name__ == "__main__":
    key = jax.random.PRNGKey(0)
    kx, kc, kp = jax.random.split(key, 3)

    N, H, W = 2, 8, 8
    S_CTX = 16

    x = jax.random.normal(kx, (N, CHANNELS, H, W), dtype=jnp.float32)
    context = jax.random.normal(kc, (N, S_CTX, D_CONTEXT), dtype=jnp.float32)

    raw_params = init_raw_params(kp)
    kernel_params = prepare_kernel_params(raw_params)

    out = jax.block_until_ready(unet_attention_block(x, context, kernel_params))

    assert out.shape == x.shape, (out.shape, x.shape)
    assert bool(jnp.all(jnp.isfinite(out)))

    ref = jax.block_until_ready(reference(x, context, raw_params))
    max_err = float(jnp.max(jnp.abs(out - ref)))
    assert max_err < 5e-2, f"max abs diff vs f32 reference: {max_err}"

    print("KERNEL_OK")
</pallas_src>

<mosaic_0001>
module attributes {stable_mosaic.version = 11 : i64} {
  func.func @_unet_attn_kernel(%arg0: i32, %arg1: memref<1x64x64xf32, #tpu.memory_space<vmem>>, %arg2: memref<1x64x16xf32, #tpu.memory_space<vmem>>, %arg3: memref<64x64xbf16, #tpu.memory_space<vmem>>, %arg4: memref<64x64xbf16, #tpu.memory_space<vmem>>, %arg5: memref<64x1xf32, #tpu.memory_space<vmem>>, %arg6: memref<192x64xbf16, #tpu.memory_space<vmem>>, %arg7: memref<192x1xf32, #tpu.memory_space<vmem>>, %arg8: memref<64x64xbf16, #tpu.memory_space<vmem>>, %arg9: memref<64x1xf32, #tpu.memory_space<vmem>>, %arg10: memref<64x64xbf16, #tpu.memory_space<vmem>>, %arg11: memref<64x1xf32, #tpu.memory_space<vmem>>, %arg12: memref<128x64xbf16, #tpu.memory_space<vmem>>, %arg13: memref<64x64xbf16, #tpu.memory_space<vmem>>, %arg14: memref<64x1xf32, #tpu.memory_space<vmem>>, %arg15: memref<512x64xbf16, #tpu.memory_space<vmem>>, %arg16: memref<512x1xf32, #tpu.memory_space<vmem>>, %arg17: memref<64x256xbf16, #tpu.memory_space<vmem>>, %arg18: memref<64x1xf32, #tpu.memory_space<vmem>>, %arg19: memref<64x64xbf16, #tpu.memory_space<vmem>>, %arg20: memref<64x1xf32, #tpu.memory_space<vmem>>, %arg21: memref<1x64x64xf32, #tpu.memory_space<vmem>>) attributes {dimension_semantics = [#tpu.dimension_semantics<parallel>], iteration_bounds = array<i64: 2>, scalar_prefetch = 0 : i64, scratch_operands = 0 : i64, tpu.core_type = #tpu.core_type<tc>, window_params = [{transform_indices = @transform_0, window_bounds = array<i64: 1, 64, 64>}, {transform_indices = @transform_1, window_bounds = array<i64: 1, 64, 16>}, {pipeline_mode = #tpu.pipeline_mode<synchronous>, transform_indices = @transform_2, window_bounds = array<i64: 64, 64>}, {pipeline_mode = #tpu.pipeline_mode<synchronous>, transform_indices = @transform_3, window_bounds = array<i64: 64, 64>}, {pipeline_mode = #tpu.pipeline_mode<synchronous>, transform_indices = @transform_4, window_bounds = array<i64: 64, 1>}, {pipeline_mode = #tpu.pipeline_mode<synchronous>, transform_indices = @transform_5, window_bounds = array<i64: 192, 64>}, {pipeline_mode = #tpu.pipeline_mode<synchronous>, transform_indices = @transform_6, window_bounds = array<i64: 192, 1>}, {pipeline_mode = #tpu.pipeline_mode<synchronous>, transform_indices = @transform_7, window_bounds = array<i64: 64, 64>}, {pipeline_mode = #tpu.pipeline_mode<synchronous>, transform_indices = @transform_8, window_bounds = array<i64: 64, 1>}, {pipeline_mode = #tpu.pipeline_mode<synchronous>, transform_indices = @transform_9, window_bounds = array<i64: 64, 64>}, {pipeline_mode = #tpu.pipeline_mode<synchronous>, transform_indices = @transform_10, window_bounds = array<i64: 64, 1>}, {pipeline_mode = #tpu.pipeline_mode<synchronous>, transform_indices = @transform_11, window_bounds = array<i64: 128, 64>}, {pipeline_mode = #tpu.pipeline_mode<synchronous>, transform_indices = @transform_12, window_bounds = array<i64: 64, 64>}, {pipeline_mode = #tpu.pipeline_mode<synchronous>, transform_indices = @transform_13, window_bounds = array<i64: 64, 1>}, {pipeline_mode = #tpu.pipeline_mode<synchronous>, transform_indices = @transform_14, window_bounds = array<i64: 512, 64>}, {pipeline_mode = #tpu.pipeline_mode<synchronous>, transform_indices = @transform_15, window_bounds = array<i64: 512, 1>}, {pipeline_mode = #tpu.pipeline_mode<synchronous>, transform_indices = @transform_16, window_bounds = array<i64: 64, 256>}, {pipeline_mode = #tpu.pipeline_mode<synchronous>, transform_indices = @transform_17, window_bounds = array<i64: 64, 1>}, {pipeline_mode = #tpu.pipeline_mode<synchronous>, transform_indices = @transform_18, window_bounds = array<i64: 64, 64>}, {pipeline_mode = #tpu.pipeline_mode<synchronous>, transform_indices = @transform_19, window_bounds = array<i64: 64, 1>}, {transform_indices = @transform_20, window_bounds = array<i64: 1, 64, 64>}]} {
    %c0 = arith.constant 0 : index
    %c0_0 = arith.constant 0 : index
    %0 = vector.load %arg3[%c0, %c0_0] : memref<64x64xbf16, #tpu.memory_space<vmem>>, vector<64x64xbf16>
    %c0_1 = arith.constant 0 : index
    %c0_2 = arith.constant 0 : index
    %1 = vector.load %arg4[%c0_1, %c0_2] : memref<64x64xbf16, #tpu.memory_space<vmem>>, vector<64x64xbf16>
    %c0_3 = arith.constant 0 : index
    %c0_4 = arith.constant 0 : index
    %2 = vector.load %arg5[%c0_3, %c0_4] : memref<64x1xf32, #tpu.memory_space<vmem>>, vector<64x1xf32>
    %c0_5 = arith.constant 0 : index
    %c0_6 = arith.constant 0 : index
    %3 = vector.load %arg6[%c0_5, %c0_6] : memref<192x64xbf16, #tpu.memory_space<vmem>>, vector<192x64xbf16>
    %c0_7 = arith.constant 0 : index
    %c0_8 = arith.constant 0 : index
    %4 = vector.load %arg7[%c0_7, %c0_8] : memref<192x1xf32, #tpu.memory_space<vmem>>, vector<192x1xf32>
    %c0_9 = arith.constant 0 : index
    %c0_10 = arith.constant 0 : index
    %5 = vector.load %arg8[%c0_9, %c0_10] : memref<64x64xbf16, #tpu.memory_space<vmem>>, vector<64x64xbf16>
    %c0_11 = arith.constant 0 : index
    %c0_12 = arith.constant 0 : index
    %6 = vector.load %arg9[%c0_11, %c0_12] : memref<64x1xf32, #tpu.memory_space<vmem>>, vector<64x1xf32>
    %c0_13 = arith.constant 0 : index
    %c0_14 = arith.constant 0 : index
    %7 = vector.load %arg10[%c0_13, %c0_14] : memref<64x64xbf16, #tpu.memory_space<vmem>>, vector<64x64xbf16>
    %c0_15 = arith.constant 0 : index
    %c0_16 = arith.constant 0 : index
    %8 = vector.load %arg11[%c0_15, %c0_16] : memref<64x1xf32, #tpu.memory_space<vmem>>, vector<64x1xf32>
    %c0_17 = arith.constant 0 : index
    %c0_18 = arith.constant 0 : index
    %9 = vector.load %arg12[%c0_17, %c0_18] : memref<128x64xbf16, #tpu.memory_space<vmem>>, vector<128x64xbf16>
    %c0_19 = arith.constant 0 : index
    %c0_20 = arith.constant 0 : index
    %10 = vector.load %arg13[%c0_19, %c0_20] : memref<64x64xbf16, #tpu.memory_space<vmem>>, vector<64x64xbf16>
    %c0_21 = arith.constant 0 : index
    %c0_22 = arith.constant 0 : index
    %11 = vector.load %arg14[%c0_21, %c0_22] : memref<64x1xf32, #tpu.memory_space<vmem>>, vector<64x1xf32>
    %c0_23 = arith.constant 0 : index
    %c0_24 = arith.constant 0 : index
    %12 = vector.load %arg15[%c0_23, %c0_24] : memref<512x64xbf16, #tpu.memory_space<vmem>>, vector<512x64xbf16>
    %c0_25 = arith.constant 0 : index
    %c0_26 = arith.constant 0 : index
    %13 = vector.load %arg16[%c0_25, %c0_26] : memref<512x1xf32, #tpu.memory_space<vmem>>, vector<512x1xf32>
    %c0_27 = arith.constant 0 : index
    %c0_28 = arith.constant 0 : index
    %14 = vector.load %arg17[%c0_27, %c0_28] : memref<64x256xbf16, #tpu.memory_space<vmem>>, vector<64x256xbf16>
    %c0_29 = arith.constant 0 : index
    %c0_30 = arith.constant 0 : index
    %15 = vector.load %arg18[%c0_29, %c0_30] : memref<64x1xf32, #tpu.memory_space<vmem>>, vector<64x1xf32>
    %c0_31 = arith.constant 0 : index
    %c0_32 = arith.constant 0 : index
    %16 = vector.load %arg19[%c0_31, %c0_32] : memref<64x64xbf16, #tpu.memory_space<vmem>>, vector<64x64xbf16>
    %c0_33 = arith.constant 0 : index
    %c0_34 = arith.constant 0 : index
    %17 = vector.load %arg20[%c0_33, %c0_34] : memref<64x1xf32, #tpu.memory_space<vmem>>, vector<64x1xf32>
    %c0_35 = arith.constant 0 : index
    %c0_36 = arith.constant 0 : index
    %c0_37 = arith.constant 0 : index
    %18 = vector.load %arg1[%c0_35, %c0_36, %c0_37] : memref<1x64x64xf32, #tpu.memory_space<vmem>>, vector<1x64x64xf32>
    %19 = vector.shape_cast %18 : vector<1x64x64xf32> to vector<64x64xf32>
    %c0_38 = arith.constant 0 : index
    %c0_39 = arith.constant 0 : index
    %c0_40 = arith.constant 0 : index
    %20 = vector.load %arg2[%c0_38, %c0_39, %c0_40] : memref<1x64x16xf32, #tpu.memory_space<vmem>>, vector<1x64x16xf32>
    %21 = vector.shape_cast %20 : vector<1x64x16xf32> to vector<64x16xf32>
    %cst = arith.constant dense<0.000000e+00> : vector<64xf32>
    %22 = vector.multi_reduction <add>, %19, %cst [1] : vector<64x64xf32> to vector<64xf32>
    %23 = vector.shape_cast %22 : vector<64xf32> to vector<64x1xf32>
    %cst_41 = arith.constant 6.400000e+01 : f32
    %24 = vector.broadcast %cst_41 : f32 to vector<64x1xf32>
    %25 = arith.divf %23, %24 : vector<64x1xf32>
    %26 = arith.truncf %25 : vector<64x1xf32> to vector<64x1xbf16>
    %cst_42 = arith.constant dense<0.000000e+00> : vector<64x1xf32>
    %27 = tpu.matmul %0, %26, %cst_42 {dimension_numbers = #tpu.dot_dimension_numbers<[1], [0], [0], [1], [0, 0, 1, 1], [], []>} : vector<64x64xbf16>, vector<64x1xbf16>, vector<64x1xf32> -> vector<64x1xf32>
    %28 = vector.broadcast %27 : vector<64x1xf32> to vector<64x64xf32>
    %29 = arith.subf %19, %28 : vector<64x64xf32>
    %30 = arith.mulf %29, %29 : vector<64x64xf32>
    %cst_43 = arith.constant dense<0.000000e+00> : vector<64xf32>
    %31 = vector.multi_reduction <add>, %30, %cst_43 [1] : vector<64x64xf32> to vector<64xf32>
    %32 = vector.shape_cast %31 : vector<64xf32> to vector<64x1xf32>
    %cst_44 = arith.constant 6.400000e+01 : f32
    %33 = vector.broadcast %cst_44 : f32 to vector<64x1xf32>
    %34 = arith.divf %32, %33 : vector<64x1xf32>
    %35 = arith.truncf %34 : vector<64x1xf32> to vector<64x1xbf16>
    %cst_45 = arith.constant dense<0.000000e+00> : vector<64x1xf32>
    %36 = tpu.matmul %0, %35, %cst_45 {dimension_numbers = #tpu.dot_dimension_numbers<[1], [0], [0], [1], [0, 0, 1, 1], [], []>} : vector<64x64xbf16>, vector<64x1xbf16>, vector<64x1xf32> -> vector<64x1xf32>
    %cst_46 = arith.constant 9.99999997E-7 : f32
    %37 = vector.broadcast %cst_46 : f32 to vector<64x1xf32>
    %38 = arith.addf %36, %37 : vector<64x1xf32>
    %39 = math.rsqrt %38 : vector<64x1xf32>
    %40 = vector.broadcast %39 : vector<64x1xf32> to vector<64x64xf32>
    %41 = arith.mulf %29, %40 : vector<64x64xf32>
    %42 = arith.truncf %41 : vector<64x64xf32> to vector<64x64xbf16>
    %cst_47 = arith.constant dense<0.000000e+00> : vector<64x64xf32>
    %43 = tpu.matmul %1, %42, %cst_47 {dimension_numbers = #tpu.dot_dimension_numbers<[1], [0], [0], [1], [0, 0, 1, 1], [], []>} : vector<64x64xbf16>, vector<64x64xbf16>, vector<64x64xf32> -> vector<64x64xf32>
    %44 = vector.broadcast %2 : vector<64x1xf32> to vector<64x64xf32>
    %45 = arith.addf %43, %44 : vector<64x64xf32>
    %cst_48 = arith.constant dense<0.000000e+00> : vector<64xf32>
    %46 = vector.multi_reduction <add>, %45, %cst_48 [0] : vector<64x64xf32> to vector<64xf32>
    %47 = vector.shape_cast %46 : vector<64xf32> to vector<1x64xf32>
    %cst_49 = arith.constant 6.400000e+01 : f32
    %48 = vector.broadcast %cst_49 : f32 to vector<1x64xf32>
    %49 = arith.divf %47, %48 : vector<1x64xf32>
    %50 = vector.broadcast %49 : vector<1x64xf32> to vector<64x64xf32>
    %51 = arith.subf %45, %50 : vector<64x64xf32>
    %52 = arith.mulf %51, %51 : vector<64x64xf32>
    %cst_50 = arith.constant dense<0.000000e+00> : vector<64xf32>
    %53 = vector.multi_reduction <add>, %52, %cst_50 [0] : vector<64x64xf32> to vector<64xf32>
    %54 = vector.shape_cast %53 : vector<64xf32> to vector<1x64xf32>
    %cst_51 = arith.constant 6.400000e+01 : f32
    %55 = vector.broadcast %cst_51 : f32 to vector<1x64xf32>
    %56 = arith.divf %54, %55 : vector<1x64xf32>
    %cst_52 = arith.constant 9.99999974E-6 : f32
    %57 = vector.broadcast %cst_52 : f32 to vector<1x64xf32>
    %58 = arith.addf %56, %57 : vector<1x64xf32>
    %59 = math.rsqrt %58 : vector<1x64xf32>
    %60 = vector.broadcast %59 : vector<1x64xf32> to vector<64x64xf32>
    %61 = arith.mulf %51, %60 : vector<64x64xf32>
    %62 = arith.truncf %61 : vector<64x64xf32> to vector<64x64xbf16>
    %cst_53 = arith.constant dense<0.000000e+00> : vector<192x64xf32>
    %63 = tpu.matmul %3, %62, %cst_53 {dimension_numbers = #tpu.dot_dimension_numbers<[1], [0], [0], [1], [0, 0, 1, 1], [], []>} : vector<192x64xbf16>, vector<64x64xbf16>, vector<192x64xf32> -> vector<192x64xf32>
    %64 = vector.broadcast %4 : vector<192x1xf32> to vector<192x64xf32>
    %65 = arith.addf %63, %64 : vector<192x64xf32>
    %66 = vector.extract_strided_slice %65 {offsets = [0, 0], sizes = [64, 64], strides = [1, 1]} : vector<192x64xf32> to vector<64x64xf32>
    %67 = vector.extract_strided_slice %65 {offsets = [64, 0], sizes = [64, 64], strides = [1, 1]} : vector<192x64xf32> to vector<64x64xf32>
    %68 = vector.extract_strided_slice %65 {offsets = [128, 0], sizes = [64, 64], strides = [1, 1]} : vector<192x64xf32> to vector<64x64xf32>
    %69 = vector.shape_cast %66 : vector<64x64xf32> to vector<4x16x64xf32>
    %70 = vector.shape_cast %67 : vector<64x64xf32> to vector<4x16x64xf32>
    %71 = vector.shape_cast %68 : vector<64x64xf32> to vector<4x16x64xf32>
    %72 = arith.truncf %70 : vector<4x16x64xf32> to vector<4x16x64xbf16>
    %73 = arith.truncf %69 : vector<4x16x64xf32> to vector<4x16x64xbf16>
    "tpu.trace_start"() <{level = 10 : i32, message = "hdk,hdq->hkq"}> : () -> ()
    %cst_54 = arith.constant dense<0.000000e+00> : vector<4x64x64xf32>
    %74 = tpu.matmul %72, %73, %cst_54 {dimension_numbers = #tpu.dot_dimension_numbers<[1], [1], [2], [2], [0, 0, 0, 2, 1, 2], [0], [0]>} : vector<4x16x64xbf16>, vector<4x16x64xbf16>, vector<4x64x64xf32> -> vector<4x64x64xf32>
    "tpu.trace_stop"() : () -> ()
    %cst_55 = arith.constant dense<0xFF800000> : vector<4x64xf32>
    %75 = vector.multi_reduction <maximumf>, %74, %cst_55 [1] : vector<4x64x64xf32> to vector<4x64xf32>
    %76 = vector.shape_cast %75 : vector<4x64xf32> to vector<4x1x64xf32>
    %77 = vector.broadcast %76 : vector<4x1x64xf32> to vector<4x64x64xf32>
    %78 = arith.subf %74, %77 : vector<4x64x64xf32>
    %79 = math.exp %78 : vector<4x64x64xf32>
    %cst_56 = arith.constant dense<0.000000e+00> : vector<4x64xf32>
    %80 = vector.multi_reduction <add>, %79, %cst_56 [1] : vector<4x64x64xf32> to vector<4x64xf32>
    %81 = vector.shape_cast %80 : vector<4x64xf32> to vector<4x1x64xf32>
    %82 = tpu.reciprocal %81 {approx = true} : vector<4x1x64xf32> -> vector<4x1x64xf32>
    %83 = vector.broadcast %82 : vector<4x1x64xf32> to vector<4x64x64xf32>
    %84 = arith.mulf %79, %83 : vector<4x64x64xf32>
    %85 = arith.truncf %71 : vector<4x16x64xf32> to vector<4x16x64xbf16>
    %86 = arith.truncf %84 : vector<4x64x64xf32> to vector<4x64x64xbf16>
    "tpu.trace_start"() <{level = 10 : i32, message = "hdk,hkq->hdq"}> : () -> ()
    %cst_57 = arith.constant dense<0.000000e+00> : vector<4x16x64xf32>
    %87 = tpu.matmul %85, %86, %cst_57 {dimension_numbers = #tpu.dot_dimension_numbers<[2], [1], [1], [2], [0, 0, 0, 1, 1, 2], [0], [0]>} : vector<4x16x64xbf16>, vector<4x64x64xbf16>, vector<4x16x64xf32> -> vector<4x16x64xf32>
    "tpu.trace_stop"() : () -> ()
    %88 = vector.shape_cast %87 : vector<4x16x64xf32> to vector<64x64xf32>
    %89 = arith.truncf %88 : vector<64x64xf32> to vector<64x64xbf16>
    %cst_58 = arith.constant dense<0.000000e+00> : vector<64x64xf32>
    %90 = tpu.matmul %5, %89, %cst_58 {dimension_numbers = #tpu.dot_dimension_numbers<[1], [0], [0], [1], [0, 0, 1, 1], [], []>} : vector<64x64xbf16>, vector<64x64xbf16>, vector<64x64xf32> -> vector<64x64xf32>
    %91 = vector.broadcast %6 : vector<64x1xf32> to vector<64x64xf32>
    %92 = arith.addf %90, %91 : vector<64x64xf32>
    %93 = arith.addf %92, %45 : vector<64x64xf32>
    %cst_59 = arith.constant dense<0.000000e+00> : vector<64xf32>
    %94 = vector.multi_reduction <add>, %93, %cst_59 [0] : vector<64x64xf32> to vector<64xf32>
    %95 = vector.shape_cast %94 : vector<64xf32> to vector<1x64xf32>
    %cst_60 = arith.constant 6.400000e+01 : f32
    %96 = vector.broadcast %cst_60 : f32 to vector<1x64xf32>
    %97 = arith.divf %95, %96 : vector<1x64xf32>
    %98 = vector.broadcast %97 : vector<1x64xf32> to vector<64x64xf32>
    %99 = arith.subf %93, %98 : vector<64x64xf32>
    %100 = arith.mulf %99, %99 : vector<64x64xf32>
    %cst_61 = arith.constant dense<0.000000e+00> : vector<64xf32>
    %101 = vector.multi_reduction <add>, %100, %cst_61 [0] : vector<64x64xf32> to vector<64xf32>
    %102 = vector.shape_cast %101 : vector<64xf32> to vector<1x64xf32>
    %cst_62 = arith.constant 6.400000e+01 : f32
    %103 = vector.broadcast %cst_62 : f32 to vector<1x64xf32>
    %104 = arith.divf %102, %103 : vector<1x64xf32>
    %cst_63 = arith.constant 9.99999974E-6 : f32
    %105 = vector.broadcast %cst_63 : f32 to vector<1x64xf32>
    %106 = arith.addf %104, %105 : vector<1x64xf32>
    %107 = math.rsqrt %106 : vector<1x64xf32>
    %108 = vector.broadcast %107 : vector<1x64xf32> to vector<64x64xf32>
    %109 = arith.mulf %99, %108 : vector<64x64xf32>
    %110 = arith.truncf %109 : vector<64x64xf32> to vector<64x64xbf16>
    %cst_64 = arith.constant dense<0.000000e+00> : vector<64x64xf32>
    %111 = tpu.matmul %7, %110, %cst_64 {dimension_numbers = #tpu.dot_dimension_numbers<[1], [0], [0], [1], [0, 0, 1, 1], [], []>} : vector<64x64xbf16>, vector<64x64xbf16>, vector<64x64xf32> -> vector<64x64xf32>
    %112 = vector.broadcast %8 : vector<64x1xf32> to vector<64x64xf32>
    %113 = arith.addf %111, %112 : vector<64x64xf32>
    %114 = arith.truncf %21 : vector<64x16xf32> to vector<64x16xbf16>
    %cst_65 = arith.constant dense<0.000000e+00> : vector<128x16xf32>
    %115 = tpu.matmul %9, %114, %cst_65 {dimension_numbers = #tpu.dot_dimension_numbers<[1], [0], [0], [1], [0, 0, 1, 1], [], []>} : vector<128x64xbf16>, vector<64x16xbf16>, vector<128x16xf32> -> vector<128x16xf32>
    %116 = vector.extract_strided_slice %115 {offsets = [0, 0], sizes = [64, 16], strides = [1, 1]} : vector<128x16xf32> to vector<64x16xf32>
    %117 = vector.extract_strided_slice %115 {offsets = [64, 0], sizes = [64, 16], strides = [1, 1]} : vector<128x16xf32> to vector<64x16xf32>
    %118 = vector.shape_cast %113 : vector<64x64xf32> to vector<4x16x64xf32>
    %119 = vector.shape_cast %116 : vector<64x16xf32> to vector<4x16x16xf32>
    %120 = vector.shape_cast %117 : vector<64x16xf32> to vector<4x16x16xf32>
    %121 = arith.truncf %119 : vector<4x16x16xf32> to vector<4x16x16xbf16>
    %122 = arith.truncf %118 : vector<4x16x64xf32> to vector<4x16x64xbf16>
    "tpu.trace_start"() <{level = 10 : i32, message = "hdk,hdq->hkq"}> : () -> ()
    %cst_66 = arith.constant dense<0.000000e+00> : vector<4x16x64xf32>
    %123 = tpu.matmul %121, %122, %cst_66 {dimension_numbers = #tpu.dot_dimension_numbers<[1], [1], [2], [2], [0, 0, 0, 2, 1, 2], [0], [0]>} : vector<4x16x16xbf16>, vector<4x16x64xbf16>, vector<4x16x64xf32> -> vector<4x16x64xf32>
    "tpu.trace_stop"() : () -> ()
    %cst_67 = arith.constant dense<0xFF800000> : vector<4x64xf32>
    %124 = vector.multi_reduction <maximumf>, %123, %cst_67 [1] : vector<4x16x64xf32> to vector<4x64xf32>
    %125 = vector.shape_cast %124 : vector<4x64xf32> to vector<4x1x64xf32>
    %126 = vector.broadcast %125 : vector<4x1x64xf32> to vector<4x16x64xf32>
    %127 = arith.subf %123, %126 : vector<4x16x64xf32>
    %128 = math.exp %127 : vector<4x16x64xf32>
    %cst_68 = arith.constant dense<0.000000e+00> : vector<4x64xf32>
    %129 = vector.multi_reduction <add>, %128, %cst_68 [1] : vector<4x16x64xf32> to vector<4x64xf32>
    %130 = vector.shape_cast %129 : vector<4x64xf32> to vector<4x1x64xf32>
    %131 = tpu.reciprocal %130 {approx = true} : vector<4x1x64xf32> -> vector<4x1x64xf32>
    %132 = vector.broadcast %131 : vector<4x1x64xf32> to vector<4x16x64xf32>
    %133 = arith.mulf %128, %132 : vector<4x16x64xf32>
    %134 = arith.truncf %120 : vector<4x16x16xf32> to vector<4x16x16xbf16>
    %135 = arith.truncf %133 : vector<4x16x64xf32> to vector<4x16x64xbf16>
    "tpu.trace_start"() <{level = 10 : i32, message = "hdk,hkq->hdq"}> : () -> ()
    %cst_69 = arith.constant dense<0.000000e+00> : vector<4x16x64xf32>
    %136 = tpu.matmul %134, %135, %cst_69 {dimension_numbers = #tpu.dot_dimension_numbers<[2], [1], [1], [2], [0, 0, 0, 1, 1, 2], [0], [0]>} : vector<4x16x16xbf16>, vector<4x16x64xbf16>, vector<4x16x64xf32> -> vector<4x16x64xf32>
    "tpu.trace_stop"() : () -> ()
    %137 = vector.shape_cast %136 : vector<4x16x64xf32> to vector<64x64xf32>
    %138 = arith.truncf %137 : vector<64x64xf32> to vector<64x64xbf16>
    %cst_70 = arith.constant dense<0.000000e+00> : vector<64x64xf32>
    %139 = tpu.matmul %10, %138, %cst_70 {dimension_numbers = #tpu.dot_dimension_numbers<[1], [0], [0], [1], [0, 0, 1, 1], [], []>} : vector<64x64xbf16>, vector<64x64xbf16>, vector<64x64xf32> -> vector<64x64xf32>
    %140 = vector.broadcast %11 : vector<64x1xf32> to vector<64x64xf32>
    %141 = arith.addf %139, %140 : vector<64x64xf32>
    %142 = arith.addf %141, %93 : vector<64x64xf32>
    %cst_71 = arith.constant dense<0.000000e+00> : vector<64xf32>
    %143 = vector.multi_reduction <add>, %142, %cst_71 [0] : vector<64x64xf32> to vector<64xf32>
    %144 = vector.shape_cast %143 : vector<64xf32> to vector<1x64xf32>
    %cst_72 = arith.constant 6.400000e+01 : f32
    %145 = vector.broadcast %cst_72 : f32 to vector<1x64xf32>
    %146 = arith.divf %144, %145 : vector<1x64xf32>
    %147 = vector.broadcast %146 : vector<1x64xf32> to vector<64x64xf32>
    %148 = arith.subf %142, %147 : vector<64x64xf32>
    %149 = arith.mulf %148, %148 : vector<64x64xf32>
    %cst_73 = arith.constant dense<0.000000e+00> : vector<64xf32>
    %150 = vector.multi_reduction <add>, %149, %cst_73 [0] : vector<64x64xf32> to vector<64xf32>
    %151 = vector.shape_cast %150 : vector<64xf32> to vector<1x64xf32>
    %cst_74 = arith.constant 6.400000e+01 : f32
    %152 = vector.broadcast %cst_74 : f32 to vector<1x64xf32>
    %153 = arith.divf %151, %152 : vector<1x64xf32>
    %cst_75 = arith.constant 9.99999974E-6 : f32
    %154 = vector.broadcast %cst_75 : f32 to vector<1x64xf32>
    %155 = arith.addf %153, %154 : vector<1x64xf32>
    %156 = math.rsqrt %155 : vector<1x64xf32>
    %157 = vector.broadcast %156 : vector<1x64xf32> to vector<64x64xf32>
    %158 = arith.mulf %148, %157 : vector<64x64xf32>
    %159 = arith.truncf %158 : vector<64x64xf32> to vector<64x64xbf16>
    %cst_76 = arith.constant dense<0.000000e+00> : vector<512x64xf32>
    %160 = tpu.matmul %12, %159, %cst_76 {dimension_numbers = #tpu.dot_dimension_numbers<[1], [0], [0], [1], [0, 0, 1, 1], [], []>} : vector<512x64xbf16>, vector<64x64xbf16>, vector<512x64xf32> -> vector<512x64xf32>
    %161 = vector.broadcast %13 : vector<512x1xf32> to vector<512x64xf32>
    %162 = arith.addf %160, %161 : vector<512x64xf32>
    %163 = vector.extract_strided_slice %162 {offsets = [0, 0], sizes = [256, 64], strides = [1, 1]} : vector<512x64xf32> to vector<256x64xf32>
    %164 = vector.extract_strided_slice %162 {offsets = [256, 0], sizes = [256, 64], strides = [1, 1]} : vector<512x64xf32> to vector<256x64xf32>
    %165 = arith.mulf %164, %164 : vector<256x64xf32>
    %166 = arith.mulf %164, %165 : vector<256x64xf32>
    %cst_77 = arith.constant 4.471500e-02 : f32
    %167 = vector.broadcast %cst_77 : f32 to vector<256x64xf32>
    %168 = arith.mulf %167, %166 : vector<256x64xf32>
    %169 = arith.addf %164, %168 : vector<256x64xf32>
    %cst_78 = arith.constant 0.797884583 : f32
    %170 = vector.broadcast %cst_78 : f32 to vector<256x64xf32>
    %171 = arith.mulf %170, %169 : vector<256x64xf32>
    %172 = math.tanh %171 : vector<256x64xf32>
    %cst_79 = arith.constant 1.000000e+00 : f32
    %173 = vector.broadcast %cst_79 : f32 to vector<256x64xf32>
    %174 = arith.addf %173, %172 : vector<256x64xf32>
    %cst_80 = arith.constant 5.000000e-01 : f32
    %175 = vector.broadcast %cst_80 : f32 to vector<256x64xf32>
    %176 = arith.mulf %175, %174 : vector<256x64xf32>
    %177 = arith.mulf %164, %176 : vector<256x64xf32>
    %178 = arith.mulf %163, %177 : vector<256x64xf32>
    %179 = arith.truncf %178 : vector<256x64xf32> to vector<256x64xbf16>
    %cst_81 = arith.constant dense<0.000000e+00> : vector<64x64xf32>
    %180 = tpu.matmul %14, %179, %cst_81 {dimension_numbers = #tpu.dot_dimension_numbers<[1], [0], [0], [1], [0, 0, 1, 1], [], []>} : vector<64x256xbf16>, vector<256x64xbf16>, vector<64x64xf32> -> vector<64x64xf32>
    %181 = vector.broadcast %15 : vector<64x1xf32> to vector<64x64xf32>
    %182 = arith.addf %180, %181 : vector<64x64xf32>
    %183 = arith.addf %182, %142 : vector<64x64xf32>
    %184 = arith.truncf %183 : vector<64x64xf32> to vector<64x64xbf16>
    %cst_82 = arith.constant dense<0.000000e+00> : vector<64x64xf32>
    %185 = tpu.matmul %16, %184, %cst_82 {dimension_numbers = #tpu.dot_dimension_numbers<[1], [0], [0], [1], [0, 0, 1, 1], [], []>} : vector<64x64xbf16>, vector<64x64xbf16>, vector<64x64xf32> -> vector<64x64xf32>
    %186 = vector.broadcast %17 : vector<64x1xf32> to vector<64x64xf32>
    %187 = arith.addf %185, %186 : vector<64x64xf32>
    %188 = arith.addf %187, %19 : vector<64x64xf32>
    %c0_83 = arith.constant 0 : index
    %c0_84 = arith.constant 0 : index
    %c0_85 = arith.constant 0 : index
    %189 = vector.load %arg21[%c0_83, %c0_84, %c0_85] : memref<1x64x64xf32, #tpu.memory_space<vmem>>, vector<1x64x64xf32>
    %190 = vector.shape_cast %189 : vector<1x64x64xf32> to vector<64x64xf32>
    %191 = vector.shape_cast %188 : vector<64x64xf32> to vector<1x64x64xf32>
    tpu.vector_store %arg21[%c0_83, %c0_84, %c0_85], %191 {strides = array<i32>} : memref<1x64x64xf32, #tpu.memory_space<vmem>>, vector<1x64x64xf32>,
    return
  }
  func.func @transform_0(%arg0: i32) -> (i32, i32, i32) {
    %c0_i32 = arith.constant 0 : i32
    %c0_i32_0 = arith.constant 0 : i32
    %c0_i32_1 = arith.constant 0 : i32
    return %arg0, %c0_i32, %c0_i32_0 : i32, i32, i32
  }
  func.func @transform_1(%arg0: i32) -> (i32, i32, i32) {
    %c0_i32 = arith.constant 0 : i32
    %c0_i32_0 = arith.constant 0 : i32
    %c0_i32_1 = arith.constant 0 : i32
    return %arg0, %c0_i32, %c0_i32_0 : i32, i32, i32
  }
  func.func @transform_2(%arg0: i32) -> (i32, i32) {
    %c0_i32 = arith.constant 0 : i32
    %c0_i32_0 = arith.constant 0 : i32
    %c0_i32_1 = arith.constant 0 : i32
    return %c0_i32, %c0_i32_0 : i32, i32
  }
  func.func @transform_3(%arg0: i32) -> (i32, i32) {
    %c0_i32 = arith.constant 0 : i32
    %c0_i32_0 = arith.constant 0 : i32
    %c0_i32_1 = arith.constant 0 : i32
    return %c0_i32, %c0_i32_0 : i32, i32
  }
  func.func @transform_4(%arg0: i32) -> (i32, i32) {
    %c0_i32 = arith.constant 0 : i32
    %c0_i32_0 = arith.constant 0 : i32
    %c0_i32_1 = arith.constant 0 : i32
    return %c0_i32, %c0_i32_0 : i32, i32
  }
  func.func @transform_5(%arg0: i32) -> (i32, i32) {
    %c0_i32 = arith.constant 0 : i32
    %c0_i32_0 = arith.constant 0 : i32
    %c0_i32_1 = arith.constant 0 : i32
    return %c0_i32, %c0_i32_0 : i32, i32
  }
  func.func @transform_6(%arg0: i32) -> (i32, i32) {
    %c0_i32 = arith.constant 0 : i32
    %c0_i32_0 = arith.constant 0 : i32
    %c0_i32_1 = arith.constant 0 : i32
    return %c0_i32, %c0_i32_0 : i32, i32
  }
  func.func @transform_7(%arg0: i32) -> (i32, i32) {
    %c0_i32 = arith.constant 0 : i32
    %c0_i32_0 = arith.constant 0 : i32
    %c0_i32_1 = arith.constant 0 : i32
    return %c0_i32, %c0_i32_0 : i32, i32
  }
  func.func @transform_8(%arg0: i32) -> (i32, i32) {
    %c0_i32 = arith.constant 0 : i32
    %c0_i32_0 = arith.constant 0 : i32
    %c0_i32_1 = arith.constant 0 : i32
    return %c0_i32, %c0_i32_0 : i32, i32
  }
  func.func @transform_9(%arg0: i32) -> (i32, i32) {
    %c0_i32 = arith.constant 0 : i32
    %c0_i32_0 = arith.constant 0 : i32
    %c0_i32_1 = arith.constant 0 : i32
    return %c0_i32, %c0_i32_0 : i32, i32
  }
  func.func @transform_10(%arg0: i32) -> (i32, i32) {
    %c0_i32 = arith.constant 0 : i32
    %c0_i32_0 = arith.constant 0 : i32
    %c0_i32_1 = arith.constant 0 : i32
    return %c0_i32, %c0_i32_0 : i32, i32
  }
  func.func @transform_11(%arg0: i32) -> (i32, i32) {
    %c0_i32 = arith.constant 0 : i32
    %c0_i32_0 = arith.constant 0 : i32
    %c0_i32_1 = arith.constant 0 : i32
    return %c0_i32, %c0_i32_0 : i32, i32
  }
  func.func @transform_12(%arg0: i32) -> (i32, i32) {
    %c0_i32 = arith.constant 0 : i32
    %c0_i32_0 = arith.constant 0 : i32
    %c0_i32_1 = arith.constant 0 : i32
    return %c0_i32, %c0_i32_0 : i32, i32
  }
  func.func @transform_13(%arg0: i32) -> (i32, i32) {
    %c0_i32 = arith.constant 0 : i32
    %c0_i32_0 = arith.constant 0 : i32
    %c0_i32_1 = arith.constant 0 : i32
    return %c0_i32, %c0_i32_0 : i32, i32
  }
  func.func @transform_14(%arg0: i32) -> (i32, i32) {
    %c0_i32 = arith.constant 0 : i32
    %c0_i32_0 = arith.constant 0 : i32
    %c0_i32_1 = arith.constant 0 : i32
    return %c0_i32, %c0_i32_0 : i32, i32
  }
  func.func @transform_15(%arg0: i32) -> (i32, i32) {
    %c0_i32 = arith.constant 0 : i32
    %c0_i32_0 = arith.constant 0 : i32
    %c0_i32_1 = arith.constant 0 : i32
    return %c0_i32, %c0_i32_0 : i32, i32
  }
  func.func @transform_16(%arg0: i32) -> (i32, i32) {
    %c0_i32 = arith.constant 0 : i32
    %c0_i32_0 = arith.constant 0 : i32
    %c0_i32_1 = arith.constant 0 : i32
    return %c0_i32, %c0_i32_0 : i32, i32
  }
  func.func @transform_17(%arg0: i32) -> (i32, i32) {
    %c0_i32 = arith.constant 0 : i32
    %c0_i32_0 = arith.constant 0 : i32
    %c0_i32_1 = arith.constant 0 : i32
    return %c0_i32, %c0_i32_0 : i32, i32
  }
  func.func @transform_18(%arg0: i32) -> (i32, i32) {
    %c0_i32 = arith.constant 0 : i32
    %c0_i32_0 = arith.constant 0 : i32
    %c0_i32_1 = arith.constant 0 : i32
    return %c0_i32, %c0_i32_0 : i32, i32
  }
  func.func @transform_19(%arg0: i32) -> (i32, i32) {
    %c0_i32 = arith.constant 0 : i32
    %c0_i32_0 = arith.constant 0 : i32
    %c0_i32_1 = arith.constant 0 : i32
    return %c0_i32, %c0_i32_0 : i32, i32
  }
  func.func @transform_20(%arg0: i32) -> (i32, i32, i32) {
    %c0_i32 = arith.constant 0 : i32
    %c0_i32_0 = arith.constant 0 : i32
    %c0_i32_1 = arith.constant 0 : i32
    return %arg0, %c0_i32, %c0_i32_0 : i32, i32, i32
  }
}

</mosaic_0001>

<bundles_post_ra>
// kernel: unet_attention_block.1
= control target key start
LH: loop header
LB: loop body
LE: loop exit
PB: predicated region body
PF: predicated region fallthrough
CT: control target
= control target key end

     0   :  { %s7866_s0 = inlined_call_operand.vmem [shape: f32[2,64,64], index: 0, kind: input, shape index: {}]   ;;  %s7867_s1 = inlined_call_operand.vmem [shape: f32[2,64,16], index: 1, kind: input, shape index: {}]   ;;  %s7868_s2 = inlined_call_operand.vmem [shape: bf16[64,64], index: 2, kind: input, shape index: {}]   ;;  %s7869_s3 = inlined_call_operand.vmem [shape: bf16[64,64], index: 3, kind: input, shape index: {}]   ;;  %s7870_s4 = inlined_call_operand.vmem [shape: f32[64,1], index: 4, kind: input, shape index: {}]   ;;  %s7871_s5 = inlined_call_operand.vmem [shape: bf16[192,64], index: 5, kind: input, shape index: {}]   ;;  %s7872_s6 = inlined_call_operand.vmem [shape: f32[192,1], index: 6, kind: input, shape index: {}]   ;;  %s7873_s7 = inlined_call_operand.vmem [shape: bf16[64,64], index: 7, kind: input, shape index: {}]   ;;  %s7874_s8 = inlined_call_operand.vmem [shape: f32[64,1], index: 8, kind: input, shape index: {}]   ;;  %s7875_s9 = inlined_call_operand.vmem [shape: bf16[64,64], index: 9, kind: input, shape index: {}]   ;;  %s7876_s10 = inlined_call_operand.vmem [shape: f32[64,1], index: 10, kind: input, shape index: {}]   ;;  %s7877_s11 = inlined_call_operand.vmem [shape: bf16[128,64], index: 11, kind: input, shape index: {}]   ;;  %s7878_s12 = inlined_call_operand.vmem [shape: bf16[64,64], index: 12, kind: input, shape index: {}]   ;;  %s7879_s13 = inlined_call_operand.vmem [shape: f32[64,1], index: 13, kind: input, shape index: {}]   ;;  %s7880_s14 = inlined_call_operand.vmem [shape: bf16[512,64], index: 14, kind: input, shape index: {}]   ;;  %s7881_s15 = inlined_call_operand.vmem [shape: f32[512,1], index: 15, kind: input, shape index: {}]   ;;  %s7882_s16 = inlined_call_operand.vmem [shape: bf16[64,256], index: 16, kind: input, shape index: {}]   ;;  %s7883_s17 = inlined_call_operand.vmem [shape: f32[64,1], index: 17, kind: input, shape index: {}]   ;;  %s7884_s18 = inlined_call_operand.vmem [shape: bf16[64,64], index: 18, kind: input, shape index: {}]   ;;  %s7885_s19 = inlined_call_operand.vmem [shape: f32[64,1], index: 19, kind: input, shape index: {}]   ;;  %s7886_s20 = inlined_call_operand.vmem [shape: f32[2,64,64], index: 20, kind: output, shape index: {}]  }
   0x1   :  { %7899 = sst [smem:[#allocation32_spill]] %s7866_s0 }
   0x2   :  { %7900 = sst [smem:[#allocation33_spill]] %s7867_s1  ;;  %s5952_s1 = smov 0  }
   0x3   :  { %7901 = sst [smem:[#allocation34_spill]] %s7868_s2 }
   0x4   :  { %7902 = sst [smem:[#allocation35_spill]] %s7869_s3 }
   0x5   :  { %7903 = sst [smem:[#allocation36_spill]] %s7870_s4 }
   0x6 LB: > { %s5064_s22 = sadd.s32 4294967295, %s5843_s1   ;;  %p5068_p0 = scmp.ge.s32.totalorder %s5843_s1, 1  ;;  %s5843_s1 = sphi %s5952_s1, %s30_s1  }
   0x7   : > { %p572_p1 = scmp.lt.s32.totalorder %s5843_s1, 3 }
   0x9   : > { %p573_p2 = pnand %p5068_p0, %p572_p1 }
   0xb   : > { %576 = sbr.rel (%p573_p2) target bundleno = 4086 (0xff6), region = 100 }
  0x10   : > { %p635_p3 = scmp.lt.s32.totalorder %s5064_s22, 1  ;;  %vm963_vm0 = vcmask 523264   ;;  %s7904_s25 = sld [smem:[#allocation32_spill]]  ;;  %v5845_v16 = vmov 64.0   ;;  %v5846_v47 = vmov 0  }
  0x11   : > { %5645 = vrcp.f32 %v5845_v16  ;;  %s7905_s28 = sld [smem:[#allocation34_spill]]  ;;  %5632 = vset.pattern.permute.xlu1 %v5846_v47  ;;  %5630 = vset.pattern.permute.xlu2 %v5846_v47 }
  0x12   : > { %s7974_s22 = smov (!%p635_p3, %s5064_s22), 1  ;;  %5631 = vset.pattern.permute.xlu0 %v5846_v47  ;;  %s7907_s21 = sld [smem:[#allocation35_spill]] }
  0x13   : > { %s5960_s23 = sshll.u32 %s7974_s22, 6  ;;  %s7908_s26 = sld [smem:[#allocation33_spill]] }
  0x14   : > { %s7837_s0 = scalar_lea.vmem %s7886_s20, %s5960_s23 }
  0x16   : > { %s5966_s3 = scalar_lea.vmem %s7904_s25, %s5960_s23  ;;  %s7906_s25 = sld [smem:[#allocation36_spill]] }
  0x17   : > { %v5969_v0 = vld [vmem:[%s5966_s3 + $0x30] sm:$0xff]  ;;  %v5972_v1 = vld [vmem:[%s5966_s3 + $0x20] sm:$0xff]  ;;  %v5984_v6 = vld [vmem:[%s5966_s3 + $0x38] sm:$0xff]  ;;  %v5646_v17 = vpop.eup %5645 }
  0x18   : > { %v5975_v2 = vld [vmem:[%s5966_s3 + $0x10] sm:$0xff]  ;;  %v982_v3 = vsel %vm963_vm0, %v5969_v0, 0.0  ;;  %v976_v4 = vsel %vm963_vm0, %v5972_v1, 0.0  ;;  %v5987_v7 = vld [vmem:[%s5966_s3 + $0x28] sm:$0xff]  ;;  %v5990_v8 = vld [vmem:[%s5966_s3 + $0x18] sm:$0xff]  ;;  %v985_v9 = vsel %vm963_vm0, %v5984_v6, 0.0  ;;  %vm993_vm1 = vweird.f32 %v5646_v17 }
  0x19   : > { %v970_v5 = vsel %vm963_vm0, %v5975_v2, 0.0  ;;  %983 = vadd.xlane.f32.xlu0 %v982_v3  ;;  %977 = vadd.xlane.f32.xlu1 %v976_v4  ;;  %v979_v10 = vsel %vm963_vm0, %v5987_v7, 0.0  ;;  %v973_v11 = vsel %vm963_vm0, %v5990_v8, 0.0  ;;  %v5999_v12 = vld [vmem:[%s5966_s3 + $0x8] sm:$0xff]  ;;  %v6002_v13 = vld [vmem:[%s5966_s3] sm:$0xff]  ;;  %v989_v18 = vmul.f32 64.0, %v5646_v17  ;;  %s644_s27 = scalar_lea.vmem %s7908_s26, %s5960_s23 }
  0x1a   : > { %971 = vadd.xlane.f32.xlu2 %v970_v5  ;;  %v967_v14 = vsel %vm963_vm0, %v5999_v12, 0.0  ;;  %v964_v15 = vsel %vm963_vm0, %v6002_v13, 0.0  ;;  %v6021_v43 = vld [vmem:[%s7905_s28] sm:$0xff]  ;;  %v6028_v44 = vld [vmem:[%s7905_s28 + $0x8] sm:$0xff]  ;;  %v6035_v45 = vld [vmem:[%s7905_s28 + $0x10] sm:$0xff] }
  0x1b   : > { %v990_v19 = vsub.f32 1.0, %v989_v18  ;;  %v6042_v46 = vld [vmem:[%s7905_s28 + $0x18] sm:$0xff] }
  0x1d   : > { %v991_v20 = vmul.f32 %v5646_v17, %v990_v19 }
  0x1f   : > { %v992_v23 = vadd.f32 %v5646_v17, %v991_v20 }
  0x21   : > { %986 = vadd.xlane.f32.xlu0 %v985_v9  ;;  %980 = vadd.xlane.f32.xlu1 %v979_v10  ;;  %v6008_v25 = vsel %vm993_vm1, %v5646_v17, %v992_v23 }
  0x22   : > { %974 = vadd.xlane.f32.xlu2 %v973_v11 }
  0x29   : > { %968 = vadd.xlane.f32.xlu1 %v967_v14  ;;  %965 = vadd.xlane.f32.xlu0 %v964_v15 }
  0x8c   : > { %v984_v21 = vpop.xlane.xlu0 %983  ;;  %v978_v22 = vpop.xlane.xlu1 %977 }
  0x8d   : > { %v972_v24 = vpop.xlane.xlu2 %971  ;;  %v1001_v28 = vmul.f32 %v6008_v25, %v984_v21  ;;  %v999_v33 = vmul.f32 %v6008_v25, %v978_v22 }
  0x8e   : > { %v997_v34 = vmul.f32 %v6008_v25, %v972_v24 }
  0x94   : > { %v987_v26 = vpop.xlane.xlu0 %986  ;;  %v981_v27 = vpop.xlane.xlu1 %980 }
  0x95   : > { %v1002_v29 = vmul.f32 %v6008_v25, %v987_v26  ;;  %v1000_v30 = vmul.f32 %v6008_v25, %v981_v27  ;;  %v975_v32 = vpop.xlane.xlu2 %974 }
  0x96   : > { %v998_v35 = vmul.f32 %v6008_v25, %v975_v32 }
  0x97   : > { %v1006_v31 = vpack.c.bf16 %v1002_v29, %v1001_v28  ;;  %v1005_v36 = vpack.c.bf16 %v1000_v30, %v999_v33 }
  0x98   : > { %v1004_v41 = vpack.c.bf16 %v998_v35, %v997_v34 }
  0x99   : > { %1043 = vmatpush.bf16.msra.mxu0 %v1006_v31 }
  0x9c   : > { %v969_v37 = vpop.xlane.xlu1 %968  ;;  %v966_v38 = vpop.xlane.xlu0 %965 }
  0x9d   : > { %1044 = vmatpush.bf16.msra.mxu0 %v1005_v36  ;;  %v996_v39 = vmul.f32 %v6008_v25, %v969_v37  ;;  %v995_v40 = vmul.f32 %v6008_v25, %v966_v38 }
  0x9f   : > { %v1003_v42 = vpack.c.bf16 %v996_v39, %v995_v40 }
  0xa1   : > { %1045 = vmatpush.bf16.msra.mxu0 %v1004_v41 }
  0xa5   : > { %1046 = vmatpush.bf16.msra.mxu0 %v1003_v42 }
  0xa8   : > { %5091 = vmatmul.msk.bf16.vlgmr.msra.gmra.mxu0 %vm963_vm0, %v6021_v43 }
  0xb8   : > { %5092 = vmatmul.msk.bf16.gmra.mxu0 %vm963_vm0, %v6028_v44 }
  0xc8   : > { %5093 = vmatmul.msk.bf16.gmra.mxu0 %vm963_vm0, %v6035_v45 }
  0xd8   : > { %5094 = vmatmul.msk.bf16.gmra.mxu0 %vm963_vm0, %v6042_v46 }
 0x125   : > { %v1048_v48 = vpop.f32.mrf.mxu0 }
 0x12d   : > { %v1050_v49 = vpop.f32.mrf.mxu0 }
 0x135   : > { %v1053_v50 = vpop.f32.mrf.mxu0 }
 0x13d   : > { %v1055_v51 = vpop.f32.mrf.mxu0 }
 0x145   : > { %v1058_v52 = vpop.f32.mrf.mxu0 }
 0x146   : > { %1090 = vperm.xlu1 %5632, %v1058_v52  }
 0x14d   : > { %v1060_v53 = vpop.f32.mrf.mxu0 }
 0x14e   : > { %1085 = vperm.xlu1 %5632, %v1055_v51  }
 0x155   : > { %v1063_v54 = vpop.f32.mrf.mxu0 }
 0x156   : > { %1075 = vperm.xlu1 %5632, %v1050_v49   ;;  %1100 = vperm.xlu2 %5630, %v1063_v54  }
 0x15d   : > { %v1065_v55 = vpop.f32.mrf.mxu0 }
 0x15e   : > { %1095 = vperm.xlu2 %5630, %v1060_v53   ;;  %1105 = vperm.xlu0 %5631, %v1065_v55  }
 0x166   : > { %1080 = vperm.xlu2 %5630, %v1053_v50  }
 0x16e   : > { %1070 = vperm.xlu2 %5630, %v1048_v48  }
 0x1b0   : > { %v1101_v56 = vpop.permute.xlu2 %1100 }
 0x1b1   : > { %v6047_v57 = vsub.f32 %v5969_v0, %v1101_v56 }
 0x1b3   : > { %v1122_v58 = vmul.f32 %v6047_v57, %v6047_v57 }
 0x1b5   : > { %v1142_v59 = vsel %vm963_vm0, %v1122_v58, 0.0 }
 0x1b6   : > { %1143 = vadd.xlane.f32.xlu0 %v1142_v59 }
 0x1b8   : > { %v1091_v60 = vpop.permute.xlu1 %1090  ;;  %v1096_v61 = vpop.permute.xlu2 %1095 }
 0x1b9   : > { %v6053_v62 = vsub.f32 %v5972_v1, %v1091_v60  ;;  %v6082_v20 = vsub.f32 %v5987_v7, %v1096_v61 }
 0x1bb   : > { %v1120_v63 = vmul.f32 %v6053_v62, %v6053_v62 }
 0x1bd   : > { %v1136_v3 = vsel %vm963_vm0, %v1120_v63, 0.0 }
 0x1be   : > { %1137 = vadd.xlane.f32.xlu1 %v1136_v3 }
 0x1c0   : > { %v1086_v4 = vpop.permute.xlu1 %1085  ;;  %v1081_v0 = vpop.permute.xlu2 %1080 }
 0x1c1   : > { %v6059_v5 = vsub.f32 %v5990_v8, %v1086_v4  ;;  %v6062_v9 = vsub.f32 %v5975_v2, %v1081_v0 }
 0x1c3   : > { %v1119_v10 = vmul.f32 %v6059_v5, %v6059_v5  ;;  %v1118_v1 = vmul.f32 %v6062_v9, %v6062_v9 }
 0x1c5   : > { %v1133_v11 = vsel %vm963_vm0, %v1119_v10, 0.0  ;;  %v1130_v14 = vsel %vm963_vm0, %v1118_v1, 0.0 }
 0x1c6   : > { %1134 = vadd.xlane.f32.xlu1 %v1133_v11  ;;  %1131 = vadd.xlane.f32.xlu0 %v1130_v14 }
 0x1c8   : > { %v1076_v15 = vpop.permute.xlu1 %1075  ;;  %v1071_v22 = vpop.permute.xlu2 %1070 }
 0x1c9   : > { %v6071_v16 = vsub.f32 %v5999_v12, %v1076_v15  ;;  %v1121_v12 = vmul.f32 %v6082_v20, %v6082_v20  ;;  %v6088_v23 = vsub.f32 %v6002_v13, %v1071_v22 }
 0x1cb   : > { %v1117_v2 = vmul.f32 %v6071_v16, %v6071_v16  ;;  %v1139_v24 = vsel %vm963_vm0, %v1121_v12, 0.0 }
 0x1cd   : > { %v1127_v8 = vsel %vm963_vm0, %v1117_v2, 0.0 }
 0x1ce   : > { %1128 = vadd.xlane.f32.xlu0 %v1127_v8 }
 0x1d0   : > { %v1106_v17 = vpop.permute.xlu0 %1105 }
 0x1d1   : > { %v6077_v18 = vsub.f32 %v5984_v6, %v1106_v17  ;;  %v1116_v6 = vmul.f32 %v6088_v23, %v6088_v23 }
 0x1d3   : > { %v1123_v19 = vmul.f32 %v6077_v18, %v6077_v18  ;;  %v1124_v26 = vsel %vm963_vm0, %v1116_v6, 0.0 }
 0x1d5   : > { %v1145_v21 = vsel %vm963_vm0, %v1123_v19, 0.0 }
 0x1d6   : > { %1146 = vadd.xlane.f32.xlu2 %v1145_v21 }
 0x1de   : > { %1140 = vadd.xlane.f32.xlu2 %v1139_v24 }
 0x1e6   : > { %1125 = vadd.xlane.f32.xlu2 %v1124_v26 }
 0x229   : > { %v1144_v7 = vpop.xlane.xlu0 %1143 }
 0x22a   : > { %v1154_v29 = vmul.f32 %v1144_v7, %v6008_v25 }
 0x231   : > { %v1138_v27 = vpop.xlane.xlu1 %1137 }
 0x232   : > { %v1152_v34 = vmul.f32 %v1138_v27, %v6008_v25 }
 0x239   : > { %v1132_v32 = vpop.xlane.xlu0 %1131  ;;  %v1135_v13 = vpop.xlane.xlu1 %1134 }
 0x23a   : > { %v1151_v36 = vmul.f32 %v1135_v13, %v6008_v25  ;;  %v1150_v37 = vmul.f32 %v1132_v32, %v6008_v25 }
 0x23c   : > { %v1157_v40 = vpack.c.bf16 %v1151_v36, %v1150_v37 }
 0x241   : > { %v1129_v39 = vpop.xlane.xlu0 %1128 }
 0x242   : > { %v1149_v42 = vmul.f32 %v1129_v39, %v6008_v25 }
 0x249   : > { %v1147_v28 = vpop.xlane.xlu2 %1146 }
 0x24a   : > { %v1155_v30 = vmul.f32 %v1147_v28, %v6008_v25 }
 0x24c   : > { %v1159_v31 = vpack.c.bf16 %v1155_v30, %v1154_v29 }
 0x24e   : > { %1164 = vmatpush.bf16.msra.mxu1 %v1159_v31 }
 0x251   : > { %v1141_v33 = vpop.xlane.xlu2 %1140 }
 0x252   : > { %v1153_v35 = vmul.f32 %v1141_v33, %v6008_v25 }
 0x254   : > { %v1158_v38 = vpack.c.bf16 %v1153_v35, %v1152_v34 }
 0x256   : > { %1165 = vmatpush.bf16.msra.mxu1 %v1158_v38 }
 0x259   : > { %v1126_v41 = vpop.xlane.xlu2 %1125 }
 0x25a   : > { %v1148_v47 = vmul.f32 %v1126_v41, %v6008_v25  ;;  %1166 = vmatpush.bf16.msra.mxu1 %v1157_v40 }
 0x25c   : > { %v1156_v48 = vpack.c.bf16 %v1149_v42, %v1148_v47 }
 0x25e   : > { %1167 = vmatpush.bf16.msra.mxu1 %v1156_v48 }
 0x261   : > { %5095 = vmatmul.msk.bf16.vlgmr.msra.gmra.mxu1 %vm963_vm0, %v6021_v43 }
 0x271   : > { %5096 = vmatmul.msk.bf16.gmra.mxu1 %vm963_vm0, %v6028_v44 }
 0x281   : > { %5097 = vmatmul.msk.bf16.gmra.mxu1 %vm963_vm0, %v6035_v45 }
 0x291   : > { %5098 = vmatmul.msk.bf16.gmra.mxu1 %vm963_vm0, %v6042_v46 }
 0x2de   : > { %v1169_v49 = vpop.f32.mrf.mxu1 }
 0x2df   : > { %v6120_v14 = vadd.f32 1e-06, %v1169_v49 }
 0x2e6   : > { %v1171_v50 = vpop.f32.mrf.mxu1 }
 0x2e7   : > { %v6110_v56 = vadd.f32 1e-06, %v1171_v50 }
 0x2e9   : > { %vm1205_vm10 = vweird.f32 %v6110_v56 }
 0x2ee   : > { %v1174_v51 = vpop.f32.mrf.mxu1 }
 0x2ef   : > { %v1175_v53 = vadd.f32 1e-06, %v1174_v51 }
 0x2f1   : > { %5647 = vrsqrt.f32 %v1175_v53  ;;  %vm1215_vm6 = vweird.f32 %v1175_v53 }
 0x2f6   : > { %v1176_v52 = vpop.f32.mrf.mxu1 }
 0x2f7   : > { %v5648_v43 = vpop.eup %5647  ;;  %v6123_v8 = vadd.f32 1e-06, %v1176_v52 }
 0x2f8   : > { %v1210_v44 = vmul.f32 %v5648_v43, %v1175_v53  ;;  %vm1216_vm5 = vweird.f32 %v5648_v43 }
 0x2f9   : > { %vm1217_vm7 = vmor %vm1215_vm6, %vm1216_vm5 }
 0x2fa   : > { %v1211_v61 = vmul.f32 %v5648_v43, %v1210_v44  ;;  %v669_v44 = vld [vmem:[%s7906_s25 + $0x10] sm:$0xff] }
 0x2fc   : > { %v1212_v0 = vmul.f32 0.5, %v1211_v61 }
 0x2fe   : > { %v1179_v54 = vpop.f32.mrf.mxu1  ;;  %v1213_v17 = vsub.f32 1.5, %v1212_v0  ;;  %v667_v0 = vld [vmem:[%s7906_s25] sm:$0xff] }
 0x2ff   : > { %v1180_v55 = vadd.f32 1e-06, %v1179_v54 }
 0x300   : > { %v1214_v6 = vmul.f32 %v5648_v43, %v1213_v17  ;;  %v710_v17 = vld [vmem:[%s7872_s6 + $0x58] sm:$0xff] }
 0x301   : > { %5649 = vrsqrt.f32 %v1180_v55  ;;  %vm1235_vm3 = vweird.f32 %v1180_v55 }
 0x302   : > { %5651 = vrsqrt.f32 %v6110_v56  ;;  %v1218_v32 = vsel %vm1217_vm7, %v5648_v43, %v1214_v6  ;;  %vm1195_vm7 = vweird.f32 %v6120_v14  ;;  %v713_v6 = vld [vmem:[%s7872_s6 + $0x70] sm:$0xff] }
 0x306   : > { %v1181_v58 = vpop.f32.mrf.mxu1 }
 0x307   : > { %v5650_v45 = vpop.eup %5649  ;;  %v6113_v60 = vadd.f32 1e-06, %v1181_v58 }
 0x308   : > { %v1230_v59 = vmul.f32 %v5650_v45, %v1180_v55  ;;  %v6115_v46 = vpop.eup %5651  ;;  %vm1236_vm2 = vweird.f32 %v5650_v45 }
 0x309   : > { %v1200_v4 = vmul.f32 %v6115_v46, %v6110_v56  ;;  %5653 = vrsqrt.f32 %v6113_v60  ;;  %vm1237_vm4 = vmor %vm1235_vm3, %vm1236_vm2  ;;  %vm1206_vm8 = vweird.f32 %v6115_v46  ;;  %vm1245_vm1 = vweird.f32 %v6113_v60 }
 0x30a   : > { %v1231_v63 = vmul.f32 %v5650_v45, %v1230_v59  ;;  %vm1207_vm12 = vmor %vm1205_vm10, %vm1206_vm8  ;;  %vm1225_vm8 = vweird.f32 %v6123_v8 }
 0x30b   : > { %v1201_v2 = vmul.f32 %v6115_v46, %v1200_v4 }
 0x30c   : > { %v1232_v3 = vmul.f32 0.5, %v1231_v63  ;;  %v672_v63 = vld [vmem:[%s7906_s25 + $0x28] sm:$0xff] }
 0x30d   : > { %v1202_v12 = vmul.f32 0.5, %v1201_v2  ;;  %v673_v2 = vld [vmem:[%s7906_s25 + $0x30] sm:$0xff] }
 0x30e   : > { %v1233_v10 = vsub.f32 1.5, %v1232_v3  ;;  %v1184_v1 = vpop.f32.mrf.mxu1 }
 0x30f   : > { %v1185_v11 = vadd.f32 1e-06, %v1184_v1  ;;  %v6125_v21 = vpop.eup %5653  ;;  %v1203_v28 = vsub.f32 1.5, %v1202_v12  ;;  %v707_v1 = vld [vmem:[%s7872_s6 + $0x40] sm:$0xff]  ;;  %v714_v12 = vld [vmem:[%s7872_s6 + $0x78] sm:$0xff] }
 0x310   : > { %v1234_v15 = vmul.f32 %v5650_v45, %v1233_v10  ;;  %v1240_v22 = vmul.f32 %v6125_v21, %v6113_v60  ;;  %vm1246_vm14 = vweird.f32 %v6125_v21  ;;  %v668_v10 = vld [vmem:[%s7906_s25 + $0x8] sm:$0xff] }
 0x311   : > { %5655 = vrsqrt.f32 %v1185_v11  ;;  %v1204_v35 = vmul.f32 %v6115_v46, %v1203_v28  ;;  %vm1255_vm11 = vweird.f32 %v1185_v11  ;;  %vm1247_vm3 = vmor %vm1245_vm1, %vm1246_vm14  ;;  %v711_v28 = vld [vmem:[%s7872_s6 + $0x60] sm:$0xff]  ;;  %vm1834_vm14 = vcmask 130048  }
 0x312   : > { %v1238_v19 = vsel %vm1237_vm4, %v5650_v45, %v1234_v15  ;;  %5657 = vrsqrt.f32 %v6120_v14  ;;  %v1241_v30 = vmul.f32 %v6125_v21, %v1240_v22  ;;  %v700_v15 = vld [vmem:[%s7872_s6 + $0x8] sm:$0xff]  ;;  %v709_v22 = vld [vmem:[%s7872_s6 + $0x50] sm:$0xff] }
 0x313   : > { %1291 = vperm.xlu0 %5631, %v1238_v19   ;;  %5659 = vrsqrt.f32 %v6123_v8  ;;  %v1208_v47 = vsel %vm1207_vm12, %v6115_v46, %v1204_v35  ;;  %v708_v19 = vld [vmem:[%s7872_s6 + $0x48] sm:$0xff] }
 0x314   : > { %v1242_v38 = vmul.f32 0.5, %v1241_v30  ;;  %v704_v30 = vld [vmem:[%s7872_s6 + $0x28] sm:$0xff] }
 0x316   : > { %v1186_v24 = vpop.f32.mrf.mxu1  ;;  %v1243_v51 = vsub.f32 1.5, %v1242_v38 }
 0x317   : > { %v5656_v26 = vpop.eup %5655  ;;  %v1187_v7 = vadd.f32 1e-06, %v1186_v24  ;;  %v702_v24 = vld [vmem:[%s7872_s6 + $0x18] sm:$0xff] }
 0x318   : > { %v1250_v27 = vmul.f32 %v5656_v26, %v1185_v11  ;;  %v5658_v29 = vpop.eup %5657  ;;  %vm1256_vm9 = vweird.f32 %v5656_v26  ;;  %v1244_v55 = vmul.f32 %v6125_v21, %v1243_v51  ;;  %v670_v11 = vld [vmem:[%s7906_s25 + $0x18] sm:$0xff] }
 0x319   : > { %5661 = vrsqrt.f32 %v1187_v7  ;;  %v5660_v13 = vpop.eup %5659  ;;  %v1190_v34 = vmul.f32 %v5658_v29, %v6120_v14  ;;  %vm1257_vm13 = vmor %vm1255_vm11, %vm1256_vm9  ;;  %vm1265_vm2 = vweird.f32 %v1187_v7  ;;  %vm1196_vm5 = vweird.f32 %v5658_v29  ;;  %v671_v14 = vld [vmem:[%s7906_s25 + $0x20] sm:$0xff] }
 0x31a   : > { %v1251_v31 = vmul.f32 %v5656_v26, %v1250_v27  ;;  %v1220_v36 = vmul.f32 %v5660_v13, %v6123_v8  ;;  %v1248_v59 = vsel %vm1247_vm3, %v6125_v21, %v1244_v55  ;;  %vm1226_vm6 = vweird.f32 %v5660_v13  ;;  %vm1197_vm9 = vmor %vm1195_vm7, %vm1196_vm5  ;;  %v674_v8 = vld [vmem:[%s7906_s25 + $0x38] sm:$0xff]  ;;  %v699_v21 = vld [vmem:[%s7872_s6] sm:$0xff] }
 0x31b   : > { %1281 = vperm.xlu0 %5631, %v1218_v32   ;;  %v1191_v42 = vmul.f32 %v5658_v29, %v1190_v34  ;;  %vm1227_vm10 = vmor %vm1225_vm8, %vm1226_vm6  ;;  %v706_v27 = vld [vmem:[%s7872_s6 + $0x38] sm:$0xff] }
 0x31c   : > { %v1252_v33 = vmul.f32 0.5, %v1251_v31  ;;  %v1221_v48 = vmul.f32 %v5660_v13, %v1220_v36 }
 0x31d   : > { %v1192_v53 = vmul.f32 0.5, %v1191_v42 }
 0x31e   : > { %v1253_v37 = vsub.f32 1.5, %v1252_v33  ;;  %v1222_v56 = vmul.f32 0.5, %v1221_v48 }
 0x31f   : > { %v5662_v39 = vpop.eup %5661  ;;  %v1193_v58 = vsub.f32 1.5, %v1192_v53 }
 0x320   : > { %v1260_v40 = vmul.f32 %v5662_v39, %v1187_v7  ;;  %v1254_v41 = vmul.f32 %v5656_v26, %v1253_v37  ;;  %vm1266_vm15 = vweird.f32 %v5662_v39  ;;  %v1223_v46 = vsub.f32 1.5, %v1222_v56  ;;  %v701_v7 = vld [vmem:[%s7872_s6 + $0x10] sm:$0xff] }
 0x321   : > { %vm1267_vm4 = vmor %vm1265_vm2, %vm1266_vm15  ;;  %v1194_v60 = vmul.f32 %v5658_v29, %v1193_v58 }
 0x322   : > { %v1261_v49 = vmul.f32 %v5662_v39, %v1260_v40  ;;  %v1258_v50 = vsel %vm1257_vm13, %v5656_v26, %v1254_v41  ;;  %v1224_v61 = vmul.f32 %v5660_v13, %v1223_v46  ;;  %v712_v26 = vld [vmem:[%s7872_s6 + $0x68] sm:$0xff] }
 0x323   : > { %1301 = vperm.xlu1 %5632, %v1258_v50   ;;  %1276 = vperm.xlu0 %5631, %v1208_v47   ;;  %v1198_v4 = vsel %vm1197_vm9, %v5658_v29, %v1194_v60  ;;  %v705_v29 = vld [vmem:[%s7872_s6 + $0x30] sm:$0xff] }
 0x324   : > { %v1262_v52 = vmul.f32 0.5, %v1261_v49  ;;  %v1228_v3 = vsel %vm1227_vm10, %v5660_v13, %v1224_v61 }
 0x326   : > { %v1263_v54 = vsub.f32 1.5, %v1262_v52 }
 0x328   : > { %v1264_v43 = vmul.f32 %v5662_v39, %v1263_v54 }
 0x32a   : > { %v1268_v45 = vsel %vm1267_vm4, %v5662_v39, %v1264_v43 }
 0x32b   : > { %1306 = vperm.xlu2 %5630, %v1268_v45   ;;  %1296 = vperm.xlu1 %5632, %v1248_v59  }
 0x32c   : > { %1333 = vperm.xlu0 %5631, %v669_v44  }
 0x333   : > { %1286 = vperm.xlu2 %5630, %v1228_v3   ;;  %1271 = vperm.xlu1 %5632, %v1198_v4  }
 0x334   : > { %1348 = vperm.xlu0 %5631, %v672_v63  }
 0x33b   : > { %1323 = vperm.xlu2 %5630, %v667_v0   ;;  %1328 = vperm.xlu1 %5632, %v668_v10  }
 0x33c   : > { %1547 = vperm.xlu0 %5631, %v707_v1  }
 0x343   : > { %1338 = vperm.xlu2 %5630, %v670_v11   ;;  %1343 = vperm.xlu1 %5632, %v671_v14  }
 0x344   : > { %1512 = vperm.xlu0 %5631, %v700_v15  }
 0x34b   : > { %1353 = vperm.xlu2 %5630, %v673_v2   ;;  %1358 = vperm.xlu1 %5632, %v674_v8  }
 0x34c   : > { %1562 = vperm.xlu0 %5631, %v710_v17  }
 0x353   : > { %1552 = vperm.xlu2 %5630, %v708_v19   ;;  %1507 = vperm.xlu1 %5632, %v699_v21  }
 0x354   : > { %1582 = vperm.xlu0 %5631, %v714_v12  }
 0x35b   : > { %1557 = vperm.xlu1 %5632, %v709_v22  }
 0x35c   : > { %1522 = vperm.xlu0 %5631, %v702_v24  }
 0x363   : > { %1577 = vperm.xlu1 %5632, %v713_v6  }
 0x364   : > { %1572 = vperm.xlu0 %5631, %v712_v26  }
 0x36b   : > { %1517 = vperm.xlu1 %5632, %v701_v7  }
 0x36c   : > { %1542 = vperm.xlu0 %5631, %v706_v27  }
 0x373   : > { %1567 = vperm.xlu1 %5632, %v711_v28  }
 0x37b   : > { %1537 = vperm.xlu1 %5632, %v705_v29  }
 0x383   : > { %1532 = vperm.xlu1 %5632, %v704_v30  }
 0x385   : > { %v1292_v31 = vpop.permute.xlu0 %1291  ;;  %v1307_v32 = vpop.permute.xlu2 %1306 }
 0x386   : > { %v1316_v33 = vmul.f32 %v1307_v32, %v6077_v18  ;;  %v1313_v39 = vmul.f32 %v1292_v31, %v6053_v62  ;;  %v5528_v62 = vld [vmem:[%s7907_s21] sm:$0xff] }
 0x38d   : > { %v1282_v36 = vpop.permute.xlu0 %1281  ;;  %v1287_v37 = vpop.permute.xlu2 %1286 }
 0x38e   : > { %v1312_v41 = vmul.f32 %v1287_v37, %v6059_v5  ;;  %v1311_v42 = vmul.f32 %v1282_v36, %v6062_v9  ;;  %v5529_v5 = vld [vmem:[%s7907_s21 + $0x8] sm:$0xff]  ;;  %v5530_v9 = vld [vmem:[%s7907_s21 + $0x10] sm:$0xff] }
 0x390   : > { %v1318_v49 = vpack.c.bf16 %v1312_v41, %v1311_v42 }
 0x395   : > { %v1302_v13 = vpop.permute.xlu1 %1301  ;;  %v1277_v48 = vpop.permute.xlu0 %1276 }
 0x396   : > { %v1315_v34 = vmul.f32 %v1302_v13, %v6047_v57  ;;  %v1310_v57 = vmul.f32 %v1277_v48, %v6071_v16  ;;  %v5531_v16 = vld [vmem:[%s7907_s21 + $0x18] sm:$0xff]  ;;  %v1324_v54 = vpop.permute.xlu2 %1323 }
 0x398   : > { %v1320_v35 = vpack.c.bf16 %v1316_v33, %v1315_v34 }
 0x39a   : > { %1397 = vmatpush.bf16.msra.mxu2 %v1320_v35 }
 0x39d   : > { %v1297_v38 = vpop.permute.xlu1 %1296 }
 0x39e   : > { %v1314_v40 = vmul.f32 %v1297_v38, %v6082_v20  ;;  %v1334_v43 = vpop.permute.xlu0 %1333  ;;  %v1339_v44 = vpop.permute.xlu2 %1338 }
 0x3a0   : > { %v1319_v47 = vpack.c.bf16 %v1314_v40, %v1313_v39 }
 0x3a2   : > { %1398 = vmatpush.bf16.msra.mxu2 %v1319_v47 }
 0x3a5   : > { %v1272_v18 = vpop.permute.xlu1 %1271 }
 0x3a6   : > { %v1309_v50 = vmul.f32 %v1272_v18, %v6088_v23  ;;  %1399 = vmatpush.bf16.msra.mxu2 %v1318_v49  ;;  %v1349_v10 = vpop.permute.xlu0 %1348  ;;  %v1354_v2 = vpop.permute.xlu2 %1353 }
 0x3a8   : > { %v1317_v51 = vpack.c.bf16 %v1310_v57, %v1309_v50 }
 0x3aa   : > { %1400 = vmatpush.bf16.msra.mxu2 %v1317_v51 }
 0x3ad   : > { %5115 = vmatmul.msk.bf16.vlgmr.msra.gmra.mxu2 %vm963_vm0, %v5528_v62  ;;  %v1329_v56 = vpop.permute.xlu1 %1328 }
 0x3b5   : > { %v1344_v63 = vpop.permute.xlu1 %1343 }
 0x3bd   : > { %5116 = vmatmul.msk.bf16.gmra.mxu2 %vm963_vm0, %v5529_v5  ;;  %v1359_v6 = vpop.permute.xlu1 %1358 }
 0x3cd   : > { %5117 = vmatmul.msk.bf16.gmra.mxu2 %vm963_vm0, %v5530_v9 }
 0x3dd   : > { %5118 = vmatmul.msk.bf16.gmra.mxu2 %vm963_vm0, %v5531_v16 }
 0x430   : > { %v1402_v20 = vpop.f32.mrf.mxu2 }
 0x431   : > { %v6239_v59 = vadd.f32 %v1402_v20, %v1324_v54 }
 0x433   : > { %v1422_v3 = vsel %vm963_vm0, %v6239_v59, 0.0 }
 0x438   : > { %v1404_v23 = vpop.f32.mrf.mxu2 }
 0x439   : > { %v6237_v45 = vadd.f32 %v1404_v23, %v1329_v56 }
 0x43b   : > { %v1423_v61 = vsel %vm963_vm0, %v6237_v45, 0.0 }
 0x43c   : > { %v1424_v1 = vadd.f32 %v1423_v61, %v1422_v3 }
 0x440   : > { %v1407_v52 = vpop.f32.mrf.mxu2 }
 0x441   : > { %v6241_v46 = vadd.f32 %v1407_v52, %v1334_v43 }
 0x443   : > { %v1425_v4 = vsel %vm963_vm0, %v6241_v46, 0.0 }
 0x444   : > { %v1426_v8 = vadd.f32 %v1425_v4, %v1424_v1 }
 0x448   : > { %v1409_v53 = vpop.f32.mrf.mxu2 }
 0x449   : > { %v6245_v60 = vadd.f32 %v1409_v53, %v1339_v44 }
 0x44b   : > { %v1427_v14 = vsel %vm963_vm0, %v6245_v60, 0.0 }
 0x44c   : > { %v1428_v21 = vadd.f32 %v1427_v14, %v1426_v8 }
 0x450   : > { %v1412_v55 = vpop.f32.mrf.mxu2 }
 0x451   : > { %v6251_v0 = vadd.f32 %v1412_v55, %v1344_v63 }
 0x453   : > { %v1429_v17 = vsel %vm963_vm0, %v6251_v0, 0.0 }
 0x454   : > { %v1430_v22 = vadd.f32 %v1429_v17, %v1428_v21 }
 0x458   : > { %v1414_v58 = vpop.f32.mrf.mxu2 }
 0x459   : > { %v6255_v15 = vadd.f32 %v1414_v58, %v1349_v10 }
 0x45b   : > { %v1431_v12 = vsel %vm963_vm0, %v6255_v15, 0.0 }
 0x45c   : > { %v1432_v26 = vadd.f32 %v1431_v12, %v1430_v22 }
 0x460   : > { %v1417_v11 = vpop.f32.mrf.mxu2 }
 0x461   : > { %v6259_v19 = vadd.f32 %v1417_v11, %v1354_v2 }
 0x463   : > { %v1433_v24 = vsel %vm963_vm0, %v6259_v19, 0.0 }
 0x464   : > { %v1434_v28 = vadd.f32 %v1433_v24, %v1432_v26 }
 0x468   : > { %v1419_v7 = vpop.f32.mrf.mxu2 }
 0x469   : > { %v6265_v27 = vadd.f32 %v1419_v7, %v1359_v6 }
 0x46b   : > { %v1435_v29 = vsel %vm963_vm0, %v6265_v27, 0.0 }
 0x46c   : > { %v1436_v30 = vadd.f32 %v1435_v29, %v1434_v28 }
 0x46e   : > { %v1437_v31 = vrot.slane %v1436_v30, 4 }
 0x470   : > { %v1438_v32 = vadd.f32 %v1437_v31, %v1436_v30 }
 0x472   : > { %v1439_v13 = vrot.slane %v1438_v32, 2 }
 0x474   : > { %v1440_v33 = vadd.f32 %v1439_v13, %v1438_v32 }
 0x476   : > { %v1441_v34 = vrot.slane %v1440_v33, 1 }
 0x478   : > { %v1442_v35 = vadd.f32 %v1441_v34, %v1440_v33 }
 0x47a   : > { %v1443_v36 = vmul.f32 %v1442_v35, %v6008_v25 }
 0x47c   : > { %v1444_v37 = vsub.f32 %v6239_v59, %v1443_v36  ;;  %v1445_v38 = vsub.f32 %v6237_v45, %v1443_v36  ;;  %v1446_v39 = vsub.f32 %v6241_v46, %v1443_v36  ;;  %v1447_v40 = vsub.f32 %v6245_v60, %v1443_v36 }
 0x47d   : > { %v1448_v41 = vsub.f32 %v6251_v0, %v1443_v36  ;;  %v1449_v49 = vsub.f32 %v6255_v15, %v1443_v36  ;;  %v1450_v62 = vsub.f32 %v6259_v19, %v1443_v36  ;;  %v1451_v20 = vsub.f32 %v6265_v27, %v1443_v36 }
 0x47e   : > { %v1452_v42 = vmul.f32 %v1444_v37, %v1444_v37  ;;  %v1453_v47 = vmul.f32 %v1445_v38, %v1445_v38  ;;  %v1454_v48 = vmul.f32 %v1446_v39, %v1446_v39  ;;  %v1455_v18 = vmul.f32 %v1447_v40, %v1447_v40 }
 0x47f   : > { %v1456_v5 = vmul.f32 %v1448_v41, %v1448_v41  ;;  %v1457_v23 = vmul.f32 %v1449_v49, %v1449_v49  ;;  %v1458_v54 = vmul.f32 %v1450_v62, %v1450_v62  ;;  %v1459_v43 = vmul.f32 %v1451_v20, %v1451_v20 }
 0x480   : > { %v1460_v57 = vsel %vm963_vm0, %v1452_v42, 0.0  ;;  %v1461_v50 = vsel %vm963_vm0, %v1453_v47, 0.0  ;;  %v1463_v9 = vsel %vm963_vm0, %v1454_v48, 0.0  ;;  %v1465_v52 = vsel %vm963_vm0, %v1455_v18, 0.0  ;;  %v5535_v18 = vld [vmem:[%s7871_s5 + $0x18] sm:$0xff] }
 0x481   : > { %v1462_v51 = vadd.f32 %v1461_v50, %v1460_v57  ;;  %v1467_v55 = vsel %vm963_vm0, %v1456_v5, 0.0  ;;  %v1469_v44 = vsel %vm963_vm0, %v1457_v23, 0.0  ;;  %v1471_v61 = vsel %vm963_vm0, %v1458_v54, 0.0  ;;  %v5536_v57 = vld [vmem:[%s7871_s5 + $0x20] sm:$0xff]  ;;  %v6319_v50 = vpop.permute.xlu0 %1547 }
 0x482   : > { %v1473_v3 = vsel %vm963_vm0, %v1459_v43, 0.0 }
 0x483   : > { %v1464_v16 = vadd.f32 %v1463_v9, %v1462_v51  ;;  %v1508_v51 = vpop.permute.xlu1 %1507 }
 0x485   : > { %v1466_v53 = vadd.f32 %v1465_v52, %v1464_v16 }
 0x487   : > { %v1468_v56 = vadd.f32 %v1467_v55, %v1466_v53 }
 0x489   : > { %v1470_v58 = vadd.f32 %v1469_v44, %v1468_v56 }
 0x48b   : > { %v1472_v63 = vadd.f32 %v1471_v61, %v1470_v58  ;;  %v1558_v5 = vpop.permute.xlu1 %1557 }
 0x48d   : > { %v1474_v4 = vadd.f32 %v1473_v3, %v1472_v63 }
 0x48f   : > { %v1475_v10 = vrot.slane %v1474_v4, 4 }
 0x491   : > { %v1476_v1 = vadd.f32 %v1475_v10, %v1474_v4 }
 0x493   : > { %v1477_v11 = vrot.slane %v1476_v1, 2  ;;  %v1578_v16 = vpop.permute.xlu1 %1577 }
 0x495   : > { %v1478_v14 = vadd.f32 %v1477_v11, %v1476_v1 }
 0x497   : > { %v1479_v2 = vrot.slane %v1478_v14, 1 }
 0x499   : > { %v1480_v8 = vadd.f32 %v1479_v2, %v1478_v14 }
 0x49b   : > { %v1481_v17 = vmul.f32 %v1480_v8, %v6008_v25  ;;  %v1518_v44 = vpop.permute.xlu1 %1517 }
 0x49d   : > { %v1482_v21 = vadd.f32 1e-05, %v1481_v17 }
 0x49f   : > { %5663 = vrsqrt.f32 %v1482_v21  ;;  %vm1489_vm12 = vweird.f32 %v1482_v21 }
 0x4a3   : > { %v1568_v11 = vpop.permute.xlu1 %1567 }
 0x4a5   : > { %v5664_v12 = vpop.eup %5663 }
 0x4a6   : > { %v1484_v22 = vmul.f32 %v5664_v12, %v1482_v21  ;;  %vm1490_vm11 = vweird.f32 %v5664_v12 }
 0x4a7   : > { %vm1491_vm13 = vmor %vm1489_vm12, %vm1490_vm11 }
 0x4a8   : > { %v1485_v24 = vmul.f32 %v5664_v12, %v1484_v22 }
 0x4aa   : > { %v1486_v6 = vmul.f32 0.5, %v1485_v24 }
 0x4ac   : > { %v1487_v26 = vsub.f32 1.5, %v1486_v6 }
 0x4ae   : > { %v1488_v7 = vmul.f32 %v5664_v12, %v1487_v26 }
 0x4b0   : > { %v1492_v28 = vsel %vm1491_vm13, %v5664_v12, %v1488_v7 }
 0x4b1   : > { %v1499_v29 = vmul.f32 %v1492_v28, %v1450_v62  ;;  %v1500_v30 = vmul.f32 %v1492_v28, %v1451_v20  ;;  %v1493_v31 = vmul.f32 %v1492_v28, %v1444_v37  ;;  %v1494_v32 = vmul.f32 %v1492_v28, %v1445_v38  ;;  %v5532_v37 = vld [vmem:[%s7871_s5] sm:$0xff]  ;;  %v5537_v38 = vld [vmem:[%s7871_s5 + $0x28] sm:$0xff]  ;;  %v1513_v62 = vpop.permute.xlu0 %1512 }
 0x4b2   : > { %v1497_v33 = vmul.f32 %v1492_v28, %v1448_v41  ;;  %v1498_v34 = vmul.f32 %v1492_v28, %v1449_v49  ;;  %v1495_v42 = vmul.f32 %v1492_v28, %v1446_v39  ;;  %v1496_v47 = vmul.f32 %v1492_v28, %v1447_v40  ;;  %v5533_v39 = vld [vmem:[%s7871_s5 + $0x8] sm:$0xff]  ;;  %v5538_v40 = vld [vmem:[%s7871_s5 + $0x30] sm:$0xff]  ;;  %v5539_v49 = vld [vmem:[%s7871_s5 + $0x38] sm:$0xff] }
 0x4b3   : > { %v1504_v13 = vpack.c.bf16 %v1500_v30, %v1499_v29  ;;  %v1501_v35 = vpack.c.bf16 %v1494_v32, %v1493_v31  ;;  %v5534_v41 = vld [vmem:[%s7871_s5 + $0x10] sm:$0xff] }
 0x4b4   : > { %v1503_v36 = vpack.c.bf16 %v1498_v34, %v1497_v33  ;;  %v1502_v48 = vpack.c.bf16 %v1496_v47, %v1495_v42 }
 0x4b5   : > { %1725 = vmatpush.bf16.msrb.mxu0 %v1504_v13  ;;  %5608 = vmatpush.bf16.msrb.mxu1 %v1504_v13 }
 0x4b6   : > { %5609 = vmatpush.bf16.msra.mxu3 %v1504_v13 }
 0x4b9   : > { %1726 = vmatpush.bf16.msrb.mxu0 %v1503_v36  ;;  %5610 = vmatpush.bf16.msrb.mxu1 %v1503_v36  ;;  %v1563_v9 = vpop.permute.xlu0 %1562 }
 0x4ba   : > { %5611 = vmatpush.bf16.msra.mxu3 %v1503_v36 }
 0x4bd   : > { %1727 = vmatpush.bf16.msrb.mxu0 %v1502_v48  ;;  %5612 = vmatpush.bf16.msrb.mxu1 %v1502_v48 }
 0x4be   : > { %5613 = vmatpush.bf16.msra.mxu3 %v1502_v48 }
 0x4c1   : > { %1728 = vmatpush.bf16.msrb.mxu0 %v1501_v35  ;;  %5614 = vmatpush.bf16.msrb.mxu1 %v1501_v35  ;;  %v1583_v52 = vpop.permute.xlu0 %1582 }
 0x4c2   : > { %5615 = vmatpush.bf16.msra.mxu3 %v1501_v35 }
 0x4c4   : > { %5167 = vmatmul.msk.bf16.vlgmr.msrb.gmra.mxu0 %vm963_vm0, %v5532_v37  ;;  %5172 = vmatmul.msk.bf16.vlgmr.msrb.gmra.mxu1 %vm963_vm0, %v5537_v38 }
 0x4c9   : > { %v1523_v61 = vpop.permute.xlu0 %1522 }
 0x4d1   : > { %v1573_v8 = vpop.permute.xlu0 %1572 }
 0x4d4   : > { %5168 = vmatmul.msk.bf16.gmra.mxu0 %vm963_vm0, %v5533_v39  ;;  %5173 = vmatmul.msk.bf16.gmra.mxu1 %vm963_vm0, %v5538_v40 }
 0x4e4   : > { %5169 = vmatmul.msk.bf16.gmra.mxu0 %vm963_vm0, %v5534_v41  ;;  %5174 = vmatmul.msk.bf16.gmra.mxu1 %vm963_vm0, %v5539_v49 }
 0x4f4   : > { %5170 = vmatmul.msk.bf16.gmra.mxu0 %vm963_vm0, %v5535_v18 }
 0x504   : > { %5171 = vmatmul.msk.bf16.gmra.mxu0 %vm963_vm0, %v5536_v57 }
 0x541   : > { %v1730_v20 = vpop.f32.mrf.mxu0  ;;  %v1755_v23 = vpop.f32.mrf.mxu1 }
 0x542   : > { %v1731_v53 = vadd.f32 %v1730_v20, %v1508_v51  ;;  %v1756_v36 = vadd.f32 %v1755_v23, %v1558_v5  ;;  %v5540_v5 = vld [vmem:[%s7871_s5 + $0x40] sm:$0xff]  ;;  %v1543_v23 = vpop.permute.xlu0 %1542 }
 0x543   : > { %5175 = vmatmul.msk.bf16.gmra.mxu1 %vm963_vm0, %v5540_v5  ;;  %v732_v5 = vld [vmem:[%s7874_s8 + $0x8] sm:$0xff] }
 0x544   : > { %v1798_v56 = vpack.c.bf16 %v1731_v53, %v1731_v53  ;;  %v1792_v38 = vpack.c.bf16 %v1756_v36, %v1756_v36  ;;  %v715_v36 = vld [vmem:[%s7872_s6 + $0x80] sm:$0xff] }
 0x546   : > { %v1830_v63 = vunpack.c.l.b16 %v1798_v56  ;;  %v1878_v18 = vunpack.c.l.b16 %v1792_v38  ;;  %v716_v38 = vld [vmem:[%s7872_s6 + $0x88] sm:$0xff] }
 0x549   : > { %v1732_v54 = vpop.f32.mrf.mxu0  ;;  %v1757_v55 = vpop.f32.mrf.mxu1 }
 0x54a   : > { %v1733_v43 = vadd.f32 %v1732_v54, %v1513_v62  ;;  %v1758_v35 = vadd.f32 %v1757_v55, %v1563_v9  ;;  %v1538_v9 = vpop.permute.xlu1 %1537 }
 0x54c   : > { %v1799_v58 = vpack.c.bf16 %v1733_v43, %v1733_v43  ;;  %v1793_v47 = vpack.c.bf16 %v1758_v35, %v1758_v35 }
 0x54e   : > { %v1831_v3 = vunpack.c.l.b16 %v1799_v58  ;;  %v1879_v41 = vunpack.c.l.b16 %v1793_v47  ;;  %v751_v47 = vld [vmem:[%s7876_s10 + $0x20] sm:$0xff] }
 0x550   : > { %v1832_v4 = vpack.c.b16 %v1831_v3, %v1830_v63  ;;  %v1880_v62 = vpack.c.b16 %v1879_v41, %v1878_v18  ;;  %v721_v41 = vld [vmem:[%s7872_s6 + $0xb0] sm:$0xff] }
 0x551   : > { %v1735_v10 = vpop.f32.mrf.mxu0  ;;  %v1760_v1 = vpop.f32.mrf.mxu1 }
 0x552   : > { %1854 = vmatpush.bf16.msra.mxu0 %v1832_v4  ;;  %v1736_v14 = vadd.f32 %v1735_v10, %v1518_v44  ;;  %v1761_v2 = vadd.f32 %v1760_v1, %v1568_v11  ;;  %v1553_v4 = vpop.permute.xlu2 %1552 }
 0x554   : > { %v1800_v12 = vpack.c.bf16 %v1736_v14, %v1736_v14  ;;  %v1794_v22 = vpack.c.bf16 %v1761_v2, %v1761_v2 }
 0x556   : > { %v1900_v28 = vunpack.c.l.b16 %v1800_v12  ;;  %v1947_v29 = vunpack.c.l.b16 %v1794_v22  ;;  %v718_v12 = vld [vmem:[%s7872_s6 + $0x98] sm:$0xff] }
 0x557   : > { %v5543_v22 = vld [vmem:[%s7871_s5 + $0x58] sm:$0xff] }
 0x559   : > { %v1737_v17 = vpop.f32.mrf.mxu0  ;;  %v1762_v21 = vpop.f32.mrf.mxu1 }
 0x55a   : > { %v1738_v24 = vadd.f32 %v1737_v17, %v1523_v61  ;;  %v1763_v6 = vadd.f32 %v1762_v21, %v1573_v8  ;;  %v5541_v61 = vld [vmem:[%s7871_s5 + $0x48] sm:$0xff]  ;;  %v5542_v21 = vld [vmem:[%s7871_s5 + $0x50] sm:$0xff] }
 0x55b   : > { %5176 = vmatmul.msk.bf16.gmra.mxu1 %vm963_vm0, %v5541_v61  ;;  %5177 = vmatmul.msk.bf16.vlgmr.msra.gmra.mxu3 %vm963_vm0, %v5542_v21  ;;  %v962_v61 = vld [vmem:[%s644_s27 + $0x38] sm:$0xff] }
 0x55c   : > { %v1801_v26 = vpack.c.bf16 %v1738_v24, %v1738_v24  ;;  %v1795_v7 = vpack.c.bf16 %v1763_v6, %v1763_v6  ;;  %v736_v24 = vld [vmem:[%s7874_s8 + $0x28] sm:$0xff]  ;;  %v747_v6 = vld [vmem:[%s7876_s10] sm:$0xff] }
 0x55e   : > { %v1901_v30 = vunpack.c.l.b16 %v1801_v26  ;;  %v1948_v31 = vunpack.c.l.b16 %v1795_v7  ;;  %v754_v26 = vld [vmem:[%s7876_s10 + $0x38] sm:$0xff]  ;;  %v717_v7 = vld [vmem:[%s7872_s6 + $0x90] sm:$0xff] }
 0x560   : > { %v1902_v32 = vpack.c.b16 %v1901_v30, %v1900_v28  ;;  %v1949_v13 = vpack.c.b16 %v1948_v31, %v1947_v29  ;;  %v731_v28 = vld [vmem:[%s7874_s8] sm:$0xff]  ;;  %v734_v29 = vld [vmem:[%s7874_s8 + $0x18] sm:$0xff]  ;;  %v737_v31 = vld [vmem:[%s7874_s8 + $0x30] sm:$0xff] }
 0x561   : > { %v6321_v33 = vpop.f32.mrf.mxu0  ;;  %v1765_v34 = vpop.f32.mrf.mxu1 }
 0x562   : > { %1923 = vmatpush.bf16.msra.mxu1 %v1902_v32  ;;  %1951 = vxpose.xlu1.c.b16.start.end [1/1] (short) (narrow) %v1949_v13, 64  ;;  %v1766_v42 = vadd.f32 %v1765_v34, %v1578_v16  ;;  %v703_v13 = vld [vmem:[%s7872_s6 + $0x20] sm:$0xff]  ;;  %v748_v34 = vld [vmem:[%s7876_s10 + $0x8] sm:$0xff] }
 0x564   : > { %v1796_v39 = vpack.c.bf16 %v1766_v42, %v1766_v42 }
 0x566   : > { %v2016_v57 = vunpack.c.l.b16 %v1796_v39  ;;  %v749_v39 = vld [vmem:[%s7876_s10 + $0x10] sm:$0xff] }
 0x569   : > { %v6323_v48 = vpop.f32.mrf.mxu0  ;;  %v1767_v37 = vpop.f32.mrf.mxu1 }
 0x56a   : > { %v1768_v40 = vadd.f32 %v1767_v37, %v1583_v52 }
 0x56b   : > { %5178 = vmatmul.msk.bf16.gmra.mxu3 %vm963_vm0, %v5543_v22  ;;  %v958_v22 = vld [vmem:[%s644_s27 + $0x18] sm:$0xff] }
 0x56c   : > { %v1797_v49 = vpack.c.bf16 %v1768_v40, %v1768_v40 }
 0x56e   : > { %v2017_v51 = vunpack.c.l.b16 %v1797_v49 }
 0x570   : > { %v2018_v20 = vpack.c.b16 %v2017_v51, %v2016_v57  ;;  %v722_v57 = vld [vmem:[%s7872_s6 + $0xb8] sm:$0xff] }
 0x571   : > { %v1745_v53 = vpop.f32.mrf.mxu0 }
 0x572   : > { %5633 = vxpose.binary.xlu0.c.b16.start.end [1/2] (short) (narrow) %v2018_v20, %v1880_v62, 64  ;;  %v1746_v16 = vadd.f32 %v1745_v53, %v1538_v9  ;;  %v719_v62 = vld [vmem:[%s7872_s6 + $0xa0] sm:$0xff]  ;;  %v720_v53 = vld [vmem:[%s7872_s6 + $0xa8] sm:$0xff] }
 0x574   : > { %v1804_v52 = vpack.c.bf16 %v1746_v16, %v1746_v16  ;;  %v735_v16 = vld [vmem:[%s7874_s8 + $0x20] sm:$0xff] }
 0x576   : > { %v2038_v43 = vunpack.c.l.b16 %v1804_v52  ;;  %v753_v52 = vld [vmem:[%s7876_s10 + $0x30] sm:$0xff] }
 0x579   : > { %v1747_v54 = vpop.f32.mrf.mxu0 }
 0x57a   : > { %v1748_v55 = vadd.f32 %v1747_v54, %v1543_v23  ;;  %v738_v23 = vld [vmem:[%s7874_s8 + $0x38] sm:$0xff] }
 0x57c   : > { %v1805_v56 = vpack.c.bf16 %v1748_v55, %v1748_v55 }
 0x57e   : > { %v2039_v44 = vunpack.c.l.b16 %v1805_v56  ;;  %v752_v56 = vld [vmem:[%s7876_s10 + $0x28] sm:$0xff] }
 0x580   : > { %v2040_v58 = vpack.c.b16 %v2039_v44, %v2038_v43  ;;  %v1533_v43 = vpop.permute.xlu1 %1532 }
 0x581   : > { %v1750_v63 = vpop.f32.mrf.mxu0  ;;  %v1743_v44 = vadd.f32 %v6323_v48, %v1533_v43 }
 0x582   : > { %2061 = vmatpush.bf16.msrb.mxu0 %v2040_v58  ;;  %v1751_v3 = vadd.f32 %v1750_v63, %v6319_v50  ;;  %v733_v50 = vld [vmem:[%s7874_s8 + $0x10] sm:$0xff] }
 0x583   : > { %v961_v58 = vld [vmem:[%s644_s27 + $0x30] sm:$0xff] }
 0x584   : > { %v1790_v1 = vpack.c.bf16 %v1751_v3, %v1751_v3  ;;  %v2907_v3 = vpack.c.bf16 %v962_v61, %v961_v58 }
 0x586   : > { %v1808_v2 = vunpack.c.l.b16 %v1790_v1 }
 0x589   : > { %v1752_v10 = vpop.f32.mrf.mxu0 }
 0x58a   : > { %v1753_v11 = vadd.f32 %v1752_v10, %v1553_v4  ;;  %v1803_v4 = vpack.c.bf16 %v1743_v44, %v1743_v44  ;;  %v5554_v44 = vld [vmem:[%s7877_s11 + $0x10] sm:$0xff] }
 0x58c   : > { %v1791_v14 = vpack.c.bf16 %v1753_v11, %v1753_v11  ;;  %v750_v11 = vld [vmem:[%s7876_s10 + $0x18] sm:$0xff]  ;;  %v1970_v48 = vunpack.c.l.b16 %v1803_v4 }
 0x58e   : > { %v1809_v8 = vunpack.c.l.b16 %v1791_v14  ;;  %v959_v14 = vld [vmem:[%s644_s27 + $0x20] sm:$0xff] }
 0x590   : > { %v1810_v17 = vpack.c.b16 %v1809_v8, %v1808_v2  ;;  %v960_v2 = vld [vmem:[%s644_s27 + $0x28] sm:$0xff] }
 0x591   : > { %v2906_v8 = vpack.c.bf16 %v960_v2, %v959_v14 }
 0x592   : > { %1812 = vxpose.xlu2.c.b16.start.end [1/1] (short) (narrow) %v1810_v17, 64 }
 0x5c0   : > { %v6417_v54 = vpop.f32.mrf.mxu1 }
 0x5c8   : > { %v6422_v55 = vpop.f32.mrf.mxu1 }
 0x5d8   : > { %v6437_v17 = vpop.f32.mrf.mxu1 }
 0x5ec   : > { %1602 = vperm.xlu1 %5632, %v718_v12  }
 0x5f4   : > { %2623 = vperm.xlu1 %5632, %v733_v50   ;;  %v957_v50 = vld [vmem:[%s644_s27 + $0x10] sm:$0xff] }
 0x5fc   : > { %2638 = vperm.xlu1 %5632, %v736_v24   ;;  %v2905_v24 = vpack.c.bf16 %v958_v22, %v957_v50 }
 0x604   : > { %2805 = vperm.xlu1 %5632, %v747_v6   ;;  %v955_v6 = vld [vmem:[%s644_s27] sm:$0xff] }
 0x60c   : > { %2840 = vperm.xlu1 %5632, %v754_v26   ;;  %v956_v26 = vld [vmem:[%s644_s27 + $0x8] sm:$0xff] }
 0x610   : > { %1597 = vperm.xlu0 %5631, %v717_v7   ;;  %v2904_v7 = vpack.c.bf16 %v956_v26, %v955_v6 }
 0x618   : > { %2613 = vperm.xlu0 %5631, %v731_v28   ;;  %v6440_v28 = vpop.f32.mrf.mxu1 }
 0x61e   : > { %v5634_v30 = vpop.trf.xlu0 }
 0x61f   : > { %5183 = vmatmul.msk.bf16.vlgmr.msra.gmra.mxu1 %vm1834_vm14, %v5634_v30 }
 0x620   : > { %2628 = vperm.xlu0 %5631, %v734_v29  }
 0x626   : > { %v5635_v32 = vpop.trf.xlu0 }
 0x628   : > { %2643 = vperm.xlu0 %5631, %v737_v31  }
 0x62b   : > { %1527 = vperm.xlu2 %5630, %v703_v13  }
 0x62e   : > { %v5636_v35 = vpop.trf.xlu0 }
 0x62f   : > { %5184 = vmatmul.msk.bf16.gmra.mxu1 %vm1834_vm14, %v5636_v35  ;;  %v5552_v35 = vld [vmem:[%s7877_s11] sm:$0xff] }
 0x630   : > { %2810 = vperm.xlu0 %5631, %v748_v34  }
 0x633   : > { %1587 = vperm.xlu2 %5630, %v715_v36   ;;  %v1820_v42 = vpop.trf.xlu2 }
 0x634   : > { %5179 = vmatmul.msk.bf16.vlgmr.msra.gmra.mxu0 %vm1834_vm14, %v1820_v42 }
 0x635   : > { %2976 = vmatpush.bf16.msra.mxu0 %v2907_v3 }
 0x636   : > { %v5637_v37 = vpop.trf.xlu0 }
 0x638   : > { %2825 = vperm.xlu0 %5631, %v751_v47  }
 0x639   : > { %2977 = vmatpush.bf16.msra.mxu0 %v2906_v8 }
 0x63b   : > { %1592 = vperm.xlu2 %5630, %v716_v38  }
 0x63d   : > { %2978 = vmatpush.bf16.msra.mxu0 %v2905_v24 }
 0x63e   : > { %v5638_v40 = vpop.trf.xlu0 }
 0x63f   : > { %5185 = vmatmul.msk.bf16.gmra.mxu1 %vm1834_vm14, %v5638_v40 }
 0x640   : > { %2815 = vperm.xlu0 %5631, %v749_v39  }
 0x641   : > { %2979 = vmatpush.bf16.msra.mxu0 %v2904_v7 }
 0x643   : > { %1617 = vperm.xlu2 %5630, %v721_v41   ;;  %v1821_v49 = vpop.trf.xlu2 }
 0x644   : > { %5180 = vmatmul.msk.bf16.gmra.mxu0 %vm1834_vm14, %v1821_v49 }
 0x646   : > { %v5639_v18 = vpop.trf.xlu0 }
 0x64b   : > { %1622 = vperm.xlu2 %5630, %v722_v57  }
 0x64e   : > { %v5640_v51 = vpop.trf.xlu0 }
 0x64f   : > { %5186 = vmatmul.msk.bf16.gmra.mxu1 %vm1834_vm14, %v5640_v51 }
 0x653   : > { %1607 = vperm.xlu2 %5630, %v719_v62   ;;  %v1822_v20 = vpop.trf.xlu2 }
 0x654   : > { %5181 = vmatmul.msk.bf16.gmra.mxu0 %vm1834_vm14, %v1822_v20 }
 0x656   : > { %v5641_v31 = vpop.trf.xlu0 }
 0x65b   : > { %1612 = vperm.xlu2 %5630, %v720_v53  }
 0x663   : > { %2618 = vperm.xlu2 %5630, %v732_v5   ;;  %v1823_v9 = vpop.trf.xlu2 }
 0x664   : > { %5182 = vmatmul.msk.bf16.gmra.mxu0 %vm1834_vm14, %v1823_v9 }
 0x66b   : > { %2633 = vperm.xlu2 %5630, %v735_v16  }
 0x673   : > { %2648 = vperm.xlu2 %5630, %v738_v23  }
 0x674   : > { %5191 = vmatmul.msk.bf16.vlgmr.msrb.gmra.mxu0 %vm1834_vm14, %v5635_v32 }
 0x67b   : > { %2835 = vperm.xlu2 %5630, %v753_v52  }
 0x683   : > { %2830 = vperm.xlu2 %5630, %v752_v56  }
 0x684   : > { %5192 = vmatmul.msk.bf16.gmra.mxu0 %vm1834_vm14, %v5637_v37 }
 0x685   : > { %v1528_v63 = vpop.permute.xlu2 %1527 }
 0x686   : > { %v1741_v10 = vadd.f32 %v6321_v33, %v1528_v63  ;;  %v1959_v33 = vpop.trf.xlu1 }
 0x688   : > { %v1802_v1 = vpack.c.bf16 %v1741_v10, %v1741_v10 }
 0x68a   : > { %v1969_v21 = vunpack.c.l.b16 %v1802_v1 }
 0x68b   : > { %2820 = vperm.xlu2 %5630, %v750_v11  }
 0x68c   : > { %v1971_v12 = vpack.c.b16 %v1970_v48, %v1969_v21 }
 0x68e   : > { %1992 = vmatpush.bf16.msrb.mxu2 %v1971_v12  ;;  %v1960_v30 = vpop.trf.xlu1 }
 0x691   : > { %5187 = vmatmul.msk.bf16.vlgmr.msrb.gmra.mxu2 %vm1834_vm14, %v1959_v33  ;;  %v5555_v33 = vld [vmem:[%s7877_s11 + $0x18] sm:$0xff] }
 0x694   : > { %5193 = vmatmul.msk.bf16.gmra.mxu0 %vm1834_vm14, %v5639_v18  ;;  %v5553_v18 = vld [vmem:[%s7877_s11 + $0x8] sm:$0xff] }
 0x696   : > { %v1961_v34 = vpop.trf.xlu1 }
 0x69c   : > { %v6443_v29 = vpop.f32.mrf.mxu1 }
 0x69d   : > { %v2104_v37 = vsel %vm963_vm0, %v6443_v29, -inf }
 0x69e   : > { %v1962_v49 = vpop.trf.xlu1 }
 0x6a1   : > { %5188 = vmatmul.msk.bf16.gmra.mxu2 %vm1834_vm14, %v1960_v30 }
 0x6a4   : > { %v6446_v32 = vpop.f32.mrf.mxu1  ;;  %5194 = vmatmul.msk.bf16.gmra.mxu0 %vm1834_vm14, %v5641_v31 }
 0x6a5   : > { %v2105_v38 = vsel %vm963_vm0, %v6446_v32, -inf }
 0x6a6   : > { %v2106_v40 = vmax.f32 %v2104_v37, %v2105_v38 }
 0x6ac   : > { %v6449_v13 = vpop.f32.mrf.mxu1 }
 0x6ad   : > { %v2107_v41 = vsel %vm963_vm0, %v6449_v13, -inf }
 0x6ae   : > { %v2108_v51 = vmax.f32 %v2106_v40, %v2107_v41 }
 0x6b1   : > { %v6454_v36 = vpop.f32.mrf.mxu0  ;;  %5189 = vmatmul.msk.bf16.gmra.mxu2 %vm1834_vm14, %v1961_v34 }
 0x6b2   : > { %v2083_v4 = vsel %vm963_vm0, %v6454_v36, -inf }
 0x6b4   : > { %v1932_v42 = vpop.f32.mrf.mxu1  ;;  %5271 = vmatmul.msk.bf16.vlgmr.msra.gmra.mxu0 %vm963_vm0, %v5552_v35 }
 0x6b5   : > { %v2109_v62 = vsel %vm963_vm0, %v1932_v42, -inf }
 0x6b6   : > { %v2110_v53 = vmax.f32 %v2108_v51, %v2109_v62 }
 0x6b9   : > { %v6458_v47 = vpop.f32.mrf.mxu0 }
 0x6ba   : > { %v2084_v10 = vsel %vm963_vm0, %v6458_v47, -inf }
 0x6bb   : > { %v2085_v14 = vmax.f32 %v2083_v4, %v2084_v10 }
 0x6bc   : > { %v1935_v39 = vpop.f32.mrf.mxu1 }
 0x6bd   : > { %v2111_v5 = vsel %vm963_vm0, %v1935_v39, -inf }
 0x6be   : > { %v2112_v16 = vmax.f32 %v2110_v53, %v2111_v5 }
 0x6c1   : > { %v6469_v57 = vpop.f32.mrf.mxu0  ;;  %5190 = vmatmul.msk.bf16.gmra.mxu2 %vm1834_vm14, %v1962_v49 }
 0x6c2   : > { %v2086_v8 = vsel %vm963_vm0, %v6469_v57, -inf }
 0x6c3   : > { %v2087_v12 = vmax.f32 %v2085_v14, %v2086_v8 }
 0x6c4   : > { %v1937_v20 = vpop.f32.mrf.mxu1  ;;  %5272 = vmatmul.msk.bf16.gmra.mxu0 %vm963_vm0, %v5553_v18 }
 0x6c5   : > { %v2113_v23 = vsel %vm963_vm0, %v1937_v20, -inf }
 0x6c6   : > { %v2114_v56 = vmax.f32 %v2112_v16, %v2113_v23 }
 0x6c9   : > { %v6475_v9 = vpop.f32.mrf.mxu0 }
 0x6ca   : > { %v2088_v50 = vsel %vm963_vm0, %v6475_v9, -inf }
 0x6cb   : > { %v2089_v6 = vmax.f32 %v2087_v12, %v2088_v50 }
 0x6cc   : > { %v1940_v52 = vpop.f32.mrf.mxu1 }
 0x6cd   : > { %v2115_v43 = vsel %vm963_vm0, %v1940_v52, -inf }
 0x6ce   : > { %v2116_v61 = vmax.f32 %v2114_v56, %v2115_v43 }
 0x6d1   : > { %v6482_v58 = vpop.f32.mrf.mxu0 }
 0x6d2   : > { %v2090_v7 = vsel %vm963_vm0, %v6482_v58, -inf }
 0x6d3   : > { %v2091_v40 = vmax.f32 %v2089_v6, %v2090_v7 }
 0x6d4   : > { %v1942_v63 = vpop.f32.mrf.mxu1  ;;  %5273 = vmatmul.msk.bf16.gmra.mxu0 %vm963_vm0, %v5554_v44 }
 0x6d5   : > { %v2117_v3 = vsel %vm963_vm0, %v1942_v63, -inf }
 0x6d6   : > { %v2118_v1 = vmax.f32 %v2116_v61, %v2117_v3 }
 0x6d8   : > { %v2119_v11 = vrot.slane %v2118_v1, 4 }
 0x6d9   : > { %v6490_v2 = vpop.f32.mrf.mxu0 }
 0x6da   : > { %v2120_v48 = vmax.f32 %v2118_v1, %v2119_v11  ;;  %v2092_v31 = vsel %vm963_vm0, %v6490_v2, -inf }
 0x6db   : > { %v2093_v23 = vmax.f32 %v2091_v40, %v2092_v31 }
 0x6dc   : > { %v2121_v21 = vrot.slane %v2120_v48, 2 }
 0x6de   : > { %v2122_v22 = vmax.f32 %v2120_v48, %v2121_v21 }
 0x6e0   : > { %v2123_v24 = vrot.slane %v2122_v22, 1 }
 0x6e1   : > { %v6499_v26 = vpop.f32.mrf.mxu0 }
 0x6e2   : > { %v2124_v30 = vmax.f32 %v2122_v22, %v2123_v24  ;;  %v2094_v18 = vsel %vm963_vm0, %v6499_v26, -inf }
 0x6e4   : > { %v2175_v34 = vsub.f32 %v6443_v29, %v2124_v30  ;;  %v2176_v35 = vsub.f32 %v6446_v32, %v2124_v30  ;;  %v2177_v37 = vsub.f32 %v6449_v13, %v2124_v30  ;;  %v2178_v38 = vsub.f32 %v1932_v42, %v2124_v30  ;;  %5274 = vmatmul.msk.bf16.gmra.mxu0 %vm963_vm0, %v5555_v33 }
 0x6e5   : > { %v2179_v41 = vsub.f32 %v1935_v39, %v2124_v30  ;;  %v2180_v49 = vsub.f32 %v1937_v20, %v2124_v30  ;;  %v2181_v5 = vsub.f32 %v1940_v52, %v2124_v30  ;;  %v2182_v32 = vsub.f32 %v1942_v63, %v2124_v30 }
 0x6e6   : > { %v2215_v51 = vmul.f32 1.442695, %v2175_v34  ;;  %v2217_v62 = vmul.f32 1.442695, %v2176_v35  ;;  %v2219_v53 = vmul.f32 1.442695, %v2177_v37  ;;  %v2095_v42 = vmax.f32 %v2093_v23, %v2094_v18 }
 0x6e7   : > { %v2221_v16 = vmul.f32 1.442695, %v2178_v38  ;;  %v2223_v29 = vmul.f32 1.442695, %v2179_v41  ;;  %v2225_v13 = vmul.f32 1.442695, %v2180_v49 }
 0x6e8   : > { %5665 = vpow2.f32 %v2215_v51  ;;  %v2227_v20 = vmul.f32 1.442695, %v2181_v5  ;;  %v2229_v52 = vmul.f32 1.442695, %v2182_v32 }
 0x6e9   : > { %5667 = vpow2.f32 %v2217_v62  ;;  %v6511_v56 = vpop.f32.mrf.mxu0 }
 0x6ea   : > { %5669 = vpow2.f32 %v2219_v53  ;;  %v2096_v39 = vsel %vm963_vm0, %v6511_v56, -inf }
 0x6eb   : > { %5671 = vpow2.f32 %v2221_v16  ;;  %v2097_v43 = vmax.f32 %v2095_v42, %v2096_v39 }
 0x6ec   : > { %5673 = vpow2.f32 %v2223_v29 }
 0x6ed   : > { %5675 = vpow2.f32 %v2225_v13  ;;  %v2098_v44 = vrot.slane %v2097_v43, 4 }
 0x6ee   : > { %v6515_v61 = vpop.eup %5665  ;;  %5677 = vpow2.f32 %v2227_v20 }
 0x6ef   : > { %v6517_v3 = vpop.eup %5667  ;;  %v2284_v63 = vsel %vm963_vm0, %v6515_v61, 0.0  ;;  %v2099_v4 = vmax.f32 %v2097_v43, %v2098_v44  ;;  %5679 = vpow2.f32 %v2229_v52 }
 0x6f0   : > { %v6521_v10 = vpop.eup %5669  ;;  %v2285_v1 = vsel %vm963_vm0, %v6517_v3, 0.0 }
 0x6f1   : > { %v6525_v11 = vpop.eup %5671  ;;  %v2286_v14 = vadd.f32 %v2285_v1, %v2284_v63  ;;  %v2287_v8 = vsel %vm963_vm0, %v6521_v10, 0.0  ;;  %v2100_v48 = vrot.slane %v2099_v4, 2  ;;  %v6529_v21 = vpop.f32.mrf.mxu0 }
 0x6f2   : > { %v6531_v12 = vpop.eup %5673  ;;  %v2289_v50 = vsel %vm963_vm0, %v6525_v11, 0.0 }
 0x6f3   : > { %v6535_v22 = vpop.eup %5675  ;;  %v2288_v24 = vadd.f32 %v2287_v8, %v2286_v14  ;;  %v2101_v33 = vmax.f32 %v2099_v4, %v2100_v48  ;;  %v2291_v6 = vsel %vm963_vm0, %v6531_v12, 0.0 }
 0x6f4   : > { %v6539_v7 = vpop.eup %5677  ;;  %v2293_v34 = vsel %vm963_vm0, %v6535_v22, 0.0 }
 0x6f5   : > { %v2290_v30 = vadd.f32 %v2289_v50, %v2288_v24  ;;  %v2102_v31 = vrot.slane %v2101_v33, 1  ;;  %v6543_v35 = vpop.eup %5679  ;;  %v2295_v40 = vsel %vm963_vm0, %v6539_v7, 0.0 }
 0x6f6   : > { %v2297_v53 = vsel %vm963_vm0, %v6543_v35, 0.0 }
 0x6f7   : > { %v2292_v37 = vadd.f32 %v2291_v6, %v2290_v30  ;;  %v2103_v38 = vmax.f32 %v2101_v33, %v2102_v31 }
 0x6f9   : > { %v2294_v41 = vadd.f32 %v2293_v34, %v2292_v37  ;;  %v2167_v49 = vsub.f32 %v6454_v36, %v2103_v38  ;;  %v2168_v18 = vsub.f32 %v6458_v47, %v2103_v38  ;;  %v2169_v51 = vsub.f32 %v6469_v57, %v2103_v38  ;;  %v6550_v62 = vpop.f32.mrf.mxu0 }
 0x6fa   : > { %v2170_v5 = vsub.f32 %v6475_v9, %v2103_v38  ;;  %v2171_v16 = vsub.f32 %v6482_v58, %v2103_v38  ;;  %v2172_v13 = vsub.f32 %v6490_v2, %v2103_v38  ;;  %v2173_v47 = vsub.f32 %v6499_v26, %v2103_v38 }
 0x6fb   : > { %v2296_v23 = vadd.f32 %v2295_v40, %v2294_v41  ;;  %v2199_v29 = vmul.f32 1.442695, %v2167_v49  ;;  %v2201_v32 = vmul.f32 1.442695, %v2168_v18  ;;  %v2203_v42 = vmul.f32 1.442695, %v2169_v51 }
 0x6fc   : > { %v2205_v36 = vmul.f32 1.442695, %v2170_v5  ;;  %v2207_v57 = vmul.f32 1.442695, %v2171_v16  ;;  %v2174_v43 = vsub.f32 %v6511_v56, %v2103_v38  ;;  %v2209_v9 = vmul.f32 1.442695, %v2172_v13 }
 0x6fd   : > { %v2298_v39 = vadd.f32 %v2297_v53, %v2296_v23  ;;  %5681 = vpow2.f32 %v2199_v29  ;;  %v2211_v44 = vmul.f32 1.442695, %v2173_v47 }
 0x6fe   : > { %5683 = vpow2.f32 %v2201_v32  ;;  %v2213_v26 = vmul.f32 1.442695, %v2174_v43 }
 0x6ff   : > { %v2299_v20 = vrot.slane %v2298_v39, 4  ;;  %5685 = vpow2.f32 %v2203_v42 }
 0x700   : > { %5687 = vpow2.f32 %v2205_v36 }
 0x701   : > { %v2300_v58 = vadd.f32 %v2299_v20, %v2298_v39  ;;  %v6559_v52 = vpop.f32.mrf.mxu0  ;;  %5689 = vpow2.f32 %v2207_v57 }
 0x702   : > { %5691 = vpow2.f32 %v2209_v9 }
 0x703   : > { %v6561_v2 = vpop.eup %5681  ;;  %v2301_v63 = vrot.slane %v2300_v58, 2  ;;  %5693 = vpow2.f32 %v2211_v44 }
 0x704   : > { %v6563_v4 = vpop.eup %5683  ;;  %v2263_v1 = vsel %vm963_vm0, %v6561_v2, 0.0  ;;  %5695 = vpow2.f32 %v2213_v26  ;;  %v2146_v26 = vsel %vm963_vm0, %v6529_v21, -inf }
 0x705   : > { %v6567_v14 = vpop.eup %5685  ;;  %v2302_v56 = vadd.f32 %v2301_v63, %v2300_v58  ;;  %v2264_v8 = vsel %vm963_vm0, %v6563_v4, 0.0 }
 0x706   : > { %v6571_v48 = vpop.eup %5687  ;;  %v2265_v50 = vadd.f32 %v2264_v8, %v2263_v1  ;;  %v2266_v33 = vsel %vm963_vm0, %v6567_v14, 0.0  ;;  %v1598_v8 = vpop.permute.xlu0 %1597 }
 0x707   : > { %v2303_v24 = vrot.slane %v2302_v56, 1  ;;  %v6575_v6 = vpop.eup %5689  ;;  %v2268_v34 = vsel %vm963_vm0, %v6571_v48, 0.0 }
 0x708   : > { %v2267_v30 = vadd.f32 %v2266_v33, %v2265_v50  ;;  %v6581_v38 = vpop.eup %5691  ;;  %v2270_v41 = vsel %vm963_vm0, %v6575_v6, 0.0 }
 0x709   : > { %v2304_v31 = vadd.f32 %v2303_v24, %v2302_v56  ;;  %v6579_v37 = vpop.f32.mrf.mxu0  ;;  %v6585_v49 = vpop.eup %5693  ;;  %v2272_v51 = vsel %vm963_vm0, %v6581_v38, 0.0 }
 0x70a   : > { %v2269_v40 = vadd.f32 %v2268_v34, %v2267_v30  ;;  %v6589_v53 = vpop.eup %5695  ;;  %v2274_v16 = vsel %vm963_vm0, %v6585_v49, 0.0  ;;  %v1603_v30 = vpop.permute.xlu1 %1602 }
 0x70b   : > { %5697 = vrcp.f32 %v2304_v31  ;;  %v2276_v32 = vsel %vm963_vm0, %v6589_v53, 0.0 }
 0x70c   : > { %v2271_v18 = vadd.f32 %v2270_v41, %v2269_v40 }
 0x70e   : > { %v2273_v5 = vadd.f32 %v2272_v51, %v2271_v18  ;;  %v1776_v18 = vadd.f32 %v6437_v17, %v1598_v8 }
 0x710   : > { %v2275_v23 = vadd.f32 %v2274_v16, %v2273_v5  ;;  %v1778_v16 = vadd.f32 %v6440_v28, %v1603_v30 }
 0x711   : > { %v5698_v29 = vpop.eup %5697  ;;  %v6595_v13 = vpop.f32.mrf.mxu0 }
 0x712   : > { %v2277_v42 = vadd.f32 %v2276_v32, %v2275_v23  ;;  %v2365_v36 = vmul.f32 %v5698_v29, %v6539_v7  ;;  %v2366_v39 = vmul.f32 %v5698_v29, %v6543_v35  ;;  %v2363_v47 = vmul.f32 %v5698_v29, %v6531_v12 }
 0x713   : > { %v2364_v57 = vmul.f32 %v5698_v29, %v6535_v22  ;;  %v2361_v20 = vmul.f32 %v5698_v29, %v6521_v10  ;;  %v2362_v63 = vmul.f32 %v5698_v29, %v6525_v11  ;;  %v2147_v12 = vsel %vm963_vm0, %v6550_v62, -inf }
 0x714   : > { %v2278_v43 = vrot.slane %v2277_v42, 4  ;;  %v6602_v9 = vpop.f32.mrf.mxu2  ;;  %v2405_v58 = vpack.c.bf16 %v2365_v36, %v2365_v36  ;;  %v2406_v44 = vpack.c.bf16 %v2366_v39, %v2366_v39  ;;  %v2403_v1 = vpack.c.bf16 %v2363_v47, %v2363_v47 }
 0x715   : > { %v2404_v7 = vpack.c.bf16 %v2364_v57, %v2364_v57  ;;  %v2401_v24 = vpack.c.bf16 %v2361_v20, %v2361_v20  ;;  %v2402_v33 = vpack.c.bf16 %v2362_v63, %v2362_v63  ;;  %v2359_v11 = vmul.f32 %v5698_v29, %v6515_v61 }
 0x716   : > { %v2279_v56 = vadd.f32 %v2278_v43, %v2277_v42  ;;  %v2488_v35 = vunpack.c.l.b16 %v2405_v58  ;;  %v2489_v22 = vunpack.c.l.b16 %v2406_v44  ;;  %v2486_v10 = vunpack.c.l.b16 %v2403_v1 }
 0x717   : > { %v2487_v50 = vunpack.c.l.b16 %v2404_v7  ;;  %v2360_v40 = vmul.f32 %v5698_v29, %v6517_v3  ;;  %v2148_v23 = vmax.f32 %v2146_v26, %v2147_v12  ;;  %v2149_v32 = vsel %vm963_vm0, %v6559_v52, -inf }
 0x718   : > { %v2280_v31 = vrot.slane %v2279_v56, 2  ;;  %v2493_v34 = vpack.c.b16 %v2489_v22, %v2488_v35  ;;  %v2484_v42 = vunpack.c.l.b16 %v2401_v24  ;;  %v2485_v61 = vunpack.c.l.b16 %v2402_v33 }
 0x719   : > { %v6611_v41 = vpop.f32.mrf.mxu0  ;;  %v2492_v5 = vpack.c.b16 %v2487_v50, %v2486_v10  ;;  %v2399_v47 = vpack.c.bf16 %v2359_v11, %v2359_v11  ;;  %v2400_v3 = vpack.c.bf16 %v2360_v40, %v2360_v40  ;;  %v2385_v29 = vpack.c.bf16 %v1776_v18, %v1776_v18 }
 0x71a   : > { %v2281_v51 = vadd.f32 %v2280_v31, %v2279_v56  ;;  %2505 = vmatpush.bf16.msra.mxu2 %v2493_v34  ;;  %v2386_v17 = vpack.c.bf16 %v1778_v16, %v1778_v16  ;;  %v2150_v20 = vmax.f32 %v2148_v23, %v2149_v32  ;;  %v2151_v43 = vsel %vm963_vm0, %v6579_v37, -inf  ;;  %v1588_v56 = vpop.permute.xlu2 %1587 }
 0x71b   : > { %v2491_v28 = vpack.c.b16 %v2485_v61, %v2484_v42  ;;  %v2482_v58 = vunpack.c.l.b16 %v2399_v47  ;;  %v2483_v44 = vunpack.c.l.b16 %v2400_v3  ;;  %v2153_v63 = vsel %vm963_vm0, %v6595_v13, -inf }
 0x71c   : > { %v2282_v36 = vrot.slane %v2281_v51, 1  ;;  %v6617_v39 = vpop.f32.mrf.mxu2  ;;  %v2471_v1 = vunpack.c.l.b16 %v2385_v29  ;;  %v2152_v7 = vmax.f32 %v2150_v20, %v2151_v43  ;;  %v2155_v12 = vsel %vm963_vm0, %v6611_v41, -inf }
 0x71d   : > { %v2472_v35 = vunpack.c.l.b16 %v2386_v17  ;;  %v2490_v10 = vpack.c.b16 %v2483_v44, %v2482_v58 }
 0x71e   : > { %v2283_v57 = vadd.f32 %v2282_v36, %v2281_v51  ;;  %2506 = vmatpush.bf16.msra.mxu2 %v2492_v5  ;;  %v2154_v22 = vmax.f32 %v2152_v7, %v2153_v63 }
 0x71f   : > { %v2473_v33 = vpack.c.b16 %v2472_v35, %v2471_v1 }
 0x720   : > { %5699 = vrcp.f32 %v2283_v57  ;;  %v2156_v30 = vmax.f32 %v2154_v22, %v2155_v12 }
 0x721   : > { %v6623_v26 = vpop.f32.mrf.mxu0 }
 0x722   : > { %2507 = vmatpush.bf16.msra.mxu2 %v2491_v28  ;;  %v2157_v50 = vsel %vm963_vm0, %v6623_v26, -inf  ;;  %v1593_v29 = vpop.permute.xlu2 %1592 }
 0x723   : > { %v2158_v18 = vmax.f32 %v2156_v30, %v2157_v50  ;;  %v1773_v58 = vadd.f32 %v6422_v55, %v1593_v29 }
 0x724   : > { %v6627_v8 = vpop.f32.mrf.mxu2 }
 0x726   : > { %v5700_v24 = vpop.eup %5699  ;;  %2508 = vmatpush.bf16.msra.mxu2 %v2490_v10 }
 0x727   : > { %v2357_v31 = vmul.f32 %v5700_v24, %v6585_v49  ;;  %v2358_v34 = vmul.f32 %v5700_v24, %v6589_v53  ;;  %v2355_v11 = vmul.f32 %v5700_v24, %v6575_v6  ;;  %v2356_v40 = vmul.f32 %v5700_v24, %v6581_v38 }
 0x728   : > { %v2353_v51 = vmul.f32 %v5700_v24, %v6567_v14  ;;  %v2354_v5 = vmul.f32 %v5700_v24, %v6571_v48  ;;  %v2351_v48 = vmul.f32 %v5700_v24, %v6561_v2  ;;  %v2352_v3 = vmul.f32 %v5700_v24, %v6563_v4 }
 0x729   : > { %5196 = vmatmul.msk.bf16.vlgmr.msra.gmra.mxu2 %vm963_vm0, %v2473_v33  ;;  %v6638_v16 = vpop.f32.mrf.mxu0  ;;  %v2397_v23 = vpack.c.bf16 %v2357_v31, %v2357_v31  ;;  %v2398_v32 = vpack.c.bf16 %v2358_v34, %v2358_v34  ;;  %v2395_v42 = vpack.c.bf16 %v2355_v11, %v2355_v11  ;;  %v2396_v36 = vpack.c.bf16 %v2356_v40, %v2356_v40 }
 0x72a   : > { %v2159_v49 = vsel %vm963_vm0, %v6638_v16, -inf  ;;  %v2393_v47 = vpack.c.bf16 %v2353_v51, %v2353_v51  ;;  %v2394_v14 = vpack.c.bf16 %v2354_v5, %v2354_v5  ;;  %v2391_v44 = vpack.c.bf16 %v2351_v48, %v2351_v48 }
 0x72b   : > { %v2160_v53 = vmax.f32 %v2158_v18, %v2159_v49  ;;  %v2442_v6 = vunpack.c.l.b16 %v2397_v23  ;;  %v2443_v61 = vunpack.c.l.b16 %v2398_v32  ;;  %v2440_v20 = vunpack.c.l.b16 %v2395_v42 }
 0x72c   : > { %v6642_v38 = vpop.f32.mrf.mxu2  ;;  %v2441_v43 = vunpack.c.l.b16 %v2396_v36  ;;  %v2392_v63 = vpack.c.bf16 %v2352_v3, %v2352_v3  ;;  %v2438_v35 = vunpack.c.l.b16 %v2393_v47  ;;  %v2439_v22 = vunpack.c.l.b16 %v2394_v14 }
 0x72d   : > { %v2161_v57 = vrot.slane %v2160_v53, 4  ;;  %v2447_v17 = vpack.c.b16 %v2443_v61, %v2442_v6  ;;  %v1771_v2 = vadd.f32 %v6417_v54, %v1588_v56  ;;  %v2384_v4 = vpack.c.bf16 %v1773_v58, %v1773_v58 }
 0x72e   : > { %v2446_v12 = vpack.c.b16 %v2441_v43, %v2440_v20  ;;  %v2436_v24 = vunpack.c.l.b16 %v2391_v44  ;;  %v2437_v33 = vunpack.c.l.b16 %v2392_v63  ;;  %v2445_v31 = vpack.c.b16 %v2439_v22, %v2438_v35 }
 0x72f   : > { %v2162_v28 = vmax.f32 %v2160_v53, %v2161_v57  ;;  %2459 = vmatpush.bf16.msrb.mxu1 %v2447_v17  ;;  %v2383_v34 = vpack.c.bf16 %v1771_v2, %v1771_v2  ;;  %v2426_v40 = vunpack.c.l.b16 %v2384_v4  ;;  %v2125_v57 = vsel %vm963_vm0, %v6602_v9, -inf }
 0x730   : > { %v2444_v18 = vpack.c.b16 %v2437_v33, %v2436_v24  ;;  %v2128_v17 = vsel %vm963_vm0, %v6627_v8, -inf  ;;  %v2130_v58 = vsel %vm963_vm0, %v6642_v38, -inf }
 0x731   : > { %v2163_v1 = vrot.slane %v2162_v28, 2  ;;  %v2981_v7 = vpop.f32.mrf.mxu0  ;;  %v2425_v32 = vunpack.c.l.b16 %v2383_v34 }
 0x732   : > { %v3021_v55 = vpack.c.bf16 %v2981_v7, %v2981_v7 }
 0x733   : > { %v2164_v10 = vmax.f32 %v2162_v28, %v2163_v1  ;;  %2460 = vmatpush.bf16.msrb.mxu1 %v2446_v12  ;;  %v2427_v47 = vpack.c.b16 %v2426_v40, %v2425_v32 }
 0x734   : > { %v6648_v50 = vpop.f32.mrf.mxu2  ;;  %v3039_v36 = vunpack.c.l.b16 %v3021_v55 }
 0x735   : > { %v2165_v30 = vrot.slane %v2164_v10, 1  ;;  %v2132_v22 = vsel %vm963_vm0, %v6648_v50, -inf }
 0x737   : > { %v2166_v11 = vmax.f32 %v2164_v10, %v2165_v30  ;;  %2461 = vmatpush.bf16.msrb.mxu1 %v2445_v31 }
 0x739   : > { %v2191_v51 = vsub.f32 %v6529_v21, %v2166_v11  ;;  %v2192_v5 = vsub.f32 %v6550_v62, %v2166_v11  ;;  %v2193_v54 = vsub.f32 %v6559_v52, %v2166_v11  ;;  %v2194_v56 = vsub.f32 %v6579_v37, %v2166_v11  ;;  %v2983_v23 = vpop.f32.mrf.mxu0 }
 0x73a   : > { %v2195_v42 = vsub.f32 %v6595_v13, %v2166_v11  ;;  %v3022_v61 = vpack.c.bf16 %v2983_v23, %v2983_v23  ;;  %v2196_v14 = vsub.f32 %v6611_v41, %v2166_v11  ;;  %v2197_v52 = vsub.f32 %v6623_v26, %v2166_v11 }
 0x73b   : > { %v2247_v49 = vmul.f32 1.442695, %v2191_v51  ;;  %v2249_v53 = vmul.f32 1.442695, %v2192_v5  ;;  %v2251_v6 = vmul.f32 1.442695, %v2193_v54  ;;  %2462 = vmatpush.bf16.msrb.mxu1 %v2444_v18  ;;  %v2198_v29 = vsub.f32 %v6638_v16, %v2166_v11 }
 0x73c   : > { %v2253_v21 = vmul.f32 1.442695, %v2194_v56  ;;  %v6656_v48 = vpop.f32.mrf.mxu2  ;;  %v3040_v62 = vunpack.c.l.b16 %v3022_v61  ;;  %v2255_v37 = vmul.f32 1.442695, %v2195_v42  ;;  %v2126_v13 = vsel %vm963_vm0, %v6617_v39, -inf }
 0x73d   : > { %5701 = vpow2.f32 %v2247_v49  ;;  %v2257_v41 = vmul.f32 1.442695, %v2196_v14  ;;  %v2127_v20 = vmax.f32 %v2125_v57, %v2126_v13  ;;  %v2259_v43 = vmul.f32 1.442695, %v2197_v52 }
 0x73e   : > { %5703 = vpow2.f32 %v2249_v53  ;;  %5195 = vmatmul.msk.bf16.vlgmr.msrb.gmra.mxu1 %vm963_vm0, %v2427_v47  ;;  %v3041_v3 = vpack.c.b16 %v3040_v62, %v3039_v36  ;;  %v2261_v63 = vmul.f32 1.442695, %v2198_v29  ;;  %v2134_v33 = vsel %vm963_vm0, %v6656_v48, -inf  ;;  %v6709_v47 = vpop.f32.mrf.mxu3 }
 0x73f   : > { %5705 = vpow2.f32 %v2251_v6  ;;  %v2129_v16 = vmax.f32 %v2127_v20, %v2128_v17 }
 0x740   : > { %5707 = vpow2.f32 %v2253_v21  ;;  %3043 = vxpose.xlu1.c.b16.start.end [1/1] (short) (narrow) %v3041_v3, 16 }
 0x741   : > { %v2986_v26 = vpop.f32.mrf.mxu0  ;;  %5709 = vpow2.f32 %v2255_v37  ;;  %v2131_v4 = vmax.f32 %v2129_v16, %v2130_v58 }
 0x742   : > { %5711 = vpow2.f32 %v2257_v41  ;;  %v3023_v20 = vpack.c.bf16 %v2986_v26, %v2986_v26 }
 0x743   : > { %v6667_v28 = vpop.eup %5701  ;;  %5713 = vpow2.f32 %v2259_v43  ;;  %v2133_v34 = vmax.f32 %v2131_v4, %v2132_v22 }
 0x744   : > { %v6671_v44 = vpop.eup %5703  ;;  %v2326_v1 = vsel %vm963_vm0, %v6667_v28, 0.0  ;;  %v6675_v7 = vpop.f32.mrf.mxu2  ;;  %5715 = vpow2.f32 %v2261_v63  ;;  %v3084_v4 = vunpack.c.l.b16 %v3023_v20 }
 0x745   : > { %v6677_v12 = vpop.eup %5705  ;;  %v2327_v35 = vsel %vm963_vm0, %v6671_v44, 0.0  ;;  %v2136_v11 = vsel %vm963_vm0, %v6675_v7, -inf  ;;  %v2135_v5 = vmax.f32 %v2133_v34, %v2134_v33 }
 0x746   : > { %v6683_v2 = vpop.eup %5707  ;;  %v2328_v10 = vadd.f32 %v2327_v35, %v2326_v1  ;;  %v2329_v24 = vsel %vm963_vm0, %v6677_v12, 0.0  ;;  %v6715_v63 = vpop.f32.mrf.mxu3 }
 0x747   : > { %v6689_v30 = vpop.eup %5709  ;;  %v2331_v55 = vsel %vm963_vm0, %v6683_v2, 0.0  ;;  %v2137_v32 = vmax.f32 %v2135_v5, %v2136_v11 }
 0x748   : > { %v2330_v31 = vadd.f32 %v2329_v24, %v2328_v10  ;;  %v6695_v18 = vpop.eup %5711  ;;  %v2333_v54 = vsel %vm963_vm0, %v6689_v30, 0.0 }
 0x749   : > { %v2988_v40 = vpop.f32.mrf.mxu0  ;;  %v6699_v56 = vpop.eup %5713  ;;  %v2335_v36 = vsel %vm963_vm0, %v6695_v18, 0.0 }
 0x74a   : > { %v2332_v51 = vadd.f32 %v2331_v55, %v2330_v31  ;;  %v6707_v53 = vpop.eup %5715  ;;  %v2337_v14 = vsel %vm963_vm0, %v6699_v56, 0.0  ;;  %v3024_v43 = vpack.c.bf16 %v2988_v40, %v2988_v40 }
 0x74b   : > { %v2339_v52 = vsel %vm963_vm0, %v6707_v53, 0.0 }
 0x74c   : > { %v2334_v23 = vadd.f32 %v2333_v54, %v2332_v51  ;;  %v6701_v42 = vpop.f32.mrf.mxu2  ;;  %v3085_v24 = vunpack.c.l.b16 %v3024_v43 }
 0x74d   : > { %v2138_v49 = vsel %vm963_vm0, %v6701_v42, -inf }
 0x74e   : > { %v2336_v6 = vadd.f32 %v2335_v36, %v2334_v23  ;;  %v2139_v61 = vmax.f32 %v2137_v32, %v2138_v49  ;;  %v3086_v32 = vpack.c.b16 %v3085_v24, %v3084_v4 }
 0x750   : > { %v2338_v21 = vadd.f32 %v2337_v14, %v2336_v6  ;;  %v2140_v62 = vrot.slane %v2139_v61, 4 }
 0x751   : > { %v2991_v37 = vpop.f32.mrf.mxu0 }
 0x752   : > { %v2340_v13 = vadd.f32 %v2339_v52, %v2338_v21  ;;  %v2141_v3 = vmax.f32 %v2139_v61, %v2140_v62  ;;  %v3025_v1 = vpack.c.bf16 %v2991_v37, %v2991_v37  ;;  %v6725_v21 = vpop.f32.mrf.mxu3 }
 0x754   : > { %v2341_v29 = vrot.slane %v2340_v13, 4  ;;  %v2142_v41 = vrot.slane %v2141_v3, 2  ;;  %v3129_v40 = vunpack.c.l.b16 %v3025_v1 }
 0x756   : > { %v2342_v57 = vadd.f32 %v2341_v29, %v2340_v13  ;;  %v2143_v17 = vmax.f32 %v2141_v3, %v2142_v41 }
 0x758   : > { %v2343_v58 = vrot.slane %v2342_v57, 2  ;;  %v2144_v16 = vrot.slane %v2143_v17, 1 }
 0x759   : > { %v2993_v35 = vpop.f32.mrf.mxu0 }
 0x75a   : > { %v2344_v22 = vadd.f32 %v2343_v58, %v2342_v57  ;;  %v2145_v10 = vmax.f32 %v2143_v17, %v2144_v16  ;;  %v3026_v33 = vpack.c.bf16 %v2993_v35, %v2993_v35 }
 0x75c   : > { %v2345_v31 = vrot.slane %v2344_v22, 1  ;;  %v2183_v34 = vsub.f32 %v6602_v9, %v2145_v10  ;;  %v2184_v55 = vsub.f32 %v6617_v39, %v2145_v10  ;;  %v2185_v11 = vsub.f32 %v6627_v8, %v2145_v10 }
 0x75d   : > { %v2186_v26 = vsub.f32 %v6642_v38, %v2145_v10  ;;  %v2187_v5 = vsub.f32 %v6648_v50, %v2145_v10  ;;  %v2188_v36 = vsub.f32 %v6656_v48, %v2145_v10  ;;  %v3130_v6 = vunpack.c.l.b16 %v3026_v33  ;;  %v6727_v50 = vpop.permute.xlu2 %1617 }
 0x75e   : > { %v2346_v51 = vadd.f32 %v2345_v31, %v2344_v22  ;;  %v2231_v54 = vmul.f32 1.442695, %v2183_v34  ;;  %v2233_v23 = vmul.f32 1.442695, %v2184_v55  ;;  %v2235_v49 = vmul.f32 1.442695, %v2185_v11 }
 0x75f   : > { %v2237_v61 = vmul.f32 1.442695, %v2186_v26  ;;  %v3131_v9 = vpack.c.b16 %v3130_v6, %v3129_v40  ;;  %v2189_v8 = vsub.f32 %v6675_v7, %v2145_v10  ;;  %v2190_v38 = vsub.f32 %v6701_v42, %v2145_v10  ;;  %v1787_v40 = vpop.f32.mrf.mxu3 }
 0x760   : > { %5717 = vrcp.f32 %v2346_v51  ;;  %v2239_v14 = vmul.f32 1.442695, %v2187_v5  ;;  %v2241_v62 = vmul.f32 1.442695, %v2188_v36 }
 0x761   : > { %5719 = vpow2.f32 %v2231_v54  ;;  %v2996_v39 = vpop.f32.mrf.mxu0  ;;  %5642 = vxpose.binary.xlu2.c.b16.start.end [1/2] (short) (narrow) %v3086_v32, %v3131_v9, 16  ;;  %v2243_v37 = vmul.f32 1.442695, %v2189_v8  ;;  %v2245_v13 = vmul.f32 1.442695, %v2190_v38 }
 0x762   : > { %5721 = vpow2.f32 %v2233_v23  ;;  %v3027_v48 = vpack.c.bf16 %v2996_v39, %v2996_v39 }
 0x763   : > { %5723 = vpow2.f32 %v2235_v49 }
 0x764   : > { %5725 = vpow2.f32 %v2237_v61  ;;  %v3174_v17 = vunpack.c.l.b16 %v3027_v48 }
 0x765   : > { %5727 = vpow2.f32 %v2239_v14  ;;  %v1623_v51 = vpop.permute.xlu2 %1622 }
 0x766   : > { %v5718_v52 = vpop.eup %5717  ;;  %5729 = vpow2.f32 %v2241_v62  ;;  %v1788_v8 = vadd.f32 %v1787_v40, %v1623_v51 }
 0x767   : > { %v6729_v3 = vpop.eup %5719  ;;  %v2381_v7 = vmul.f32 %v5718_v52, %v6699_v56  ;;  %v2382_v42 = vmul.f32 %v5718_v52, %v6707_v53  ;;  %v2379_v29 = vmul.f32 %v5718_v52, %v6689_v30  ;;  %v2380_v20 = vmul.f32 %v5718_v52, %v6695_v18 }
 0x768   : > { %v6734_v41 = vpop.eup %5721  ;;  %v2305_v57 = vsel %vm963_vm0, %v6729_v3, 0.0  ;;  %v2377_v43 = vmul.f32 %v5718_v52, %v6677_v12  ;;  %5731 = vpow2.f32 %v2243_v37  ;;  %v2378_v23 = vmul.f32 %v5718_v52, %v6683_v2 }
 0x769   : > { %v6740_v58 = vpop.eup %5723  ;;  %v2306_v16 = vsel %vm963_vm0, %v6734_v41, 0.0  ;;  %v2998_v56 = vpop.f32.mrf.mxu0  ;;  %v2421_v1 = vpack.c.bf16 %v2381_v7, %v2381_v7  ;;  %v2422_v53 = vpack.c.bf16 %v2382_v42, %v2382_v42  ;;  %v2419_v35 = vpack.c.bf16 %v2379_v29, %v2379_v29 }
 0x76a   : > { %v6744_v30 = vpop.eup %5725  ;;  %v2307_v22 = vadd.f32 %v2306_v16, %v2305_v57  ;;  %v3028_v10 = vpack.c.bf16 %v2998_v56, %v2998_v56  ;;  %v2420_v4 = vpack.c.bf16 %v2380_v20, %v2380_v20  ;;  %5733 = vpow2.f32 %v2245_v13 }
 0x76b   : > { %v2308_v18 = vsel %vm963_vm0, %v6740_v58, 0.0  ;;  %v2580_v12 = vunpack.c.l.b16 %v2421_v1  ;;  %v2581_v24 = vunpack.c.l.b16 %v2422_v53  ;;  %v5728_v33 = vpop.eup %5727  ;;  %v2310_v34 = vsel %vm963_vm0, %v6744_v30, 0.0 }
 0x76c   : > { %v2309_v31 = vadd.f32 %v2308_v18, %v2307_v22  ;;  %v3175_v55 = vunpack.c.l.b16 %v3028_v10  ;;  %v2578_v11 = vunpack.c.l.b16 %v2419_v35  ;;  %v5730_v26 = vpop.eup %5729  ;;  %v2579_v54 = vunpack.c.l.b16 %v2420_v4 }
 0x76d   : > { %v2585_v5 = vpack.c.b16 %v2581_v24, %v2580_v12  ;;  %v2417_v32 = vpack.c.bf16 %v2377_v43, %v2377_v43  ;;  %v2312_v6 = vsel %vm963_vm0, %v5728_v33, 0.0  ;;  %v2418_v61 = vpack.c.bf16 %v2378_v23, %v2378_v23 }
 0x76e   : > { %v2311_v36 = vadd.f32 %v2310_v34, %v2309_v31  ;;  %v3176_v49 = vpack.c.b16 %v3175_v55, %v3174_v17  ;;  %v2375_v9 = vmul.f32 %v5718_v52, %v6667_v28  ;;  %v5732_v39 = vpop.eup %5731  ;;  %v2314_v14 = vsel %vm963_vm0, %v5730_v26, 0.0  ;;  %v1608_v31 = vpop.permute.xlu2 %1607 }
 0x76f   : > { %2597 = vmatpush.bf16.msrb.mxu2 %v2585_v5  ;;  %v2376_v62 = vmul.f32 %v5718_v52, %v6671_v44  ;;  %v2584_v37 = vpack.c.b16 %v2579_v54, %v2578_v11  ;;  %v2576_v2 = vunpack.c.l.b16 %v2417_v32  ;;  %v2577_v13 = vunpack.c.l.b16 %v2418_v61 }
 0x770   : > { %v2313_v38 = vadd.f32 %v2312_v6, %v2311_v36  ;;  %3178 = vxpose.xlu0.c.b16.start.end [1/1] (short) (narrow) %v3176_v49, 16  ;;  %v5734_v48 = vpop.eup %5733  ;;  %v2415_v7 = vpack.c.bf16 %v2375_v9, %v2375_v9  ;;  %v1786_v42 = vadd.f32 %v6725_v21, %v6727_v50  ;;  %v2316_v28 = vsel %vm963_vm0, %v5732_v39, 0.0 }
 0x771   : > { %v2416_v57 = vpack.c.bf16 %v2376_v62, %v2376_v62  ;;  %v2390_v17 = vpack.c.bf16 %v1788_v8, %v1788_v8  ;;  %v2318_v43 = vsel %vm963_vm0, %v5734_v48, 0.0  ;;  %v2583_v16 = vpack.c.b16 %v2577_v13, %v2576_v2 }
 0x772   : > { %v2315_v29 = vadd.f32 %v2314_v14, %v2313_v38  ;;  %v2574_v56 = vunpack.c.l.b16 %v2415_v7  ;;  %v2389_v52 = vpack.c.bf16 %v1786_v42, %v1786_v42  ;;  %v1781_v7 = vadd.f32 %v6709_v47, %v1608_v31  ;;  %v782_v47 = vld [vmem:[%s7879_s13 + $0x18] sm:$0xff] }
 0x773   : > { %2598 = vmatpush.bf16.msrb.mxu2 %v2584_v37  ;;  %v2575_v44 = vunpack.c.l.b16 %v2416_v57  ;;  %v2564_v53 = vunpack.c.l.b16 %v2390_v17  ;;  %v914_v31 = vld [vmem:[%s7881_s15 + $0x1f8] sm:$0xff] }
 0x774   : > { %v2317_v20 = vadd.f32 %v2316_v28, %v2315_v29  ;;  %v2563_v10 = vunpack.c.l.b16 %v2389_v52  ;;  %v2387_v28 = vpack.c.bf16 %v1781_v7, %v1781_v7  ;;  %v894_v52 = vld [vmem:[%s7881_s15 + $0x158] sm:$0xff]  ;;  %v880_v7 = vld [vmem:[%s7881_s15 + $0xe8] sm:$0xff] }
 0x775   : > { %v2582_v22 = vpack.c.b16 %v2575_v44, %v2574_v56  ;;  %v786_v56 = vld [vmem:[%s7879_s13 + $0x38] sm:$0xff]  ;;  %v895_v44 = vld [vmem:[%s7881_s15 + $0x160] sm:$0xff] }
 0x776   : > { %v2319_v1 = vadd.f32 %v2318_v43, %v2317_v20  ;;  %v2565_v50 = vpack.c.b16 %v2564_v53, %v2563_v10  ;;  %v1613_v14 = vpop.permute.xlu2 %1612  ;;  %v2517_v20 = vunpack.c.l.b16 %v2387_v28  ;;  %v780_v53 = vld [vmem:[%s7879_s13 + $0x8] sm:$0xff]  ;;  %v909_v10 = vld [vmem:[%s7881_s15 + $0x1d0] sm:$0xff] }
 0x777   : > { %2599 = vmatpush.bf16.msrb.mxu2 %v2583_v16  ;;  %v783_v16 = vld [vmem:[%s7879_s13 + $0x20] sm:$0xff]  ;;  %v904_v28 = vld [vmem:[%s7881_s15 + $0x1a8] sm:$0xff] }
 0x778   : > { %v2320_v35 = vrot.slane %v2319_v1, 4 }
 0x77a   : > { %v2321_v21 = vadd.f32 %v2320_v35, %v2319_v1  ;;  %v891_v1 = vld [vmem:[%s7881_s15 + $0x140] sm:$0xff]  ;;  %v912_v35 = vld [vmem:[%s7881_s15 + $0x1e8] sm:$0xff] }
 0x77b   : > { %2600 = vmatpush.bf16.msrb.mxu2 %v2582_v22  ;;  %v785_v22 = vld [vmem:[%s7879_s13 + $0x30] sm:$0xff] }
 0x77c   : > { %v2322_v4 = vrot.slane %v2321_v21, 2 }
 0x77e   : > { %v2323_v18 = vadd.f32 %v2322_v4, %v2321_v21  ;;  %5198 = vmatmul.msk.bf16.vlgmr.msrb.gmra.mxu2 %vm963_vm0, %v2565_v50  ;;  %v898_v21 = vld [vmem:[%s7881_s15 + $0x178] sm:$0xff]  ;;  %v779_v50 = vld [vmem:[%s7879_s13] sm:$0xff]  ;;  %v888_v4 = vld [vmem:[%s7881_s15 + $0x128] sm:$0xff] }
 0x780   : > { %v2324_v12 = vrot.slane %v2323_v18, 1 }
 0x782   : > { %v2325_v24 = vadd.f32 %v2324_v12, %v2323_v18  ;;  %v893_v18 = vld [vmem:[%s7881_s15 + $0x150] sm:$0xff]  ;;  %v784_v12 = vld [vmem:[%s7879_s13 + $0x28] sm:$0xff] }
 0x784   : > { %5735 = vrcp.f32 %v2325_v24  ;;  %v865_v24 = vld [vmem:[%s7881_s15 + $0x70] sm:$0xff] }
 0x78a   : > { %v5736_v34 = vpop.eup %5735 }
 0x78b   : > { %v2373_v55 = vmul.f32 %v5736_v34, %v5732_v39  ;;  %v2374_v11 = vmul.f32 %v5736_v34, %v5734_v48  ;;  %v2371_v40 = vmul.f32 %v5736_v34, %v5728_v33  ;;  %v2372_v51 = vmul.f32 %v5736_v34, %v5730_v26 }
 0x78c   : > { %v2369_v5 = vmul.f32 %v5736_v34, %v6740_v58  ;;  %v2370_v54 = vmul.f32 %v5736_v34, %v6744_v30  ;;  %v2367_v8 = vmul.f32 %v5736_v34, %v6729_v3  ;;  %v2368_v38 = vmul.f32 %v5736_v34, %v6734_v41  ;;  %v781_v3 = vld [vmem:[%s7879_s13 + $0x10] sm:$0xff] }
 0x78d   : > { %v2413_v23 = vpack.c.bf16 %v2373_v55, %v2373_v55  ;;  %v2414_v32 = vpack.c.bf16 %v2374_v11, %v2374_v11  ;;  %v2411_v36 = vpack.c.bf16 %v2371_v40, %v2371_v40  ;;  %v2412_v49 = vpack.c.bf16 %v2372_v51, %v2372_v51  ;;  %v897_v34 = vld [vmem:[%s7881_s15 + $0x170] sm:$0xff]  ;;  %v886_v11 = vld [vmem:[%s7881_s15 + $0x118] sm:$0xff]  ;;  %v911_v40 = vld [vmem:[%s7881_s15 + $0x1e0] sm:$0xff] }
 0x78e   : > { %v2409_v9 = vpack.c.bf16 %v2369_v5, %v2369_v5  ;;  %v2410_v26 = vpack.c.bf16 %v2370_v54, %v2370_v54  ;;  %v1783_v58 = vadd.f32 %v6715_v63, %v1613_v14  ;;  %v2407_v30 = vpack.c.bf16 %v2367_v8, %v2367_v8  ;;  %v896_v51 = vld [vmem:[%s7881_s15 + $0x168] sm:$0xff]  ;;  %v863_v5 = vld [vmem:[%s7881_s15 + $0x60] sm:$0xff] }
 0x78f   : > { %v2534_v6 = vunpack.c.l.b16 %v2413_v23  ;;  %v2535_v61 = vunpack.c.l.b16 %v2414_v32  ;;  %v2532_v62 = vunpack.c.l.b16 %v2411_v36  ;;  %v2533_v33 = vunpack.c.l.b16 %v2412_v49  ;;  %v890_v23 = vld [vmem:[%s7881_s15 + $0x138] sm:$0xff]  ;;  %v913_v32 = vld [vmem:[%s7881_s15 + $0x1f0] sm:$0xff]  ;;  %v884_v36 = vld [vmem:[%s7881_s15 + $0x108] sm:$0xff] }
 0x790   : > { %v2530_v37 = vunpack.c.l.b16 %v2409_v9  ;;  %v2531_v2 = vunpack.c.l.b16 %v2410_v26  ;;  %v2408_v13 = vpack.c.bf16 %v2368_v38, %v2368_v38  ;;  %v2388_v42 = vpack.c.bf16 %v1783_v58, %v1783_v58  ;;  %v861_v9 = vld [vmem:[%s7881_s15 + $0x50] sm:$0xff]  ;;  %v908_v38 = vld [vmem:[%s7881_s15 + $0x1c8] sm:$0xff]  ;;  %v910_v58 = vld [vmem:[%s7881_s15 + $0x1d8] sm:$0xff] }
 0x791   : > { %v2539_v39 = vpack.c.b16 %v2535_v61, %v2534_v6  ;;  %v2538_v48 = vpack.c.b16 %v2533_v33, %v2532_v62  ;;  %v2528_v29 = vunpack.c.l.b16 %v2407_v30  ;;  %v887_v6 = vld [vmem:[%s7881_s15 + $0x120] sm:$0xff]  ;;  %v892_v61 = vld [vmem:[%s7881_s15 + $0x148] sm:$0xff]  ;;  %v882_v33 = vld [vmem:[%s7881_s15 + $0xf8] sm:$0xff] }
 0x792   : > { %v2537_v41 = vpack.c.b16 %v2531_v2, %v2530_v37  ;;  %v2529_v57 = vunpack.c.l.b16 %v2408_v13  ;;  %v2518_v63 = vunpack.c.l.b16 %v2388_v42  ;;  %v885_v26 = vld [vmem:[%s7881_s15 + $0x110] sm:$0xff]  ;;  %v906_v37 = vld [vmem:[%s7881_s15 + $0x1b8] sm:$0xff]  ;;  %v907_v2 = vld [vmem:[%s7881_s15 + $0x1c0] sm:$0xff] }
 0x793   : > { %2551 = vmatpush.bf16.msra.mxu1 %v2539_v39  ;;  %v889_v39 = vld [vmem:[%s7881_s15 + $0x130] sm:$0xff]  ;;  %v883_v42 = vld [vmem:[%s7881_s15 + $0x100] sm:$0xff] }
 0x794   : > { %v2536_v17 = vpack.c.b16 %v2529_v57, %v2528_v29  ;;  %v2519_v43 = vpack.c.b16 %v2518_v63, %v2517_v20  ;;  %v857_v57 = vld [vmem:[%s7881_s15 + $0x30] sm:$0xff] }
 0x795   : > { %v905_v63 = vld [vmem:[%s7881_s15 + $0x1b0] sm:$0xff] }
 0x797   : > { %2552 = vmatpush.bf16.msra.mxu1 %v2538_v48  ;;  %v859_v48 = vld [vmem:[%s7881_s15 + $0x40] sm:$0xff] }
 0x79a   : > { %3469 = vperm.xlu1 %5632, %v781_v3   ;;  %v866_v3 = vld [vmem:[%s7881_s15 + $0x78] sm:$0xff] }
 0x79b   : > { %2553 = vmatpush.bf16.msra.mxu1 %v2537_v41 }
 0x79f   : > { %2554 = vmatpush.bf16.msra.mxu1 %v2536_v17 }
 0x7a2   : > { %5197 = vmatmul.msk.bf16.vlgmr.msra.gmra.mxu1 %vm963_vm0, %v2519_v43  ;;  %3474 = vperm.xlu1 %5632, %v782_v47   ;;  %v878_v43 = vld [vmem:[%s7881_s15 + $0xd8] sm:$0xff]  ;;  %v881_v47 = vld [vmem:[%s7881_s15 + $0xf0] sm:$0xff] }
 0x7aa   : > { %3479 = vperm.xlu1 %5632, %v783_v16   ;;  %v5544_v16 = vld [vmem:[%s7873_s7] sm:$0xff] }
 0x7ac   : > { %v2510_v55 = vpop.f32.mrf.mxu2 }
 0x7b2   : > { %3494 = vperm.xlu1 %5632, %v786_v56   ;;  %v864_v56 = vld [vmem:[%s7881_s15 + $0x68] sm:$0xff] }
 0x7b4   : > { %v2512_v54 = vpop.f32.mrf.mxu2 }
 0x7b5   : > { %v2608_v17 = vpack.c.bf16 %v2512_v54, %v2510_v55  ;;  %v856_v55 = vld [vmem:[%s7881_s15 + $0x28] sm:$0xff]  ;;  %v858_v54 = vld [vmem:[%s7881_s15 + $0x38] sm:$0xff] }
 0x7ba   : > { %3871 = vperm.xlu1 %5632, %v895_v44   ;;  %v875_v44 = vld [vmem:[%s7881_s15 + $0xc0] sm:$0xff] }
 0x7bb   : > { %v2464_v62 = vpop.f32.mrf.mxu1 }
 0x7c2   : > { %3866 = vperm.xlu1 %5632, %v894_v52   ;;  %v902_v52 = vld [vmem:[%s7881_s15 + $0x198] sm:$0xff] }
 0x7c3   : > { %v2466_v30 = vpop.f32.mrf.mxu1 }
 0x7c4   : > { %v2607_v20 = vpack.c.bf16 %v2466_v30, %v2464_v62  ;;  %v852_v62 = vld [vmem:[%s7881_s15 + $0x8] sm:$0xff] }
 0x7c5   : > { %v868_v30 = vld [vmem:[%s7881_s15 + $0x88] sm:$0xff] }
 0x7ca   : > { %3851 = vperm.xlu1 %5632, %v891_v1   ;;  %3464 = vperm.xlu2 %5630, %v780_v53   ;;  %v903_v1 = vld [vmem:[%s7881_s15 + $0x1a0] sm:$0xff]  ;;  %v854_v53 = vld [vmem:[%s7881_s15 + $0x18] sm:$0xff] }
 0x7d2   : > { %3956 = vperm.xlu1 %5632, %v912_v35   ;;  %3489 = vperm.xlu2 %5630, %v785_v22   ;;  %v879_v35 = vld [vmem:[%s7881_s15 + $0xe0] sm:$0xff]  ;;  %v5545_v22 = vld [vmem:[%s7873_s7 + $0x8] sm:$0xff] }
 0x7da   : > { %3941 = vperm.xlu1 %5632, %v909_v10   ;;  %3886 = vperm.xlu2 %5630, %v898_v21   ;;  %v862_v10 = vld [vmem:[%s7881_s15 + $0x58] sm:$0xff]  ;;  %v851_v21 = vld [vmem:[%s7881_s15] sm:$0xff] }
 0x7de   : > { %3459 = vperm.xlu0 %5631, %v779_v50   ;;  %v900_v50 = vld [vmem:[%s7881_s15 + $0x188] sm:$0xff] }
 0x7e2   : > { %3836 = vperm.xlu1 %5632, %v888_v4   ;;  %3861 = vperm.xlu2 %5630, %v893_v18   ;;  %v901_v4 = vld [vmem:[%s7881_s15 + $0x190] sm:$0xff]  ;;  %v872_v18 = vld [vmem:[%s7881_s15 + $0xa8] sm:$0xff] }
 0x7e6   : > { %3484 = vperm.xlu0 %5631, %v784_v12   ;;  %v877_v12 = vld [vmem:[%s7881_s15 + $0xd0] sm:$0xff] }
 0x7ea   : > { %3721 = vperm.xlu1 %5632, %v865_v24   ;;  %3966 = vperm.xlu2 %5630, %v914_v31   ;;  %v5546_v24 = vld [vmem:[%s7873_s7 + $0x10] sm:$0xff]  ;;  %v860_v31 = vld [vmem:[%s7881_s15 + $0x48] sm:$0xff] }
 0x7ee   : > { %3881 = vperm.xlu0 %5631, %v897_v34   ;;  %v867_v34 = vld [vmem:[%s7881_s15 + $0x80] sm:$0xff] }
 0x7f2   : > { %3826 = vperm.xlu1 %5632, %v886_v11   ;;  %3951 = vperm.xlu2 %5630, %v911_v40   ;;  %v899_v11 = vld [vmem:[%s7881_s15 + $0x180] sm:$0xff]  ;;  %v930_v40 = vld [vmem:[%s7883_s17 + $0x38] sm:$0xff] }
 0x7f6   : > { %3876 = vperm.xlu0 %5631, %v896_v51   ;;  %v853_v51 = vld [vmem:[%s7881_s15 + $0x10] sm:$0xff] }
 0x7fa   : > { %3711 = vperm.xlu1 %5632, %v863_v5   ;;  %3846 = vperm.xlu2 %5630, %v890_v23   ;;  %v5547_v5 = vld [vmem:[%s7873_s7 + $0x18] sm:$0xff]  ;;  %v925_v23 = vld [vmem:[%s7883_s17 + $0x10] sm:$0xff] }
 0x7fe   : > { %3961 = vperm.xlu0 %5631, %v913_v32   ;;  %v874_v32 = vld [vmem:[%s7881_s15 + $0xb8] sm:$0xff] }
 0x801   : > { %v2602_v49 = vpop.f32.mrf.mxu2 }
 0x802   : > { %3816 = vperm.xlu1 %5632, %v884_v36   ;;  %3831 = vperm.xlu2 %5630, %v887_v6   ;;  %v855_v36 = vld [vmem:[%s7881_s15 + $0x20] sm:$0xff] }
 0x803   : > { %v871_v6 = vld [vmem:[%s7881_s15 + $0xa0] sm:$0xff] }
 0x806   : > { %3856 = vperm.xlu0 %5631, %v892_v61   ;;  %v876_v61 = vld [vmem:[%s7881_s15 + $0xc8] sm:$0xff] }
 0x809   : > { %v2604_v8 = vpop.f32.mrf.mxu2 }
 0x80a   : > { %v2610_v14 = vpack.c.bf16 %v2604_v8, %v2602_v49  ;;  %3701 = vperm.xlu1 %5632, %v861_v9   ;;  %3936 = vperm.xlu2 %5630, %v908_v38   ;;  %v924_v49 = vld [vmem:[%s7883_s17 + $0x8] sm:$0xff]  ;;  %v941_v9 = vld [vmem:[%s7885_s19 + $0x10] sm:$0xff]  ;;  %v870_v8 = vld [vmem:[%s7881_s15 + $0x98] sm:$0xff] }
 0x80b   : > { %v873_v38 = vld [vmem:[%s7881_s15 + $0xb0] sm:$0xff] }
 0x80c   : > { %2687 = vmatpush.bf16.msrb.mxu1 %v2610_v14  ;;  %v944_v14 = vld [vmem:[%s7885_s19 + $0x28] sm:$0xff] }
 0x80e   : > { %3841 = vperm.xlu0 %5631, %v889_v39   ;;  %v929_v39 = vld [vmem:[%s7883_s17 + $0x30] sm:$0xff] }
 0x812   : > { %3806 = vperm.xlu1 %5632, %v882_v33   ;;  %3821 = vperm.xlu2 %5630, %v885_v26   ;;  %v928_v33 = vld [vmem:[%s7883_s17 + $0x28] sm:$0xff]  ;;  %v869_v26 = vld [vmem:[%s7881_s15 + $0x90] sm:$0xff] }
 0x816   : > { %3946 = vperm.xlu0 %5631, %v910_v58   ;;  %v923_v58 = vld [vmem:[%s7883_s17] sm:$0xff] }
 0x81a   : > { %3691 = vperm.xlu1 %5632, %v859_v48   ;;  %3926 = vperm.xlu2 %5630, %v906_v37   ;;  %v940_v48 = vld [vmem:[%s7885_s19 + $0x8] sm:$0xff]  ;;  %v927_v37 = vld [vmem:[%s7883_s17 + $0x20] sm:$0xff] }
 0x81e   : > { %3931 = vperm.xlu0 %5631, %v907_v2   ;;  %v943_v2 = vld [vmem:[%s7885_s19 + $0x20] sm:$0xff] }
 0x81f   : > { %v2556_v13 = vpop.f32.mrf.mxu1 }
 0x822   : > { %3796 = vperm.xlu1 %5632, %v880_v7   ;;  %3811 = vperm.xlu2 %5630, %v883_v42   ;;  %v946_v7 = vld [vmem:[%s7885_s19 + $0x38] sm:$0xff]  ;;  %v939_v42 = vld [vmem:[%s7885_s19] sm:$0xff] }
 0x826   : > { %3726 = vperm.xlu0 %5631, %v866_v3  }
 0x827   : > { %v2558_v41 = vpop.f32.mrf.mxu1 }
 0x828   : > { %v2609_v29 = vpack.c.bf16 %v2558_v41, %v2556_v13  ;;  %v926_v13 = vld [vmem:[%s7883_s17 + $0x18] sm:$0xff] }
 0x829   : > { %v942_v41 = vld [vmem:[%s7885_s19 + $0x18] sm:$0xff] }
 0x82a   : > { %2688 = vmatpush.bf16.msrb.mxu1 %v2609_v29  ;;  %3681 = vperm.xlu1 %5632, %v857_v57   ;;  %v945_v57 = vld [vmem:[%s7885_s19 + $0x30] sm:$0xff] }
 0x82b   : > { %3916 = vperm.xlu2 %5630, %v904_v28  }
 0x82e   : > { %2689 = vmatpush.bf16.msrb.mxu1 %v2608_v17  ;;  %3921 = vperm.xlu0 %5631, %v905_v63   ;;  %v2614_v17 = vpop.permute.xlu0 %2613 }
 0x832   : > { %2690 = vmatpush.bf16.msrb.mxu1 %v2607_v20  ;;  %3786 = vperm.xlu1 %5632, %v878_v43   ;;  %v2619_v43 = vpop.permute.xlu2 %2618 }
 0x833   : > { %3801 = vperm.xlu2 %5630, %v881_v47   ;;  %v2624_v47 = vpop.permute.xlu1 %2623 }
 0x835   : > { %5215 = vmatmul.msk.bf16.vlgmr.msrb.gmra.mxu1 %vm963_vm0, %v5544_v16 }
 0x836   : > { %3716 = vperm.xlu0 %5631, %v864_v56   ;;  %v2629_v16 = vpop.permute.xlu0 %2628 }
 0x83a   : > { %3771 = vperm.xlu1 %5632, %v875_v44  }
 0x83b   : > { %3906 = vperm.xlu2 %5630, %v902_v52  }
 0x83e   : > { %3911 = vperm.xlu0 %5631, %v903_v1  }
 0x842   : > { %3666 = vperm.xlu1 %5632, %v854_v53  }
 0x843   : > { %3791 = vperm.xlu2 %5630, %v879_v35  }
 0x845   : > { %5216 = vmatmul.msk.bf16.gmra.mxu1 %vm963_vm0, %v5545_v22  ;;  %v2634_v22 = vpop.permute.xlu2 %2633 }
 0x846   : > { %3706 = vperm.xlu0 %5631, %v862_v10  }
 0x84a   : > { %3651 = vperm.xlu1 %5632, %v851_v21  }
 0x84b   : > { %3896 = vperm.xlu2 %5630, %v900_v50  }
 0x84e   : > { %3901 = vperm.xlu0 %5631, %v901_v4   ;;  %v2639_v4 = vpop.permute.xlu1 %2638 }
 0x852   : > { %3756 = vperm.xlu1 %5632, %v872_v18  }
 0x853   : > { %3781 = vperm.xlu2 %5630, %v877_v12  }
 0x855   : > { %5217 = vmatmul.msk.bf16.gmra.mxu1 %vm963_vm0, %v5546_v24 }
 0x856   : > { %3696 = vperm.xlu0 %5631, %v860_v31   ;;  %v2644_v31 = vpop.permute.xlu0 %2643 }
 0x85a   : > { %3731 = vperm.xlu1 %5632, %v867_v34  }
 0x85b   : > { %3676 = vperm.xlu2 %5630, %v856_v55  }
 0x85e   : > { %3891 = vperm.xlu0 %5631, %v899_v11  }
 0x862   : > { %4767 = vperm.xlu1 %5632, %v930_v40  }
 0x863   : > { %3661 = vperm.xlu2 %5630, %v853_v51  }
 0x865   : > { %5218 = vmatmul.msk.bf16.gmra.mxu1 %vm963_vm0, %v5547_v5 }
 0x866   : > { %3686 = vperm.xlu0 %5631, %v858_v54  }
 0x86a   : > { %4742 = vperm.xlu1 %5632, %v925_v23  }
 0x86b   : > { %3766 = vperm.xlu2 %5630, %v874_v32   ;;  %v2649_v32 = vpop.permute.xlu2 %2648 }
 0x86e   : > { %3671 = vperm.xlu0 %5631, %v855_v36  }
 0x872   : > { %4737 = vperm.xlu1 %5632, %v924_v49  }
 0x873   : > { %3751 = vperm.xlu2 %5630, %v871_v6  }
 0x876   : > { %3776 = vperm.xlu0 %5631, %v876_v61  }
 0x87a   : > { %4892 = vperm.xlu1 %5632, %v941_v9  }
 0x87b   : > { %3746 = vperm.xlu2 %5630, %v870_v8  }
 0x87e   : > { %3761 = vperm.xlu0 %5631, %v873_v38  }
 0x882   : > { %4907 = vperm.xlu1 %5632, %v944_v14  }
 0x883   : > { %4762 = vperm.xlu2 %5630, %v929_v39  }
 0x886   : > { %3656 = vperm.xlu0 %5631, %v852_v62  }
 0x88b   : > { %4757 = vperm.xlu2 %5630, %v928_v33  }
 0x88e   : > { %3741 = vperm.xlu0 %5631, %v869_v26  }
 0x893   : > { %4732 = vperm.xlu2 %5630, %v923_v58  }
 0x896   : > { %3736 = vperm.xlu0 %5631, %v868_v30  }
 0x89b   : > { %4887 = vperm.xlu2 %5630, %v940_v48  }
 0x89e   : > { %4752 = vperm.xlu0 %5631, %v927_v37  }
 0x8a3   : > { %4902 = vperm.xlu2 %5630, %v943_v2  }
 0x8a6   : > { %4747 = vperm.xlu0 %5631, %v926_v13  }
 0x8ab   : > { %4917 = vperm.xlu2 %5630, %v946_v7  }
 0x8ae   : > { %4882 = vperm.xlu0 %5631, %v939_v42  }
 0x8b2   : > { %v2692_v3 = vpop.f32.mrf.mxu1 }
 0x8b3   : > { %v2693_v52 = vadd.f32 %v2692_v3, %v2614_v17 }
 0x8b5   : > { %v7051_v10 = vadd.f32 %v2693_v52, %v6239_v59 }
 0x8b6   : > { %4897 = vperm.xlu0 %5631, %v942_v41  }
 0x8b7   : > { %v2720_v34 = vsel %vm963_vm0, %v7051_v10, 0.0 }
 0x8ba   : > { %v2694_v29 = vpop.f32.mrf.mxu1 }
 0x8bb   : > { %v2695_v56 = vadd.f32 %v2694_v29, %v2619_v43 }
 0x8bd   : > { %v7048_v53 = vadd.f32 %v2695_v56, %v6237_v45 }
 0x8be   : > { %4912 = vperm.xlu0 %5631, %v945_v57  }
 0x8bf   : > { %v2721_v18 = vsel %vm963_vm0, %v7048_v53, 0.0 }
 0x8c0   : > { %v2722_v11 = vadd.f32 %v2721_v18, %v2720_v34 }
 0x8c2   : > { %v2697_v28 = vpop.f32.mrf.mxu1 }
 0x8c3   : > { %v2698_v1 = vadd.f32 %v2697_v28, %v2624_v47 }
 0x8c5   : > { %v7054_v21 = vadd.f32 %v2698_v1, %v6241_v46 }
 0x8c7   : > { %v2723_v59 = vsel %vm963_vm0, %v7054_v21, 0.0 }
 0x8c8   : > { %v2724_v51 = vadd.f32 %v2723_v59, %v2722_v11 }
 0x8ca   : > { %v2699_v63 = vpop.f32.mrf.mxu1 }
 0x8cb   : > { %v2700_v35 = vadd.f32 %v2699_v63, %v2629_v16 }
 0x8cd   : > { %v7059_v12 = vadd.f32 %v2700_v35, %v6245_v60 }
 0x8cf   : > { %v2725_v40 = vsel %vm963_vm0, %v7059_v12, 0.0 }
 0x8d0   : > { %v2726_v23 = vadd.f32 %v2725_v40, %v2724_v51 }
 0x8d2   : > { %v2702_v20 = vpop.f32.mrf.mxu1 }
 0x8d3   : > { %v2703_v50 = vadd.f32 %v2702_v20, %v2634_v22 }
 0x8d5   : > { %v7066_v46 = vadd.f32 %v2703_v50, %v6251_v0 }
 0x8d7   : > { %v2727_v5 = vsel %vm963_vm0, %v7066_v46, 0.0 }
 0x8d8   : > { %v2728_v36 = vadd.f32 %v2727_v5, %v2726_v23 }
 0x8da   : > { %v2704_v44 = vpop.f32.mrf.mxu1 }
 0x8db   : > { %v2705_v24 = vadd.f32 %v2704_v44, %v2639_v4 }
 0x8dd   : > { %v7071_v60 = vadd.f32 %v2705_v24, %v6255_v15 }
 0x8df   : > { %v2729_v0 = vsel %vm963_vm0, %v7071_v60, 0.0 }
 0x8e0   : > { %v2730_v15 = vadd.f32 %v2729_v0, %v2728_v36 }
 0x8e2   : > { %v2707_v45 = vpop.f32.mrf.mxu1 }
 0x8e3   : > { %v2708_v55 = vadd.f32 %v2707_v45, %v2644_v31 }
 0x8e5   : > { %v7076_v54 = vadd.f32 %v2708_v55, %v6259_v19 }
 0x8e7   : > { %v2731_v6 = vsel %vm963_vm0, %v7076_v54, 0.0 }
 0x8e8   : > { %v2732_v8 = vadd.f32 %v2731_v6, %v2730_v15 }
 0x8ea   : > { %v2709_v49 = vpop.f32.mrf.mxu1 }
 0x8eb   : > { %v2710_v61 = vadd.f32 %v2709_v49, %v2649_v32 }
 0x8ed   : > { %v7083_v9 = vadd.f32 %v2710_v61, %v6265_v27 }
 0x8ef   : > { %v2733_v19 = vsel %vm963_vm0, %v7083_v9, 0.0 }
 0x8f0   : > { %v2734_v38 = vadd.f32 %v2733_v19, %v2732_v8 }
 0x8f2   : > { %v2735_v14 = vrot.slane %v2734_v38, 4 }
 0x8f4   : > { %v2736_v39 = vadd.f32 %v2735_v14, %v2734_v38 }
 0x8f6   : > { %v2737_v62 = vrot.slane %v2736_v39, 2 }
 0x8f8   : > { %v2738_v33 = vadd.f32 %v2737_v62, %v2736_v39 }
 0x8fa   : > { %v2739_v26 = vrot.slane %v2738_v33, 1 }
 0x8fc   : > { %v2740_v58 = vadd.f32 %v2739_v26, %v2738_v33 }
 0x8fe   : > { %v2741_v30 = vmul.f32 %v2740_v58, %v6008_v25 }
 0x900   : > { %v2742_v48 = vsub.f32 %v7051_v10, %v2741_v30  ;;  %v2743_v37 = vsub.f32 %v7048_v53, %v2741_v30  ;;  %v2744_v27 = vsub.f32 %v7054_v21, %v2741_v30  ;;  %v2745_v2 = vsub.f32 %v7059_v12, %v2741_v30 }
 0x901   : > { %v2746_v13 = vsub.f32 %v7066_v46, %v2741_v30  ;;  %v2747_v41 = vsub.f32 %v7071_v60, %v2741_v30  ;;  %v2748_v17 = vsub.f32 %v7076_v54, %v2741_v30  ;;  %v2749_v16 = vsub.f32 %v7083_v9, %v2741_v30 }
 0x902   : > { %v2750_v7 = vmul.f32 %v2742_v48, %v2742_v48  ;;  %v2751_v42 = vmul.f32 %v2743_v37, %v2743_v37  ;;  %v2752_v3 = vmul.f32 %v2744_v27, %v2744_v27  ;;  %v2753_v29 = vmul.f32 %v2745_v2, %v2745_v2 }
 0x903   : > { %v2754_v20 = vmul.f32 %v2746_v13, %v2746_v13  ;;  %v2755_v56 = vmul.f32 %v2747_v41, %v2747_v41  ;;  %v2756_v1 = vmul.f32 %v2748_v17, %v2748_v17  ;;  %v2757_v50 = vmul.f32 %v2749_v16, %v2749_v16 }
 0x904   : > { %v2758_v57 = vsel %vm963_vm0, %v2750_v7, 0.0  ;;  %v2759_v28 = vsel %vm963_vm0, %v2751_v42, 0.0  ;;  %v2761_v43 = vsel %vm963_vm0, %v2752_v3, 0.0  ;;  %v2763_v44 = vsel %vm963_vm0, %v2753_v29, 0.0  ;;  %v5548_v29 = vld [vmem:[%s7875_s9] sm:$0xff] }
 0x905   : > { %v2760_v63 = vadd.f32 %v2759_v28, %v2758_v57  ;;  %v2765_v35 = vsel %vm963_vm0, %v2754_v20, 0.0  ;;  %v2767_v4 = vsel %vm963_vm0, %v2755_v56, 0.0  ;;  %v2769_v24 = vsel %vm963_vm0, %v2756_v1, 0.0  ;;  %v2806_v57 = vpop.permute.xlu1 %2805 }
 0x906   : > { %v2771_v45 = vsel %vm963_vm0, %v2757_v50, 0.0 }
 0x907   : > { %v2762_v47 = vadd.f32 %v2761_v43, %v2760_v63 }
 0x909   : > { %v2764_v52 = vadd.f32 %v2763_v44, %v2762_v47 }
 0x90b   : > { %v2766_v22 = vadd.f32 %v2765_v35, %v2764_v52 }
 0x90d   : > { %v2768_v18 = vadd.f32 %v2767_v4, %v2766_v22 }
 0x90f   : > { %v2770_v31 = vadd.f32 %v2769_v24, %v2768_v18 }
 0x911   : > { %v2772_v34 = vadd.f32 %v2771_v45, %v2770_v31 }
 0x913   : > { %v2773_v59 = vrot.slane %v2772_v34, 4 }
 0x915   : > { %v2774_v55 = vadd.f32 %v2773_v59, %v2772_v34 }
 0x917   : > { %v2775_v11 = vrot.slane %v2774_v55, 2 }
 0x919   : > { %v2776_v40 = vadd.f32 %v2775_v11, %v2774_v55 }
 0x91b   : > { %v2777_v51 = vrot.slane %v2776_v40, 1 }
 0x91d   : > { %v2778_v5 = vadd.f32 %v2777_v51, %v2776_v40 }
 0x91f   : > { %v2779_v23 = vmul.f32 %v2778_v5, %v6008_v25 }
 0x921   : > { %v2780_v0 = vadd.f32 1e-05, %v2779_v23  ;;  %v5556_v23 = vld [vmem:[%s7877_s11 + $0x20] sm:$0xff] }
 0x922   : > { %5275 = vmatmul.msk.bf16.gmra.mxu0 %vm963_vm0, %v5556_v23 }
 0x923   : > { %5737 = vrsqrt.f32 %v2780_v0  ;;  %vm2787_vm1 = vweird.f32 %v2780_v0 }
 0x929   : > { %v5738_v32 = vpop.eup %5737 }
 0x92a   : > { %v2782_v36 = vmul.f32 %v5738_v32, %v2780_v0  ;;  %vm2788_vm15 = vweird.f32 %v5738_v32 }
 0x92b   : > { %vm2789_vm2 = vmor %vm2787_vm1, %vm2788_vm15 }
 0x92c   : > { %v2783_v49 = vmul.f32 %v5738_v32, %v2782_v36 }
 0x92e   : > { %v2784_v6 = vmul.f32 0.5, %v2783_v49 }
 0x930   : > { %v2785_v61 = vsub.f32 1.5, %v2784_v6 }
 0x932   : > { %v2786_v15 = vmul.f32 %v5738_v32, %v2785_v61 }
 0x934   : > { %v2790_v8 = vsel %vm2789_vm2, %v5738_v32, %v2786_v15 }
 0x935   : > { %v2798_v19 = vmul.f32 %v2790_v8, %v2749_v16  ;;  %v2797_v38 = vmul.f32 %v2790_v8, %v2748_v17  ;;  %v2791_v14 = vmul.f32 %v2790_v8, %v2742_v48  ;;  %v2792_v39 = vmul.f32 %v2790_v8, %v2743_v37  ;;  %v5549_v48 = vld [vmem:[%s7875_s9 + $0x8] sm:$0xff]  ;;  %v5550_v37 = vld [vmem:[%s7875_s9 + $0x10] sm:$0xff]  ;;  %v2841_v16 = vpop.permute.xlu1 %2840 }
 0x936   : > { %v2795_v33 = vmul.f32 %v2790_v8, %v2746_v13  ;;  %v2796_v26 = vmul.f32 %v2790_v8, %v2747_v41  ;;  %v2793_v7 = vmul.f32 %v2790_v8, %v2744_v27  ;;  %v2794_v42 = vmul.f32 %v2790_v8, %v2745_v2  ;;  %v5551_v27 = vld [vmem:[%s7875_s9 + $0x18] sm:$0xff]  ;;  %v2836_v2 = vpop.permute.xlu2 %2835  ;;  %v2811_v13 = vpop.permute.xlu0 %2810 }
 0x937   : > { %v2802_v62 = vpack.c.bf16 %v2798_v19, %v2797_v38  ;;  %v2799_v58 = vpack.c.bf16 %v2792_v39, %v2791_v14  ;;  %v5557_v38 = vld [vmem:[%s7877_s11 + $0x28] sm:$0xff] }
 0x938   : > { %v2801_v30 = vpack.c.bf16 %v2796_v26, %v2795_v33  ;;  %v2800_v3 = vpack.c.bf16 %v2794_v42, %v2793_v7  ;;  %5276 = vmatmul.msk.bf16.gmra.mxu0 %vm963_vm0, %v5557_v38  ;;  %v5558_v42 = vld [vmem:[%s7877_s11 + $0x30] sm:$0xff] }
 0x939   : > { %2879 = vmatpush.bf16.msra.mxu2 %v2802_v62 }
 0x93d   : > { %2880 = vmatpush.bf16.msra.mxu2 %v2801_v30  ;;  %v3051_v50 = vpop.trf.xlu1 }
 0x93e   : > { %v2831_v63 = vpop.permute.xlu2 %2830  ;;  %v2826_v47 = vpop.permute.xlu0 %2825 }
 0x941   : > { %2881 = vmatpush.bf16.msra.mxu2 %v2800_v3 }
 0x945   : > { %2882 = vmatpush.bf16.msra.mxu2 %v2799_v58 }
 0x946   : > { %v2821_v22 = vpop.permute.xlu2 %2820  ;;  %v2816_v4 = vpop.permute.xlu0 %2815 }
 0x948   : > { %5235 = vmatmul.msk.bf16.vlgmr.msra.gmra.mxu2 %vm963_vm0, %v5548_v29  ;;  %5277 = vmatmul.msk.bf16.gmra.mxu0 %vm963_vm0, %v5558_v42  ;;  %v5559_v29 = vld [vmem:[%s7877_s11 + $0x38] sm:$0xff] }
 0x94e   : > { %v5643_v31 = vpop.trf.xlu2  ;;  %v3186_v3 = vpop.trf.xlu0 }
 0x956   : > { %v5644_v5 = vpop.trf.xlu2 }
 0x958   : > { %5236 = vmatmul.msk.bf16.gmra.mxu2 %vm963_vm0, %v5549_v48  ;;  %5278 = vmatmul.msk.bf16.gmra.mxu0 %vm963_vm0, %v5559_v29 }
 0x968   : > { %5237 = vmatmul.msk.bf16.gmra.mxu2 %vm963_vm0, %v5550_v37 }
 0x978   : > { %5238 = vmatmul.msk.bf16.gmra.mxu2 %vm963_vm0, %v5551_v27 }
 0x9cb   : > { %v2884_v41 = vpop.f32.mrf.mxu2 }
 0x9cc   : > { %v2885_v28 = vadd.f32 %v2884_v41, %v2806_v57 }
 0x9ce   : > { %v3029_v20 = vpack.c.bf16 %v2885_v28, %v2885_v28 }
 0x9d0   : > { %v3061_v44 = vunpack.c.l.b16 %v3029_v20 }
 0x9d3   : > { %v2886_v17 = vpop.f32.mrf.mxu2 }
 0x9d4   : > { %v2887_v43 = vadd.f32 %v2886_v17, %v2811_v13 }
 0x9d6   : > { %v3030_v56 = vpack.c.bf16 %v2887_v43, %v2887_v43 }
 0x9d8   : > { %v3062_v52 = vunpack.c.l.b16 %v3030_v56 }
 0x9da   : > { %v3063_v1 = vpack.c.b16 %v3062_v52, %v3061_v44 }
 0x9db   : > { %v2889_v35 = vpop.f32.mrf.mxu2 }
 0x9dc   : > { %3075 = vmatpush.bf16.msrb.mxu3 %v3063_v1  ;;  %v2890_v18 = vadd.f32 %v2889_v35, %v2816_v4 }
 0x9de   : > { %v3031_v45 = vpack.c.bf16 %v2890_v18, %v2890_v18 }
 0x9df   : > { %5279 = vmatmul.msk.bf16.vlgmr.msrb.gmra.mxu3 %vm1834_vm14, %v3051_v50 }
 0x9e0   : > { %v3106_v55 = vunpack.c.l.b16 %v3031_v45 }
 0x9e3   : > { %v2891_v24 = vpop.f32.mrf.mxu2 }
 0x9e4   : > { %v2892_v34 = vadd.f32 %v2891_v24, %v2821_v22 }
 0x9e6   : > { %v3032_v59 = vpack.c.bf16 %v2892_v34, %v2892_v34 }
 0x9e8   : > { %v3107_v11 = vunpack.c.l.b16 %v3032_v59 }
 0x9ea   : > { %v3108_v40 = vpack.c.b16 %v3107_v11, %v3106_v55 }
 0x9eb   : > { %v2894_v51 = vpop.f32.mrf.mxu2 }
 0x9ec   : > { %3120 = vmatpush.bf16.msra.mxu3 %v3108_v40  ;;  %v2895_v0 = vadd.f32 %v2894_v51, %v2826_v47 }
 0x9ee   : > { %v3033_v36 = vpack.c.bf16 %v2895_v0, %v2895_v0 }
 0x9ef   : > { %5280 = vmatmul.msk.bf16.vlgmr.msra.gmra.mxu3 %vm1834_vm14, %v5644_v5 }
 0x9f0   : > { %v3151_v61 = vunpack.c.l.b16 %v3033_v36 }
 0x9f3   : > { %v2896_v32 = vpop.f32.mrf.mxu2 }
 0x9f4   : > { %v2897_v49 = vadd.f32 %v2896_v32, %v2831_v63 }
 0x9f6   : > { %v3034_v6 = vpack.c.bf16 %v2897_v49, %v2897_v49 }
 0x9f8   : > { %v3152_v15 = vunpack.c.l.b16 %v3034_v6 }
 0x9fa   : > { %v3153_v8 = vpack.c.b16 %v3152_v15, %v3151_v61 }
 0x9fb   : > { %v2899_v19 = vpop.f32.mrf.mxu2 }
 0x9fc   : > { %3165 = vmatpush.bf16.msra.mxu1 %v3153_v8  ;;  %v2900_v14 = vadd.f32 %v2899_v19, %v2836_v2 }
 0x9fe   : > { %v3035_v62 = vpack.c.bf16 %v2900_v14, %v2900_v14 }
 0x9ff   : > { %5281 = vmatmul.msk.bf16.vlgmr.msra.gmra.mxu1 %vm1834_vm14, %v5643_v31  ;;  %v7145_v31 = vpop.f32.mrf.mxu0 }
 0xa00   : > { %v3196_v58 = vunpack.c.l.b16 %v3035_v62 }
 0xa03   : > { %v2901_v39 = vpop.f32.mrf.mxu2 }
 0xa04   : > { %v2902_v33 = vadd.f32 %v2901_v39, %v2841_v16 }
 0xa06   : > { %v3036_v26 = vpack.c.bf16 %v2902_v33, %v2902_v33 }
 0xa07   : > { %v3003_v62 = vpop.f32.mrf.mxu0 }
 0xa08   : > { %v3197_v30 = vunpack.c.l.b16 %v3036_v26 }
 0xa0a   : > { %v3198_v7 = vpack.c.b16 %v3197_v30, %v3196_v58 }
 0xa0c   : > { %3210 = vmatpush.bf16.msrb.mxu2 %v3198_v7 }
 0xa0f   : > { %5282 = vmatmul.msk.bf16.vlgmr.msrb.gmra.mxu2 %vm1834_vm14, %v3186_v3 }
 0xa62   : > { %v3077_v48 = vpop.f32.mrf.mxu3 }
 0xa63   : > { %v3217_v37 = vsel %vm963_vm0, %v3077_v48, -inf }
 0xa6a   : > { %v3079_v27 = vpop.f32.mrf.mxu3 }
 0xa6b   : > { %v3218_v2 = vsel %vm963_vm0, %v3079_v27, -inf }
 0xa6c   : > { %v3219_v13 = vmax.f32 %v3217_v37, %v3218_v2 }
 0xa6e   : > { %v3220_v41 = vrot.slane %v3219_v13, 4 }
 0xa70   : > { %v3221_v57 = vmax.f32 %v3219_v13, %v3220_v41 }
 0xa72   : > { %v3222_v28 = vrot.slane %v3221_v57, 2  ;;  %v3122_v63 = vpop.f32.mrf.mxu3 }
 0xa73   : > { %v3226_v47 = vsel %vm963_vm0, %v3122_v63, -inf }
 0xa74   : > { %v3223_v17 = vmax.f32 %v3221_v57, %v3222_v28 }
 0xa76   : > { %v3224_v20 = vrot.slane %v3223_v17, 1 }
 0xa78   : > { %v3225_v43 = vmax.f32 %v3223_v17, %v3224_v20 }
 0xa7a   : > { %v3253_v16 = vsub.f32 %v3077_v48, %v3225_v43  ;;  %v3254_v56 = vsub.f32 %v3079_v27, %v3225_v43  ;;  %v3124_v44 = vpop.f32.mrf.mxu3 }
 0xa7b   : > { %v3227_v52 = vsel %vm963_vm0, %v3124_v44, -inf }
 0xa7c   : > { %v3261_v1 = vmul.f32 1.442695, %v3253_v16  ;;  %v3263_v35 = vmul.f32 1.442695, %v3254_v56  ;;  %v3228_v22 = vmax.f32 %v3226_v47, %v3227_v52  ;;  %v3167_v50 = vpop.f32.mrf.mxu1 }
 0xa7d   : > { %v3235_v45 = vsel %vm963_vm0, %v3167_v50, -inf }
 0xa7e   : > { %5739 = vpow2.f32 %v3261_v1  ;;  %v3229_v4 = vrot.slane %v3228_v22, 4 }
 0xa7f   : > { %5741 = vpow2.f32 %v3263_v35 }
 0xa80   : > { %v3230_v18 = vmax.f32 %v3228_v22, %v3229_v4  ;;  %v3326_v4 = vpack.c.bf16 %v3003_v62, %v3003_v62 }
 0xa82   : > { %v3231_v24 = vrot.slane %v3230_v18, 2 }
 0xa84   : > { %v5740_v34 = vpop.eup %5739  ;;  %v3232_v59 = vmax.f32 %v3230_v18, %v3231_v24  ;;  %v3169_v55 = vpop.f32.mrf.mxu1 }
 0xa85   : > { %v5742_v11 = vpop.eup %5741  ;;  %v3277_v40 = vsel %vm963_vm0, %v5740_v34, 0.0  ;;  %v3236_v51 = vsel %vm963_vm0, %v3169_v55, -inf }
 0xa86   : > { %v3278_v5 = vsel %vm963_vm0, %v5742_v11, 0.0  ;;  %v3233_v23 = vrot.slane %v3232_v59, 1  ;;  %v3237_v0 = vmax.f32 %v3235_v45, %v3236_v51 }
 0xa87   : > { %v3279_v32 = vadd.f32 %v3278_v5, %v3277_v40 }
 0xa88   : > { %v3234_v36 = vmax.f32 %v3232_v59, %v3233_v23  ;;  %v3238_v49 = vrot.slane %v3237_v0, 4 }
 0xa89   : > { %v3280_v6 = vrot.slane %v3279_v32, 4 }
 0xa8a   : > { %v3255_v61 = vsub.f32 %v3122_v63, %v3234_v36  ;;  %v3256_v15 = vsub.f32 %v3124_v44, %v3234_v36  ;;  %v3239_v8 = vmax.f32 %v3237_v0, %v3238_v49  ;;  %v7153_v63 = vpop.f32.mrf.mxu0 }
 0xa8b   : > { %v3281_v19 = vadd.f32 %v3280_v6, %v3279_v32  ;;  %v3344_v6 = vunpack.c.l.b16 %v3326_v4 }
 0xa8c   : > { %v3265_v38 = vmul.f32 1.442695, %v3255_v61  ;;  %v3267_v14 = vmul.f32 1.442695, %v3256_v15  ;;  %v3240_v39 = vrot.slane %v3239_v8, 2 }
 0xa8d   : > { %v3282_v33 = vrot.slane %v3281_v19, 2 }
 0xa8e   : > { %5743 = vpow2.f32 %v3265_v38  ;;  %v3241_v26 = vmax.f32 %v3239_v8, %v3240_v39 }
 0xa8f   : > { %v3283_v58 = vadd.f32 %v3282_v33, %v3281_v19  ;;  %5745 = vpow2.f32 %v3267_v14 }
 0xa90   : > { %v3242_v30 = vrot.slane %v3241_v26, 1 }
 0xa91   : > { %v3284_v7 = vrot.slane %v3283_v58, 1 }
 0xa92   : > { %v3243_v42 = vmax.f32 %v3241_v26, %v3242_v30  ;;  %v3212_v3 = vpop.f32.mrf.mxu2 }
 0xa93   : > { %v3285_v29 = vadd.f32 %v3284_v7, %v3283_v58  ;;  %v3244_v56 = vsel %vm963_vm0, %v3212_v3, -inf }
 0xa94   : > { %v5744_v48 = vpop.eup %5743  ;;  %v3257_v37 = vsub.f32 %v3167_v50, %v3243_v42  ;;  %v3258_v27 = vsub.f32 %v3169_v55, %v3243_v42  ;;  %v3325_v50 = vpack.c.bf16 %v7145_v31, %v7145_v31 }
 0xa95   : > { %v5746_v2 = vpop.eup %5745  ;;  %v3286_v13 = vsel %vm963_vm0, %v5744_v48, 0.0  ;;  %5747 = vrcp.f32 %v3285_v29 }
 0xa96   : > { %v3287_v41 = vsel %vm963_vm0, %v5746_v2, 0.0  ;;  %v3269_v57 = vmul.f32 1.442695, %v3257_v37  ;;  %v3271_v28 = vmul.f32 1.442695, %v3258_v27  ;;  %v3343_v49 = vunpack.c.l.b16 %v3325_v50 }
 0xa97   : > { %v3288_v17 = vadd.f32 %v3287_v41, %v3286_v13 }
 0xa98   : > { %5749 = vpow2.f32 %v3269_v57  ;;  %v3345_v14 = vpack.c.b16 %v3344_v6, %v3343_v49 }
 0xa99   : > { %v3289_v20 = vrot.slane %v3288_v17, 4  ;;  %5751 = vpow2.f32 %v3271_v28  ;;  %v3327_v28 = vpack.c.bf16 %v7153_v63, %v7153_v63 }
 0xa9a   : > { %v3214_v43 = vpop.f32.mrf.mxu2 }
 0xa9b   : > { %v5748_v47 = vpop.eup %5747  ;;  %v3290_v16 = vadd.f32 %v3289_v20, %v3288_v17  ;;  %v3245_v44 = vsel %vm963_vm0, %v3214_v43, -inf }
 0xa9c   : > { %v3246_v52 = vmax.f32 %v3244_v56, %v3245_v44  ;;  %v3317_v1 = vmul.f32 %v5748_v47, %v5740_v34  ;;  %v3318_v35 = vmul.f32 %v5748_v47, %v5742_v11  ;;  %v3008_v34 = vpop.f32.mrf.mxu0 }
 0xa9d   : > { %v3291_v22 = vrot.slane %v3290_v16, 2  ;;  %v3328_v17 = vpack.c.bf16 %v3008_v34, %v3008_v34 }
 0xa9e   : > { %v5750_v18 = vpop.eup %5749  ;;  %v3247_v24 = vrot.slane %v3246_v52, 4  ;;  %v3333_v45 = vpack.c.bf16 %v3317_v1, %v3317_v1  ;;  %v3334_v59 = vpack.c.bf16 %v3318_v35, %v3318_v35 }
 0xa9f   : > { %v5752_v55 = vpop.eup %5751  ;;  %v3292_v40 = vadd.f32 %v3291_v22, %v3290_v16  ;;  %v3295_v51 = vsel %vm963_vm0, %v5750_v18, 0.0  ;;  %v3372_v56 = vunpack.c.l.b16 %v3328_v17 }
 0xaa0   : > { %v3296_v5 = vsel %vm963_vm0, %v5752_v55, 0.0  ;;  %v3248_v23 = vmax.f32 %v3246_v52, %v3247_v24  ;;  %v3348_v0 = vunpack.c.l.b16 %v3333_v45  ;;  %v3349_v32 = vunpack.c.l.b16 %v3334_v59 }
 0xaa1   : > { %v3293_v11 = vrot.slane %v3292_v40, 1  ;;  %v3297_v36 = vadd.f32 %v3296_v5, %v3295_v51 }
 0xaa2   : > { %v3249_v31 = vrot.slane %v3248_v23, 2  ;;  %v3350_v61 = vpack.c.b16 %v3349_v32, %v3348_v0 }
 0xaa3   : > { %v3298_v15 = vrot.slane %v3297_v36, 4  ;;  %v3294_v8 = vadd.f32 %v3293_v11, %v3292_v40 }
 0xaa4   : > { %v3250_v19 = vmax.f32 %v3248_v23, %v3249_v31  ;;  %3362 = vmatpush.bf16.msrb.mxu3 %v3350_v61  ;;  %v3011_v7 = vpop.f32.mrf.mxu0 }
 0xaa5   : > { %v3299_v38 = vadd.f32 %v3298_v15, %v3297_v36  ;;  %5753 = vrcp.f32 %v3294_v8  ;;  %v3329_v24 = vpack.c.bf16 %v3011_v7, %v3011_v7 }
 0xaa6   : > { %v3251_v39 = vrot.slane %v3250_v19, 1 }
 0xaa7   : > { %v3300_v62 = vrot.slane %v3299_v38, 2  ;;  %5283 = vmatmul.msk.bf16.vlgmr.msrb.gmra.mxu3 %vm1834_vm14, %v3345_v14  ;;  %v3399_v32 = vunpack.c.l.b16 %v3329_v24  ;;  %v3460_v24 = vpop.permute.xlu0 %3459 }
 0xaa8   : > { %v3252_v33 = vmax.f32 %v3250_v19, %v3251_v39 }
 0xaa9   : > { %v3301_v26 = vadd.f32 %v3300_v62, %v3299_v38 }
 0xaaa   : > { %v3259_v58 = vsub.f32 %v3212_v3, %v3252_v33  ;;  %v3260_v30 = vsub.f32 %v3214_v43, %v3252_v33  ;;  %v3371_v43 = vunpack.c.l.b16 %v3327_v28 }
 0xaab   : > { %v5754_v42 = vpop.eup %5753  ;;  %v3302_v29 = vrot.slane %v3301_v26, 1 }
 0xaac   : > { %v3273_v37 = vmul.f32 1.442695, %v3259_v58  ;;  %v3275_v27 = vmul.f32 1.442695, %v3260_v30  ;;  %v3319_v13 = vmul.f32 %v5754_v42, %v5744_v48  ;;  %v3320_v41 = vmul.f32 %v5754_v42, %v5746_v2  ;;  %v3013_v1 = vpop.f32.mrf.mxu0 }
 0xaad   : > { %v3303_v57 = vadd.f32 %v3302_v29, %v3301_v26  ;;  %v3373_v35 = vpack.c.b16 %v3372_v56, %v3371_v43  ;;  %v3330_v45 = vpack.c.bf16 %v3013_v1, %v3013_v1  ;;  %v5560_v56 = vld [vmem:[%s7878_s12] sm:$0xff]  ;;  %v5563_v1 = vld [vmem:[%s7878_s12 + $0x18] sm:$0xff] }
 0xaae   : > { %5755 = vpow2.f32 %v3273_v37  ;;  %v3335_v20 = vpack.c.bf16 %v3319_v13, %v3319_v13  ;;  %v3336_v47 = vpack.c.bf16 %v3320_v41, %v3320_v41 }
 0xaaf   : > { %5757 = vrcp.f32 %v3303_v57  ;;  %v3400_v34 = vunpack.c.l.b16 %v3330_v45  ;;  %v3465_v45 = vpop.permute.xlu2 %3464 }
 0xab0   : > { %5759 = vpow2.f32 %v3275_v27  ;;  %v3376_v16 = vunpack.c.l.b16 %v3335_v20  ;;  %v3377_v3 = vunpack.c.l.b16 %v3336_v47 }
 0xab2   : > { %v3378_v44 = vpack.c.b16 %v3377_v3, %v3376_v16 }
 0xab4   : > { %v5756_v52 = vpop.eup %5755  ;;  %3390 = vmatpush.bf16.msrb.mxu1 %v3378_v44  ;;  %v3016_v6 = vpop.f32.mrf.mxu0  ;;  %v5561_v44 = vld [vmem:[%s7878_s12 + $0x8] sm:$0xff] }
 0xab5   : > { %v5758_v48 = vpop.eup %5757  ;;  %v3304_v2 = vsel %vm963_vm0, %v5756_v52, 0.0  ;;  %v3331_v14 = vpack.c.bf16 %v3016_v6, %v3016_v6 }
 0xab6   : > { %v5760_v22 = vpop.eup %5759  ;;  %v3322_v63 = vmul.f32 %v5758_v48, %v5752_v55  ;;  %v3321_v50 = vmul.f32 %v5758_v48, %v5750_v18  ;;  %v3401_v55 = vpack.c.b16 %v3400_v34, %v3399_v32 }
 0xab7   : > { %v3305_v4 = vsel %vm963_vm0, %v5760_v22, 0.0  ;;  %5284 = vmatmul.msk.bf16.vlgmr.msrb.gmra.mxu1 %vm1834_vm14, %v3373_v35  ;;  %v3427_v30 = vunpack.c.l.b16 %v3331_v14 }
 0xab8   : > { %v3306_v59 = vadd.f32 %v3305_v4, %v3304_v2  ;;  %v3337_v40 = vpack.c.bf16 %v3321_v50, %v3321_v50  ;;  %v3338_v51 = vpack.c.bf16 %v3322_v63, %v3322_v63 }
 0xaba   : > { %v3307_v5 = vrot.slane %v3306_v59, 4  ;;  %v3404_v23 = vunpack.c.l.b16 %v3337_v40  ;;  %v3405_v0 = vunpack.c.l.b16 %v3338_v51 }
 0xabc   : > { %v3308_v11 = vadd.f32 %v3307_v5, %v3306_v59  ;;  %v3406_v36 = vpack.c.b16 %v3405_v0, %v3404_v23  ;;  %v3018_v15 = vpop.f32.mrf.mxu0 }
 0xabd   : > { %v3332_v39 = vpack.c.bf16 %v3018_v15, %v3018_v15 }
 0xabe   : > { %v3309_v49 = vrot.slane %v3308_v11, 2  ;;  %3418 = vmatpush.bf16.msra.mxu2 %v3406_v36 }
 0xabf   : > { %v3428_v7 = vunpack.c.l.b16 %v3332_v39 }
 0xac0   : > { %v3310_v18 = vadd.f32 %v3309_v49, %v3308_v11  ;;  %v3485_v49 = vpop.permute.xlu0 %3484 }
 0xac1   : > { %5285 = vmatmul.msk.bf16.vlgmr.msra.gmra.mxu2 %vm1834_vm14, %v3401_v55  ;;  %v3429_v29 = vpack.c.b16 %v3428_v7, %v3427_v30 }
 0xac2   : > { %v3311_v31 = vrot.slane %v3310_v18, 1 }
 0xac4   : > { %v3312_v61 = vadd.f32 %v3311_v31, %v3310_v18  ;;  %v3490_v31 = vpop.permute.xlu2 %3489 }
 0xac6   : > { %5761 = vrcp.f32 %v3312_v61 }
 0xacc   : > { %v5762_v8 = vpop.eup %5761 }
 0xacd   : > { %v3323_v19 = vmul.f32 %v5762_v8, %v5756_v52  ;;  %v3324_v38 = vmul.f32 %v5762_v8, %v5760_v22  ;;  %v5562_v52 = vld [vmem:[%s7878_s12 + $0x10] sm:$0xff]  ;;  %v3470_v22 = vpop.permute.xlu1 %3469 }
 0xacf   : > { %v3339_v62 = vpack.c.bf16 %v3323_v19, %v3323_v19  ;;  %v3340_v33 = vpack.c.bf16 %v3324_v38, %v3324_v38 }
 0xad1   : > { %v3432_v26 = vunpack.c.l.b16 %v3339_v62  ;;  %v3433_v58 = vunpack.c.l.b16 %v3340_v33 }
 0xad3   : > { %v3434_v42 = vpack.c.b16 %v3433_v58, %v3432_v26 }
 0xad5   : > { %3446 = vmatpush.bf16.msra.mxu3 %v3434_v42  ;;  %v3475_v4 = vpop.permute.xlu1 %3474 }
 0xad8   : > { %5286 = vmatmul.msk.bf16.vlgmr.msra.gmra.mxu3 %vm1834_vm14, %v3429_v29 }
 0xadd   : > { %v3480_v32 = vpop.permute.xlu1 %3479 }
 0xae5   : > { %v3495_v33 = vpop.permute.xlu1 %3494 }
 0xb2a   : > { %v3364_v37 = vpop.f32.mrf.mxu3 }
 0xb32   : > { %v3366_v27 = vpop.f32.mrf.mxu3 }
 0xb33   : > { %v3453_v43 = vpack.c.bf16 %v3366_v27, %v3364_v37 }
 0xb34   : > { %v3392_v57 = vpop.f32.mrf.mxu1 }
 0xb3c   : > { %v3394_v16 = vpop.f32.mrf.mxu1 }
 0xb3d   : > { %v3454_v3 = vpack.c.bf16 %v3394_v16, %v3392_v57 }
 0xb44   : > { %v3420_v13 = vpop.f32.mrf.mxu2 }
 0xb4c   : > { %v3422_v20 = vpop.f32.mrf.mxu2 }
 0xb4d   : > { %v3455_v47 = vpack.c.bf16 %v3422_v20, %v3420_v13 }
 0xb5b   : > { %v3448_v41 = vpop.f32.mrf.mxu3 }
 0xb63   : > { %v3450_v28 = vpop.f32.mrf.mxu3 }
 0xb64   : > { %v3456_v17 = vpack.c.bf16 %v3450_v28, %v3448_v41 }
 0xb66   : > { %3533 = vmatpush.bf16.msra.mxu1 %v3456_v17 }
 0xb6a   : > { %3534 = vmatpush.bf16.msra.mxu1 %v3455_v47 }
 0xb6e   : > { %3535 = vmatpush.bf16.msra.mxu1 %v3454_v3 }
 0xb72   : > { %3536 = vmatpush.bf16.msra.mxu1 %v3453_v43 }
 0xb75   : > { %5303 = vmatmul.msk.bf16.vlgmr.msra.gmra.mxu1 %vm963_vm0, %v5560_v56 }
 0xb85   : > { %5304 = vmatmul.msk.bf16.gmra.mxu1 %vm963_vm0, %v5561_v44 }
 0xb95   : > { %5305 = vmatmul.msk.bf16.gmra.mxu1 %vm963_vm0, %v5562_v52 }
 0xba5   : > { %5306 = vmatmul.msk.bf16.gmra.mxu1 %vm963_vm0, %v5563_v1 }
 0xbf2   : > { %v3538_v48 = vpop.f32.mrf.mxu1 }
 0xbf3   : > { %v3539_v51 = vadd.f32 %v3538_v48, %v3460_v24 }
 0xbf5   : > { %v7189_v34 = vadd.f32 %v3539_v51, %v7051_v10 }
 0xbf7   : > { %7910 = vst [vmem:[#allocation3_spill] sm:$0xff] %v7189_v34  ;;  %v3566_v61 = vsel %vm963_vm0, %v7189_v34, 0.0 }
 0xbfa   : > { %v3540_v2 = vpop.f32.mrf.mxu1 }
 0xbfb   : > { %v3541_v59 = vadd.f32 %v3540_v2, %v3465_v45 }
 0xbfd   : > { %v7186_v23 = vadd.f32 %v3541_v59, %v7048_v53 }
 0xbff   : > { %7909 = vst [vmem:[#allocation2_spill] sm:$0xff] %v7186_v23  ;;  %v3567_v55 = vsel %vm963_vm0, %v7186_v23, 0.0 }
 0xc00   : > { %v3568_v8 = vadd.f32 %v3567_v55, %v3566_v61 }
 0xc02   : > { %v3543_v35 = vpop.f32.mrf.mxu1 }
 0xc03   : > { %v3544_v5 = vadd.f32 %v3543_v35, %v3470_v22 }
 0xc05   : > { %v7192_v11 = vadd.f32 %v3544_v5, %v7054_v21 }
 0xc07   : > { %7911 = vst [vmem:[#allocation4_spill] sm:$0xff] %v7192_v11  ;;  %v3569_v10 = vsel %vm963_vm0, %v7192_v11, 0.0 }
 0xc08   : > { %v3570_v38 = vadd.f32 %v3569_v10, %v3568_v8 }
 0xc0a   : > { %v3545_v63 = vpop.f32.mrf.mxu1 }
 0xc0b   : > { %v3546_v0 = vadd.f32 %v3545_v63, %v3475_v4 }
 0xc0d   : > { %v7197_v18 = vadd.f32 %v3546_v0, %v7059_v12 }
 0xc0f   : > { %7912 = vst [vmem:[#allocation5_spill] sm:$0xff] %v7197_v18  ;;  %v3571_v19 = vsel %vm963_vm0, %v7197_v18, 0.0 }
 0xc10   : > { %v3572_v62 = vadd.f32 %v3571_v19, %v3570_v38 }
 0xc12   : > { %v3548_v50 = vpop.f32.mrf.mxu1 }
 0xc13   : > { %v3549_v36 = vadd.f32 %v3548_v50, %v3480_v32 }
 0xc15   : > { %v7204_v21 = vadd.f32 %v3549_v36, %v7066_v46 }
 0xc17   : > { %7913 = vst [vmem:[#allocation6_spill] sm:$0xff] %v7204_v21  ;;  %v3573_v14 = vsel %vm963_vm0, %v7204_v21, 0.0 }
 0xc18   : > { %v3574_v26 = vadd.f32 %v3573_v14, %v3572_v62 }
 0xc1a   : > { %v3550_v40 = vpop.f32.mrf.mxu1 }
 0xc1b   : > { %v3551_v6 = vadd.f32 %v3550_v40, %v3485_v49 }
 0xc1d   : > { %v7209_v12 = vadd.f32 %v3551_v6, %v7071_v60 }
 0xc1f   : > { %7914 = vst [vmem:[#allocation7_spill] sm:$0xff] %v7209_v12  ;;  %v3575_v46 = vsel %vm963_vm0, %v7209_v12, 0.0 }
 0xc20   : > { %v3576_v60 = vadd.f32 %v3575_v46, %v3574_v26 }
 0xc22   : > { %v3553_v53 = vpop.f32.mrf.mxu1 }
 0xc23   : > { %v3554_v15 = vadd.f32 %v3553_v53, %v3490_v31 }
 0xc25   : > { %v7214_v39 = vadd.f32 %v3554_v15, %v7076_v54 }
 0xc27   : > { %7915 = vst [vmem:[#allocation8_spill] sm:$0xff] %v7214_v39  ;;  %v3577_v30 = vsel %vm963_vm0, %v7214_v39, 0.0 }
 0xc28   : > { %v3578_v29 = vadd.f32 %v3577_v30, %v3576_v60 }
 0xc2a   : > { %v3555_v58 = vpop.f32.mrf.mxu1 }
 0xc2b   : > { %v3556_v7 = vadd.f32 %v3555_v58, %v3495_v33 }
 0xc2d   : > { %v7221_v42 = vadd.f32 %v3556_v7, %v7083_v9 }
 0xc2f   : > { %7916 = vst [vmem:[#allocation9_spill] sm:$0xff] %v7221_v42  ;;  %v3579_v54 = vsel %vm963_vm0, %v7221_v42, 0.0 }
 0xc30   : > { %v3580_v37 = vadd.f32 %v3579_v54, %v3578_v29 }
 0xc32   : > { %v3581_v27 = vrot.slane %v3580_v37, 4 }
 0xc34   : > { %v3582_v13 = vadd.f32 %v3581_v27, %v3580_v37 }
 0xc36   : > { %v3583_v41 = vrot.slane %v3582_v13, 2 }
 0xc38   : > { %v3584_v57 = vadd.f32 %v3583_v41, %v3582_v13 }
 0xc3a   : > { %v3585_v28 = vrot.slane %v3584_v57, 1 }
 0xc3c   : > { %v3586_v17 = vadd.f32 %v3585_v28, %v3584_v57 }
 0xc3e   : > { %v3587_v20 = vmul.f32 %v3586_v17, %v6008_v25 }
 0xc40   : > { %v3588_v47 = vsub.f32 %v7189_v34, %v3587_v20  ;;  %v3589_v16 = vsub.f32 %v7186_v23, %v3587_v20  ;;  %v3590_v9 = vsub.f32 %v7192_v11, %v3587_v20  ;;  %v3591_v3 = vsub.f32 %v7197_v18, %v3587_v20 }
 0xc41   : > { %v3592_v43 = vsub.f32 %v7204_v21, %v3587_v20  ;;  %v3593_v1 = vsub.f32 %v7209_v12, %v3587_v20  ;;  %v3594_v63 = vsub.f32 %v7214_v39, %v3587_v20  ;;  %v3595_v45 = vsub.f32 %v7221_v42, %v3587_v20 }
 0xc42   : > { %v3596_v56 = vmul.f32 %v3588_v47, %v3588_v47  ;;  %v3597_v44 = vmul.f32 %v3589_v16, %v3589_v16  ;;  %v3598_v52 = vmul.f32 %v3590_v9, %v3590_v9  ;;  %v3599_v48 = vmul.f32 %v3591_v3, %v3591_v3 }
 0xc43   : > { %v3600_v50 = vmul.f32 %v3592_v43, %v3592_v43  ;;  %v3601_v59 = vmul.f32 %v3593_v1, %v3593_v1  ;;  %v3602_v5 = vmul.f32 %v3594_v63, %v3594_v63  ;;  %v3603_v36 = vmul.f32 %v3595_v45, %v3595_v45 }
 0xc44   : > { %v3604_v2 = vsel %vm963_vm0, %v3596_v56, 0.0  ;;  %v3605_v35 = vsel %vm963_vm0, %v3597_v44, 0.0  ;;  %v3607_v4 = vsel %vm963_vm0, %v3598_v52, 0.0  ;;  %v3609_v40 = vsel %vm963_vm0, %v3599_v48, 0.0  ;;  %v5564_v52 = vld [vmem:[%s7880_s14] sm:$0xff]  ;;  %v5579_v48 = vld [vmem:[%s7880_s14 + $0x78] sm:$0xff] }
 0xc45   : > { %v3606_v22 = vadd.f32 %v3605_v35, %v3604_v2  ;;  %v3611_v0 = vsel %vm963_vm0, %v3600_v50, 0.0  ;;  %v3613_v49 = vsel %vm963_vm0, %v3601_v59, 0.0  ;;  %v3615_v6 = vsel %vm963_vm0, %v3602_v5, 0.0  ;;  %v5567_v50 = vld [vmem:[%s7880_s14 + $0x18] sm:$0xff]  ;;  %v5568_v5 = vld [vmem:[%s7880_s14 + $0x20] sm:$0xff] }
 0xc46   : > { %v3617_v53 = vsel %vm963_vm0, %v3603_v36, 0.0 }
 0xc47   : > { %v3608_v24 = vadd.f32 %v3607_v4, %v3606_v22  ;;  %v5580_v4 = vld [vmem:[%s7880_s14 + $0x80] sm:$0xff] }
 0xc49   : > { %v3610_v51 = vadd.f32 %v3609_v40, %v3608_v24  ;;  %v7285_v24 = vpop.permute.xlu2 %3886 }
 0xc4b   : > { %v3612_v32 = vadd.f32 %v3611_v0, %v3610_v51  ;;  %v5581_v0 = vld [vmem:[%s7880_s14 + $0x88] sm:$0xff] }
 0xc4d   : > { %v3614_v55 = vadd.f32 %v3613_v49, %v3612_v32 }
 0xc4f   : > { %v3616_v31 = vadd.f32 %v3615_v6, %v3614_v55  ;;  %v5569_v6 = vld [vmem:[%s7880_s14 + $0x28] sm:$0xff] }
 0xc51   : > { %v3618_v61 = vadd.f32 %v3617_v53, %v3616_v31  ;;  %v7293_v40 = vpop.permute.xlu2 %3861  ;;  %v5582_v31 = vld [vmem:[%s7880_s14 + $0x90] sm:$0xff] }
 0xc53   : > { %v3619_v10 = vrot.slane %v3618_v61, 4 }
 0xc55   : > { %v3620_v15 = vadd.f32 %v3619_v10, %v3618_v61 }
 0xc57   : > { %v3621_v8 = vrot.slane %v3620_v15, 2 }
 0xc59   : > { %v3622_v19 = vadd.f32 %v3621_v8, %v3620_v15  ;;  %v7307_v36 = vpop.permute.xlu2 %3966 }
 0xc5a   : > { %7920 = vst [vmem:[#allocation13_spill] sm:$0xff] %v7307_v36 }
 0xc5b   : > { %v3623_v38 = vrot.slane %v3622_v19, 1 }
 0xc5d   : > { %v3624_v14 = vadd.f32 %v3623_v38, %v3622_v19  ;;  %v5570_v38 = vld [vmem:[%s7880_s14 + $0x30] sm:$0xff] }
 0xc5f   : > { %v3625_v62 = vmul.f32 %v3624_v14, %v6008_v25  ;;  %v5583_v14 = vld [vmem:[%s7880_s14 + $0x98] sm:$0xff] }
 0xc61   : > { %v3626_v46 = vadd.f32 1e-05, %v3625_v62  ;;  %v7319_v53 = vpop.permute.xlu2 %3951 }
 0xc62   : > { %7922 = vst [vmem:[#allocation15_spill] sm:$0xff] %v7319_v53 }
 0xc63   : > { %5763 = vrsqrt.f32 %v3626_v46  ;;  %vm3633_vm4 = vweird.f32 %v3626_v46 }
 0xc69   : > { %v5764_v33 = vpop.eup %5763  ;;  %v7327_v15 = vpop.permute.xlu2 %3846 }
 0xc6a   : > { %v3628_v26 = vmul.f32 %v5764_v33, %v3626_v46  ;;  %vm3634_vm3 = vweird.f32 %v5764_v33 }
 0xc6b   : > { %vm3635_vm5 = vmor %vm3633_vm4, %vm3634_vm3 }
 0xc6c   : > { %v3629_v58 = vmul.f32 %v5764_v33, %v3628_v26 }
 0xc6e   : > { %v3630_v30 = vmul.f32 0.5, %v3629_v58  ;;  %v5571_v58 = vld [vmem:[%s7880_s14 + $0x38] sm:$0xff] }
 0xc70   : > { %v3631_v7 = vsub.f32 1.5, %v3630_v30  ;;  %v5584_v30 = vld [vmem:[%s7880_s14 + $0xa0] sm:$0xff] }
 0xc71   : > { %v7341_v62 = vpop.permute.xlu2 %3831 }
 0xc72   : > { %v3632_v60 = vmul.f32 %v5764_v33, %v3631_v7 }
 0xc74   : > { %v3636_v29 = vsel %vm3635_vm5, %v5764_v33, %v3632_v60 }
 0xc75   : > { %v3644_v54 = vmul.f32 %v3636_v29, %v3595_v45  ;;  %v3643_v37 = vmul.f32 %v3636_v29, %v3594_v63  ;;  %v3637_v27 = vmul.f32 %v3636_v29, %v3588_v47  ;;  %v3638_v13 = vmul.f32 %v3636_v29, %v3589_v16  ;;  %v5577_v47 = vld [vmem:[%s7880_s14 + $0x68] sm:$0xff] }
 0xc76   : > { %v3641_v57 = vmul.f32 %v3636_v29, %v3592_v43  ;;  %v3642_v28 = vmul.f32 %v3636_v29, %v3593_v1  ;;  %v3639_v20 = vmul.f32 %v3636_v29, %v3590_v9  ;;  %v3640_v56 = vmul.f32 %v3636_v29, %v3591_v3  ;;  %v5565_v16 = vld [vmem:[%s7880_s14 + $0x8] sm:$0xff]  ;;  %v5578_v9 = vld [vmem:[%s7880_s14 + $0x70] sm:$0xff]  ;;  %v7259_v3 = vpop.permute.xlu0 %3881  ;;  %v7261_v43 = vpop.permute.xlu1 %3871 }
 0xc77   : > { %v3648_v41 = vpack.c.bf16 %v3644_v54, %v3643_v37  ;;  %v3645_v25 = vpack.c.bf16 %v3638_v13, %v3637_v27  ;;  %v5566_v1 = vld [vmem:[%s7880_s14 + $0x10] sm:$0xff]  ;;  %v5572_v27 = vld [vmem:[%s7880_s14 + $0x40] sm:$0xff]  ;;  %v5585_v13 = vld [vmem:[%s7880_s14 + $0xa8] sm:$0xff] }
 0xc78   : > { %v3647_v17 = vpack.c.bf16 %v3642_v28, %v3641_v57  ;;  %v3646_v44 = vpack.c.bf16 %v3640_v56, %v3639_v20 }
 0xc79   : > { %4229 = vmatpush.bf16.msrb.mxu2 %v3648_v41  ;;  %5616 = vmatpush.bf16.msrb.mxu3 %v3648_v41  ;;  %v7347_v26 = vpop.permute.xlu2 %3936 }
 0xc7a   : > { %7924 = vst [vmem:[#allocation17_spill] sm:$0xff] %v7347_v26 }
 0xc7d   : > { %4230 = vmatpush.bf16.msrb.mxu2 %v3647_v17  ;;  %5617 = vmatpush.bf16.msrb.mxu3 %v3647_v17 }
 0xc7e   : > { %v7269_v2 = vpop.permute.xlu0 %3876  ;;  %v7271_v35 = vpop.permute.xlu1 %3866 }
 0xc81   : > { %4231 = vmatpush.bf16.msrb.mxu2 %v3646_v44  ;;  %5618 = vmatpush.bf16.msrb.mxu3 %v3646_v44  ;;  %v7359_v29 = vpop.permute.xlu2 %3821  ;;  %v5573_v44 = vld [vmem:[%s7880_s14 + $0x48] sm:$0xff] }
 0xc85   : > { %4232 = vmatpush.bf16.msrb.mxu2 %v3645_v25  ;;  %5619 = vmatpush.bf16.msrb.mxu3 %v3645_v25 }
 0xc86   : > { %v7275_v22 = vpop.permute.xlu0 %3961  ;;  %v7277_v63 = vpop.permute.xlu1 %3851 }
 0xc87   : > { %7917 = vst [vmem:[#allocation10_spill] sm:$0xff] %v7275_v22 }
 0xc88   : > { %5435 = vmatmul.msk.bf16.vlgmr.msrb.gmra.mxu2 %vm963_vm0, %v5564_v52  ;;  %5448 = vmatmul.msk.bf16.vlgmr.msrb.gmra.mxu3 %vm963_vm0, %v5577_v47  ;;  %v5586_v52 = vld [vmem:[%s7880_s14 + $0xb0] sm:$0xff] }
 0xc89   : > { %v7371_v41 = vpop.permute.xlu2 %3926 }
 0xc8e   : > { %v7289_v45 = vpop.permute.xlu0 %3856  ;;  %v7291_v59 = vpop.permute.xlu1 %3956 }
 0xc8f   : > { %7918 = vst [vmem:[#allocation11_spill] sm:$0xff] %v7291_v59 }
 0xc91   : > { %v3812_v17 = vpop.permute.xlu2 %3811 }
 0xc96   : > { %v7295_v51 = vpop.permute.xlu0 %3841  ;;  %v7303_v32 = vpop.permute.xlu1 %3941 }
 0xc97   : > { %7919 = vst [vmem:[#allocation12_spill] sm:$0xff] %v7303_v32 }
 0xc98   : > { %5436 = vmatmul.msk.bf16.gmra.mxu2 %vm963_vm0, %v5565_v16  ;;  %5449 = vmatmul.msk.bf16.gmra.mxu3 %vm963_vm0, %v5578_v9 }
 0xc99   : > { %v7397_v9 = vpop.permute.xlu2 %3916 }
 0xc9e   : > { %v7309_v49 = vpop.permute.xlu0 %3946  ;;  %v7311_v55 = vpop.permute.xlu1 %3836 }
 0xc9f   : > { %7921 = vst [vmem:[#allocation14_spill] sm:$0xff] %v7309_v49 }
 0xca6   : > { %v7321_v61 = vpop.permute.xlu0 %3931  ;;  %v7325_v10 = vpop.permute.xlu1 %3721 }
 0xca7   : > { %7923 = vst [vmem:[#allocation16_spill] sm:$0xff] %v7321_v61 }
 0xca8   : > { %5437 = vmatmul.msk.bf16.gmra.mxu2 %vm963_vm0, %v5566_v1  ;;  %5450 = vmatmul.msk.bf16.gmra.mxu3 %vm963_vm0, %v5579_v48 }
 0xcae   : > { %v7329_v8 = vpop.permute.xlu0 %3726  ;;  %v7331_v19 = vpop.permute.xlu1 %3826 }
 0xcb6   : > { %v7343_v46 = vpop.permute.xlu0 %3921  ;;  %v7345_v33 = vpop.permute.xlu1 %3711 }
 0xcb8   : > { %5438 = vmatmul.msk.bf16.gmra.mxu2 %vm963_vm0, %v5567_v50  ;;  %5451 = vmatmul.msk.bf16.gmra.mxu3 %vm963_vm0, %v5580_v4 }
 0xcbe   : > { %v7355_v7 = vpop.permute.xlu0 %3716  ;;  %v3817_v60 = vpop.permute.xlu1 %3816 }
 0xcc6   : > { %v7361_v54 = vpop.permute.xlu0 %3911  ;;  %v7363_v37 = vpop.permute.xlu1 %3701 }
 0xcc8   : > { %5439 = vmatmul.msk.bf16.gmra.mxu2 %vm963_vm0, %v5568_v5  ;;  %5452 = vmatmul.msk.bf16.gmra.mxu3 %vm963_vm0, %v5581_v0  ;;  %v5574_v5 = vld [vmem:[%s7880_s14 + $0x50] sm:$0xff]  ;;  %v5587_v0 = vld [vmem:[%s7880_s14 + $0xb8] sm:$0xff] }
 0xcce   : > { %v7375_v57 = vpop.permute.xlu0 %3706  ;;  %v7379_v25 = vpop.permute.xlu1 %3806 }
 0xccf   : > { %7926 = vst [vmem:[#allocation19_spill] sm:$0xff] %v7379_v25 }
 0xcd6   : > { %v7383_v56 = vpop.permute.xlu0 %3901  ;;  %v7391_v47 = vpop.permute.xlu1 %3691 }
 0xcd8   : > { %5440 = vmatmul.msk.bf16.gmra.mxu2 %vm963_vm0, %v5569_v6  ;;  %5453 = vmatmul.msk.bf16.gmra.mxu3 %vm963_vm0, %v5582_v31  ;;  %v7411_v6 = vpop.permute.xlu2 %3801 }
 0xcd9   : > { %7931 = vst [vmem:[#allocation24_spill] sm:$0xff] %v7411_v6 }
 0xcde   : > { %v7399_v1 = vpop.permute.xlu0 %3696  ;;  %v7401_v48 = vpop.permute.xlu1 %3796 }
 0xcdf   : > { %7929 = vst [vmem:[#allocation22_spill] sm:$0xff] %v7401_v48 }
 0xce6   : > { %v7413_v31 = vpop.permute.xlu0 %3891 }
 0xce8   : > { %5441 = vmatmul.msk.bf16.gmra.mxu2 %vm963_vm0, %v5570_v38  ;;  %5454 = vmatmul.msk.bf16.gmra.mxu3 %vm963_vm0, %v5583_v14  ;;  %v7417_v38 = vpop.permute.xlu1 %3681 }
 0xcf8   : > { %5442 = vmatmul.msk.bf16.gmra.mxu2 %vm963_vm0, %v5571_v58  ;;  %5455 = vmatmul.msk.bf16.gmra.mxu3 %vm963_vm0, %v5584_v30  ;;  %v7423_v30 = vpop.permute.xlu2 %3906 }
 0xd00   : > { %v7441_v34 = vpop.permute.xlu2 %3791 }
 0xd01   : > { %7935 = vst [vmem:[#allocation28_spill] sm:$0xff] %v7441_v34 }
 0xd08   : > { %5443 = vmatmul.msk.bf16.gmra.mxu2 %vm963_vm0, %v5572_v27  ;;  %5456 = vmatmul.msk.bf16.gmra.mxu3 %vm963_vm0, %v5585_v13  ;;  %v7425_v27 = vpop.permute.xlu0 %3686 }
 0xd0b   : > { %v7377_v28 = vpop.f32.mrf.mxu3  ;;  %v4234_v50 = vpop.f32.mrf.mxu2 }
 0xd0c   : > { %7925 = vst [vmem:[#allocation18_spill] sm:$0xff] %v7377_v28 }
 0xd10   : > { %v7443_v11 = vpop.permute.xlu0 %3671 }
 0xd13   : > { %v7381_v20 = vpop.f32.mrf.mxu3  ;;  %v7421_v58 = vpop.f32.mrf.mxu2 }
 0xd14   : > { %7927 = vst [vmem:[#allocation20_spill] sm:$0xff] %v7381_v20 }
 0xd18   : > { %5444 = vmatmul.msk.bf16.gmra.mxu2 %vm963_vm0, %v5573_v44  ;;  %5457 = vmatmul.msk.bf16.gmra.mxu3 %vm963_vm0, %v5586_v52  ;;  %v7429_v44 = vpop.permute.xlu1 %3786  ;;  %v5575_v52 = vld [vmem:[%s7880_s14 + $0x58] sm:$0xff] }
 0xd19   : > { %7934 = vst [vmem:[#allocation27_spill] sm:$0xff] %v7429_v44 }
 0xd1b   : > { %v7395_v16 = vpop.f32.mrf.mxu3 }
 0xd1c   : > { %7928 = vst [vmem:[#allocation21_spill] sm:$0xff] %v7395_v16 }
 0xd20   : > { %v7445_v21 = vpop.permute.xlu1 %3771 }
 0xd21   : > { %7936 = vst [vmem:[#allocation29_spill] sm:$0xff] %v7445_v21 }
 0xd23   : > { %v7403_v4 = vpop.f32.mrf.mxu3 }
 0xd24   : > { %7930 = vst [vmem:[#allocation23_spill] sm:$0xff] %v7403_v4 }
 0xd28   : > { %5445 = vmatmul.msk.bf16.gmra.mxu2 %vm963_vm0, %v5574_v5  ;;  %5458 = vmatmul.msk.bf16.gmra.mxu3 %vm963_vm0, %v5587_v0  ;;  %v5588_v5 = vld [vmem:[%s7880_s14 + $0xc0] sm:$0xff]  ;;  %v7437_v0 = vpop.f32.mrf.mxu2  ;;  %v7459_v48 = vpop.permute.xlu1 %3666 }
 0xd2b   : > { %v7419_v14 = vpop.f32.mrf.mxu3 }
 0xd2c   : > { %7932 = vst [vmem:[#allocation25_spill] sm:$0xff] %v7419_v14  ;;  %v7449_v14 = vpop.permute.xlu2 %3896 }
 0xd30   : > { %v7447_v42 = vpop.f32.mrf.mxu2 }
 0xd33   : > { %v7427_v13 = vpop.f32.mrf.mxu3 }
 0xd34   : > { %7933 = vst [vmem:[#allocation26_spill] sm:$0xff] %v7427_v13  ;;  %v7466_v36 = vpop.permute.xlu2 %3781 }
 0xd35   : > { %7938 = vst [vmem:[#allocation31_spill] sm:$0xff] %v7466_v36 }
 0xd38   : > { %5446 = vmatmul.msk.bf16.gmra.mxu2 %vm963_vm0, %v5575_v52  ;;  %5459 = vmatmul.msk.bf16.gmra.mxu3 %vm963_vm0, %v5588_v5  ;;  %v5576_v5 = vld [vmem:[%s7880_s14 + $0x60] sm:$0xff] }
 0xd3b   : > { %v4314_v23 = vpop.f32.mrf.mxu3 }
 0xd3c   : > { %v4315_v18 = vadd.f32 %v4314_v23, %v3812_v17  ;;  %v5589_v23 = vld [vmem:[%s7880_s14 + $0xc8] sm:$0xff]  ;;  %v7457_v17 = vpop.permute.xlu0 %3776  ;;  %v7478_v36 = vpop.permute.xlu2 %3676 }
 0xd3d   : > { %7937 = vst [vmem:[#allocation30_spill] sm:$0xff] %v7457_v17 }
 0xd3e   : > { %v4394_v12 = vmul.f32 %v4315_v18, %v4315_v18 }
 0xd40   : > { %v4426_v39 = vmul.f32 %v4394_v12, %v4315_v18 }
 0xd42   : > { %v4458_v13 = vmul.f32 0.044715, %v4426_v39  ;;  %v7463_v39 = vpop.f32.mrf.mxu2 }
 0xd43   : > { %v4316_v25 = vpop.f32.mrf.mxu3 }
 0xd44   : > { %v4490_v6 = vadd.f32 %v4458_v13, %v4315_v18  ;;  %v4317_v52 = vadd.f32 %v4316_v25, %v3817_v60  ;;  %v7468_v61 = vpop.permute.xlu0 %3761 }
 0xd46   : > { %v4522_v21 = vmul.f32 0.7978846, %v4490_v6  ;;  %v4395_v4 = vmul.f32 %v4317_v52, %v4317_v52 }
 0xd48   : > { %5765 = vtanh.f32 %v4522_v21  ;;  %v4427_v12 = vmul.f32 %v4395_v4, %v4317_v52  ;;  %5447 = vmatmul.msk.bf16.gmra.mxu2 %vm963_vm0, %v5576_v5  ;;  %5460 = vmatmul.msk.bf16.gmra.mxu3 %vm963_vm0, %v5589_v23  ;;  %v3652_v5 = vpop.permute.xlu1 %3651 }
 0xd49   : > { %v4235_v20 = vadd.f32 %v4234_v50, %v3652_v5 }
 0xd4a   : > { %v4459_v60 = vmul.f32 0.044715, %v4427_v12  ;;  %v7470_v28 = vpop.f32.mrf.mxu2 }
 0xd4b   : > { %v4319_v25 = vpop.f32.mrf.mxu3 }
 0xd4c   : > { %v4491_v13 = vadd.f32 %v4459_v60, %v4317_v52  ;;  %v4320_v16 = vadd.f32 %v4319_v25, %v7359_v29  ;;  %v5590_v25 = vld [vmem:[%s7880_s14 + $0xd0] sm:$0xff] }
 0xd4e   : > { %v5766_v34 = vpop.eup %5765  ;;  %v4523_v6 = vmul.f32 0.7978846, %v4491_v13  ;;  %v4396_v17 = vmul.f32 %v4320_v16, %v4320_v16 }
 0xd4f   : > { %v4586_v22 = vadd.f32 1.0, %v5766_v34 }
 0xd50   : > { %5767 = vtanh.f32 %v4523_v6  ;;  %v4428_v21 = vmul.f32 %v4396_v17, %v4320_v16 }
 0xd51   : > { %v4618_v4 = vmul.f32 0.5, %v4586_v22 }
 0xd52   : > { %v4460_v23 = vmul.f32 0.044715, %v4428_v21  ;;  %v3657_v21 = vpop.permute.xlu0 %3656 }
 0xd53   : > { %v4321_v44 = vpop.f32.mrf.mxu3  ;;  %v4650_v12 = vmul.f32 %v4618_v4, %v4315_v18 }
 0xd54   : > { %v4492_v60 = vadd.f32 %v4460_v23, %v4320_v16  ;;  %v4322_v29 = vadd.f32 %v4321_v44, %v7331_v19  ;;  %v4237_v19 = vadd.f32 %v7421_v58, %v3657_v21  ;;  %v3662_v58 = vpop.permute.xlu2 %3661 }
 0xd55   : > { %v7476_v34 = vmul.f32 %v4650_v12, %v4235_v20 }
 0xd56   : > { %v5768_v13 = vpop.eup %5767  ;;  %v4524_v6 = vmul.f32 0.7978846, %v4492_v60  ;;  %v4397_v17 = vmul.f32 %v4322_v29, %v4322_v29 }
 0xd57   : > { %v4587_v22 = vadd.f32 1.0, %v5768_v13  ;;  %v7485_v13 = vpop.f32.mrf.mxu2 }
 0xd58   : > { %5769 = vtanh.f32 %v4524_v6  ;;  %v4429_v50 = vmul.f32 %v4397_v17, %v4322_v29  ;;  %5461 = vmatmul.msk.bf16.gmra.mxu3 %vm963_vm0, %v5590_v25 }
 0xd59   : > { %v4619_v18 = vmul.f32 0.5, %v4587_v22 }
 0xd5a   : > { %v4461_v4 = vmul.f32 0.044715, %v4429_v50 }
 0xd5b   : > { %v4324_v44 = vpop.f32.mrf.mxu3  ;;  %v4651_v5 = vmul.f32 %v4619_v18, %v4317_v52  ;;  %v4240_v52 = vadd.f32 %v7437_v0, %v3662_v58 }
 0xd5c   : > { %v4493_v23 = vadd.f32 %v4461_v4, %v4322_v29  ;;  %v4325_v20 = vadd.f32 %v4324_v44, %v7341_v62  ;;  %v5591_v44 = vld [vmem:[%s7880_s14 + $0xd8] sm:$0xff] }
 0xd5d   : > { %v7483_v12 = vmul.f32 %v4651_v5, %v4237_v19 }
 0xd5e   : > { %v5770_v60 = vpop.eup %5769  ;;  %v4525_v26 = vmul.f32 0.7978846, %v4493_v23  ;;  %v4398_v6 = vmul.f32 %v4325_v20, %v4325_v20 }
 0xd5f   : > { %v4588_v17 = vadd.f32 1.0, %v5770_v60 }
 0xd60   : > { %5771 = vtanh.f32 %v4525_v26  ;;  %v4430_v22 = vmul.f32 %v4398_v6, %v4325_v20 }
 0xd61   : > { %v4620_v50 = vmul.f32 0.5, %v4588_v17  ;;  %v7496_v17 = vpop.f32.mrf.mxu2 }
 0xd62   : > { %v4462_v21 = vmul.f32 0.044715, %v4430_v22 }
 0xd63   : > { %v4326_v18 = vpop.f32.mrf.mxu3  ;;  %v4652_v62 = vmul.f32 %v4620_v50, %v4320_v16 }
 0xd64   : > { %v4494_v4 = vadd.f32 %v4462_v21, %v4325_v20  ;;  %v4327_v19 = vadd.f32 %v4326_v18, %v7311_v55  ;;  %v4242_v55 = vadd.f32 %v7447_v42, %v7459_v48  ;;  %v4245_v42 = vadd.f32 %v7463_v39, %v7443_v11 }
 0xd65   : > { %v7494_v5 = vmul.f32 %v4652_v62, %v4240_v52 }
 0xd66   : > { %v5772_v23 = vpop.eup %5771  ;;  %v4526_v60 = vmul.f32 0.7978846, %v4494_v4  ;;  %v4399_v26 = vmul.f32 %v4327_v19, %v4327_v19 }
 0xd67   : > { %v4589_v6 = vadd.f32 1.0, %v5772_v23 }
 0xd68   : > { %5773 = vtanh.f32 %v4526_v60  ;;  %v4431_v22 = vmul.f32 %v4399_v26, %v4327_v19  ;;  %5462 = vmatmul.msk.bf16.gmra.mxu3 %vm963_vm0, %v5591_v44 }
 0xd69   : > { %v4621_v16 = vmul.f32 0.5, %v4589_v6  ;;  %v4254_v6 = vpop.f32.mrf.mxu2 }
 0xd6a   : > { %v4463_v0 = vmul.f32 0.044715, %v4431_v22 }
 0xd6b   : > { %v4329_v50 = vpop.f32.mrf.mxu3  ;;  %v4653_v58 = vmul.f32 %v4621_v16, %v4322_v29 }
 0xd6c   : > { %v4495_v21 = vadd.f32 %v4463_v0, %v4327_v19  ;;  %v4330_v52 = vadd.f32 %v4329_v50, %v7295_v51  ;;  %v5592_v0 = vld [vmem:[%s7880_s14 + $0xe0] sm:$0xff] }
 0xd6d   : > { %v7502_v18 = vmul.f32 %v4653_v58, %v4242_v55 }
 0xd6e   : > { %v5774_v62 = vpop.eup %5773  ;;  %v4527_v4 = vmul.f32 0.7978846, %v4495_v21  ;;  %v4400_v23 = vmul.f32 %v4330_v52, %v4330_v52 }
 0xd6f   : > { %v4590_v25 = vadd.f32 1.0, %v5774_v62 }
 0xd70   : > { %5775 = vtanh.f32 %v4527_v4  ;;  %v4432_v44 = vmul.f32 %v4400_v23, %v4330_v52 }
 0xd71   : > { %v4622_v26 = vmul.f32 0.5, %v4590_v25  ;;  %v7517_v23 = vpop.f32.mrf.mxu2 }
 0xd72   : > { %v4464_v22 = vmul.f32 0.044715, %v4432_v44 }
 0xd73   : > { %v4331_v48 = vpop.f32.mrf.mxu3  ;;  %v4654_v29 = vmul.f32 %v4622_v26, %v4325_v20  ;;  %v4247_v20 = vadd.f32 %v7470_v28, %v7478_v36  ;;  %v4250_v28 = vadd.f32 %v7485_v13, %v7417_v38  ;;  %v4252_v38 = vadd.f32 %v7496_v17, %v7425_v27  ;;  %v5594_v27 = vld [vmem:[%s7880_s14 + $0xf0] sm:$0xff] }
 0xd74   : > { %v4496_v51 = vadd.f32 %v4464_v22, %v4330_v52  ;;  %v4332_v16 = vadd.f32 %v4331_v48, %v7327_v15 }
 0xd75   : > { %v7512_v55 = vmul.f32 %v4654_v29, %v4245_v42 }
 0xd76   : > { %v5776_v50 = vpop.eup %5775  ;;  %v4528_v58 = vmul.f32 0.7978846, %v4496_v51  ;;  %v4401_v21 = vmul.f32 %v4332_v16, %v4332_v16 }
 0xd77   : > { %v4591_v25 = vadd.f32 1.0, %v5776_v50 }
 0xd78   : > { %5777 = vtanh.f32 %v4528_v58  ;;  %v4433_v62 = vmul.f32 %v4401_v21, %v4332_v16  ;;  %5463 = vmatmul.msk.bf16.gmra.mxu3 %vm963_vm0, %v5592_v0 }
 0xd79   : > { %v4623_v11 = vmul.f32 0.5, %v4591_v25 }
 0xd7a   : > { %v4465_v39 = vmul.f32 0.044715, %v4433_v62 }
 0xd7b   : > { %v4334_v15 = vpop.f32.mrf.mxu3  ;;  %v4655_v4 = vmul.f32 %v4623_v11, %v4327_v19 }
 0xd7c   : > { %v4497_v44 = vadd.f32 %v4465_v39, %v4332_v16  ;;  %v4335_v26 = vadd.f32 %v4334_v15, %v7277_v63  ;;  %v5593_v63 = vld [vmem:[%s7880_s14 + $0xe8] sm:$0xff]  ;;  %v7531_v39 = vpop.f32.mrf.mxu2 }
 0xd7d   : > { %v7520_v22 = vmul.f32 %v4655_v4, %v4247_v20 }
 0xd7e   : > { %v5778_v42 = vpop.eup %5777  ;;  %v4529_v48 = vmul.f32 0.7978846, %v4497_v44  ;;  %v4402_v29 = vmul.f32 %v4335_v26, %v4335_v26 }
 0xd7f   : > { %v4592_v51 = vadd.f32 1.0, %v5778_v42 }
 0xd80   : > { %5779 = vtanh.f32 %v4529_v48  ;;  %v4434_v50 = vmul.f32 %v4402_v29, %v4335_v26 }
 0xd81   : > { %v4624_v58 = vmul.f32 0.5, %v4592_v51 }
 0xd82   : > { %v4466_v36 = vmul.f32 0.044715, %v4434_v50 }
 0xd83   : > { %v4336_v19 = vpop.f32.mrf.mxu3  ;;  %v4656_v21 = vmul.f32 %v4624_v58, %v4330_v52  ;;  %v4255_v58 = vadd.f32 %v4254_v6, %v7391_v47  ;;  %v5595_v6 = vld [vmem:[%s7880_s14 + $0xf8] sm:$0xff] }
 0xd84   : > { %v4498_v25 = vadd.f32 %v4466_v36, %v4335_v26  ;;  %v7540_v51 = vpop.f32.mrf.mxu2 }
 0xd85   : > { %v7529_v62 = vmul.f32 %v4656_v21, %v4250_v28 }
 0xd86   : > { %v5780_v11 = vpop.eup %5779  ;;  %v4530_v20 = vmul.f32 0.7978846, %v4498_v25 }
 0xd87   : > { %v4593_v15 = vadd.f32 1.0, %v5780_v11 }
 0xd88   : > { %5781 = vtanh.f32 %v4530_v20  ;;  %5464 = vmatmul.msk.bf16.gmra.mxu3 %vm963_vm0, %v5593_v63 }
 0xd89   : > { %v4625_v4 = vmul.f32 0.5, %v4593_v15 }
 0xd8b   : > { %v4339_v13 = vpop.f32.mrf.mxu3  ;;  %v4657_v52 = vmul.f32 %v4625_v4, %v4332_v16 }
 0xd8c   : > { %v7549_v16 = vpop.f32.mrf.mxu2  ;;  %v7568_v15 = vadd.f32 %v4339_v13, %v7293_v40 }
 0xd8d   : > { %v7536_v44 = vmul.f32 %v4657_v52, %v4252_v38 }
 0xd8e   : > { %v5782_v42 = vpop.eup %5781  ;;  %v4404_v38 = vmul.f32 %v7568_v15, %v7568_v15 }
 0xd8f   : > { %v4594_v48 = vadd.f32 1.0, %v5782_v42 }
 0xd91   : > { %v4626_v50 = vmul.f32 0.5, %v4594_v48 }
 0xd93   : > { %v4341_v36 = vpop.f32.mrf.mxu3  ;;  %v4658_v28 = vmul.f32 %v4626_v50, %v4335_v26 }
 0xd94   : > { %v7551_v63 = vpop.f32.mrf.mxu2  ;;  %v7563_v26 = vadd.f32 %v4341_v36, %v7271_v35 }
 0xd95   : > { %v7546_v17 = vmul.f32 %v4658_v28, %v4255_v58  ;;  %v4436_v58 = vmul.f32 %v4404_v38, %v7568_v15 }
 0xd96   : > { %v4405_v4 = vmul.f32 %v7563_v26, %v7563_v26 }
 0xd98   : > { %5465 = vmatmul.msk.bf16.gmra.mxu3 %vm963_vm0, %v5594_v27 }
 0xd9b   : > { %v4344_v21 = vpop.f32.mrf.mxu3 }
 0xd9c   : > { %v7554_v11 = vadd.f32 %v4344_v21, %v7261_v43  ;;  %v7587_v48 = vpop.f32.mrf.mxu2 }
 0xd9e   : > { %v4406_v43 = vmul.f32 %v7554_v11, %v7554_v11 }
 0xda0   : > { %v4438_v40 = vmul.f32 %v4406_v43, %v7554_v11 }
 0xda2   : > { %v4470_v36 = vmul.f32 0.044715, %v4438_v40 }
 0xda3   : > { %v4346_v25 = vpop.f32.mrf.mxu3 }
 0xda4   : > { %v7557_v47 = vadd.f32 %v4346_v25, %v7269_v2  ;;  %v7574_v2 = vadd.f32 %v4336_v19, %v7289_v45  ;;  %v4437_v45 = vmul.f32 %v4405_v4, %v7563_v26  ;;  %v4502_v43 = vadd.f32 %v4470_v36, %v7554_v11 }
 0xda6   : > { %v4407_v20 = vmul.f32 %v7557_v47, %v7557_v47  ;;  %v4403_v42 = vmul.f32 %v7574_v2, %v7574_v2  ;;  %v4534_v0 = vmul.f32 0.7978846, %v4502_v43 }
 0xda8   : > { %5466 = vmatmul.msk.bf16.gmra.mxu3 %vm963_vm0, %v5595_v6  ;;  %v4439_v35 = vmul.f32 %v4407_v20, %v7557_v47  ;;  %v4435_v27 = vmul.f32 %v4403_v42, %v7574_v2  ;;  %v4468_v6 = vmul.f32 0.044715, %v4436_v58 }
 0xdaa   : > { %v4471_v19 = vmul.f32 0.044715, %v4439_v35  ;;  %v4500_v42 = vadd.f32 %v4468_v6, %v7568_v15 }
 0xdab   : > { %v4349_v52 = vpop.f32.mrf.mxu3 }
 0xdac   : > { %v7583_v13 = vadd.f32 %v4349_v52, %v7259_v3  ;;  %v4469_v3 = vmul.f32 0.044715, %v4437_v45  ;;  %v4503_v21 = vadd.f32 %v4471_v19, %v7557_v47  ;;  %v4467_v52 = vmul.f32 0.044715, %v4435_v27  ;;  %v4271_v45 = vpop.f32.mrf.mxu2 }
 0xdad   : > { %v4272_v53 = vadd.f32 %v4271_v45, %v7329_v8 }
 0xdae   : > { %v4408_v50 = vmul.f32 %v7583_v13, %v7583_v13  ;;  %v4501_v38 = vadd.f32 %v4469_v3, %v7563_v26  ;;  %v4535_v40 = vmul.f32 0.7978846, %v4503_v21  ;;  %v4499_v58 = vadd.f32 %v4467_v52, %v7574_v2 }
 0xdb0   : > { %v4440_v28 = vmul.f32 %v4408_v50, %v7583_v13  ;;  %v4531_v3 = vmul.f32 0.7978846, %v4499_v58 }
 0xdb2   : > { %v4472_v25 = vmul.f32 0.044715, %v4440_v28  ;;  %v4533_v28 = vmul.f32 0.7978846, %v4501_v38 }
 0xdb3   : > { %v4351_v20 = vpop.f32.mrf.mxu3 }
 0xdb4   : > { %v4504_v4 = vadd.f32 %v4472_v25, %v7583_v13  ;;  %v4352_v35 = vadd.f32 %v4351_v20, %v7285_v24  ;;  %v4532_v25 = vmul.f32 0.7978846, %v4500_v42 }
 0xdb6   : > { %v4536_v60 = vmul.f32 0.7978846, %v4504_v4  ;;  %v4409_v50 = vmul.f32 %v4352_v35, %v4352_v35 }
 0xdb8   : > { %5783 = vtanh.f32 %v4536_v60  ;;  %v4441_v19 = vmul.f32 %v4409_v50, %v4352_v35 }
 0xdb9   : > { %5785 = vtanh.f32 %v4535_v40 }
 0xdba   : > { %v4473_v36 = vmul.f32 0.044715, %v4441_v19  ;;  %5787 = vtanh.f32 %v4534_v0  ;;  %v4274_v0 = vpop.f32.mrf.mxu2 }
 0xdbb   : > { %v4354_v29 = vpop.f32.mrf.mxu3  ;;  %5789 = vtanh.f32 %v4533_v28 }
 0xdbc   : > { %v4505_v24 = vadd.f32 %v4473_v36, %v4352_v35  ;;  %v7603_v27 = vadd.f32 %v4354_v29, %v7413_v31  ;;  %5791 = vtanh.f32 %v4532_v25 }
 0xdbe   : > { %v5784_v21 = vpop.eup %5783  ;;  %v4537_v6 = vmul.f32 0.7978846, %v4505_v24  ;;  %v4410_v60 = vmul.f32 %v7603_v27, %v7603_v27 }
 0xdbf   : > { %v5786_v20 = vpop.eup %5785  ;;  %v4600_v4 = vadd.f32 1.0, %v5784_v21  ;;  %v7614_v21 = vpop.permute.xlu1 %3756 }
 0xdc0   : > { %5793 = vtanh.f32 %v4537_v6  ;;  %v4442_v43 = vmul.f32 %v4410_v60, %v7603_v27  ;;  %v5788_v52 = vpop.eup %5787  ;;  %v4599_v31 = vadd.f32 1.0, %v5786_v20 }
 0xdc1   : > { %5795 = vtanh.f32 %v4531_v3  ;;  %v5790_v29 = vpop.eup %5789  ;;  %v4632_v58 = vmul.f32 0.5, %v4600_v4  ;;  %v4598_v28 = vadd.f32 1.0, %v5788_v52  ;;  %v4270_v52 = vadd.f32 %v7587_v48, %v7325_v10 }
 0xdc2   : > { %v4474_v38 = vmul.f32 0.044715, %v4442_v43  ;;  %v5792_v19 = vpop.eup %5791  ;;  %v4631_v60 = vmul.f32 0.5, %v4599_v31  ;;  %v4597_v20 = vadd.f32 1.0, %v5790_v29 }
 0xdc3   : > { %v4356_v40 = vpop.f32.mrf.mxu3  ;;  %v4596_v4 = vadd.f32 1.0, %v5792_v19 }
 0xdc4   : > { %v4506_v50 = vadd.f32 %v4474_v38, %v7603_v27  ;;  %v7610_v42 = vadd.f32 %v4356_v40, %v7449_v14  ;;  %v4664_v14 = vmul.f32 %v4632_v58, %v7583_v13  ;;  %v4630_v40 = vmul.f32 0.5, %v4598_v28 }
 0xdc5   : > { %v4663_v31 = vmul.f32 %v4631_v60, %v7557_v47  ;;  %v4629_v29 = vmul.f32 0.5, %v4597_v20  ;;  %v4628_v28 = vmul.f32 0.5, %v4596_v4 }
 0xdc6   : > { %v5794_v36 = vpop.eup %5793  ;;  %v4538_v25 = vmul.f32 0.7978846, %v4506_v50  ;;  %v4411_v24 = vmul.f32 %v7610_v42, %v7610_v42  ;;  %v4696_v58 = vmul.f32 %v4664_v14, %v4270_v52  ;;  %v4662_v48 = vmul.f32 %v4630_v40, %v7554_v11 }
 0xdc7   : > { %v5796_v3 = vpop.eup %5795  ;;  %v4601_v6 = vadd.f32 1.0, %v5794_v36  ;;  %v4267_v36 = vadd.f32 %v7551_v63, %v7355_v7  ;;  %v4262_v11 = vadd.f32 %v7540_v51, %v7375_v57  ;;  %v4257_v51 = vadd.f32 %v7517_v23, %v7399_v1 }
 0xdc8   : > { %5797 = vtanh.f32 %v4538_v25  ;;  %v4443_v43 = vmul.f32 %v4411_v24, %v7610_v42  ;;  %v4595_v59 = vadd.f32 1.0, %v5796_v3  ;;  %v4276_v25 = vpop.f32.mrf.mxu2  ;;  %v4661_v3 = vmul.f32 %v4629_v29, %v7563_v26 }
 0xdc9   : > { %v4633_v38 = vmul.f32 0.5, %v4601_v6  ;;  %v4695_v24 = vmul.f32 %v4663_v31, %v4267_v36 }
 0xdca   : > { %v4475_v50 = vmul.f32 0.044715, %v4443_v43  ;;  %v4627_v7 = vmul.f32 0.5, %v4595_v59  ;;  %v4260_v59 = vadd.f32 %v7531_v39, %v7363_v37  ;;  %v4693_v14 = vmul.f32 %v4661_v3, %v4262_v11  ;;  %v7648_v39 = vpop.permute.xlu2 %3766 }
 0xdcb   : > { %v4665_v49 = vmul.f32 %v4633_v38, %v4352_v35  ;;  %v4359_v32 = vpop.f32.mrf.mxu3  ;;  %v4265_v35 = vadd.f32 %v7549_v16, %v7345_v33  ;;  %v4660_v16 = vmul.f32 %v4628_v28, %v7568_v15 }
 0xdcc   : > { %v4507_v13 = vadd.f32 %v4475_v50, %v7610_v42  ;;  %v7626_v19 = vadd.f32 %v4359_v32, %v7383_v56  ;;  %v3742_v56 = vpop.permute.xlu0 %3741  ;;  %v4659_v38 = vmul.f32 %v4627_v7, %v7574_v2 }
 0xdcd   : > { %v4697_v10 = vmul.f32 %v4665_v49, %v4272_v53  ;;  %v3732_v53 = vpop.permute.xlu1 %3731  ;;  %v4694_v33 = vmul.f32 %v4662_v48, %v4265_v35  ;;  %v4692_v15 = vmul.f32 %v4660_v16, %v4260_v59 }
 0xdce   : > { %v5798_v8 = vpop.eup %5797  ;;  %v4539_v47 = vmul.f32 0.7978846, %v4507_v13  ;;  %v4412_v45 = vmul.f32 %v7626_v19, %v7626_v19  ;;  %v4275_v60 = vadd.f32 %v4274_v0, %v3732_v53  ;;  %v4691_v29 = vmul.f32 %v4659_v38, %v4257_v51 }
 0xdcf   : > { %v4721_v63 = vpack.c.bf16 %v4697_v10, %v4696_v58  ;;  %v4602_v32 = vadd.f32 1.0, %v5798_v8  ;;  %v4720_v43 = vpack.c.bf16 %v4695_v24, %v4694_v33  ;;  %v4719_v2 = vpack.c.bf16 %v4693_v14, %v4692_v15 }
 0xdd0   : > { %5799 = vtanh.f32 %v4539_v47  ;;  %v4444_v49 = vmul.f32 %v4412_v45, %v7626_v19  ;;  %v4279_v0 = vpop.f32.mrf.mxu2  ;;  %v4718_v10 = vpack.c.bf16 %v4691_v29, %v7546_v17 }
 0xdd1   : > { %4810 = vmatpush.bf16.msra.mxu3 %v4721_v63  ;;  %v4634_v6 = vmul.f32 0.5, %v4602_v32 }
 0xdd2   : > { %v4476_v20 = vmul.f32 0.044715, %v4444_v49  ;;  %v3752_v24 = vpop.permute.xlu2 %3751  ;;  %v4280_v49 = vadd.f32 %v4279_v0, %v3742_v56  ;;  %v7941_v56 = vpack.c.bf16 %v7502_v18, %v7494_v5  ;;  %v7942_v18 = vpack.c.bf16 %v7483_v12, %v7476_v34 }
 0xdd3   : > { %v4361_v26 = vpop.f32.mrf.mxu3  ;;  %v4666_v40 = vmul.f32 %v4634_v6, %v7603_v27  ;;  %v7940_v6 = vpack.c.bf16 %v7520_v22, %v7512_v55  ;;  %v5597_v55 = vld [vmem:[%s7882_s16 + $0x4] sm:$0xf0] }
 0xdd4   : > { %v4508_v4 = vadd.f32 %v4476_v20, %v7626_v19  ;;  %v4362_v57 = vadd.f32 %v4361_v26, %v7423_v30  ;;  %v3737_v13 = vpop.permute.xlu0 %3736 }
 0xdd5   : > { %4811 = vmatpush.bf16.msra.mxu3 %v4720_v43  ;;  %v7646_v52 = vmul.f32 %v4666_v40, %v4275_v60  ;;  %v4277_v1 = vadd.f32 %v4276_v25, %v3737_v13 }
 0xdd6   : > { %v5800_v37 = vpop.eup %5799  ;;  %v4540_v50 = vmul.f32 0.7978846, %v4508_v4  ;;  %v4413_v31 = vmul.f32 %v4362_v57, %v4362_v57 }
 0xdd7   : > { %v4603_v27 = vadd.f32 1.0, %v5800_v37 }
 0xdd8   : > { %5801 = vtanh.f32 %v4540_v50  ;;  %v4445_v36 = vmul.f32 %v4413_v31, %v4362_v57  ;;  %v4281_v17 = vpop.f32.mrf.mxu2 }
 0xdd9   : > { %4812 = vmatpush.bf16.msra.mxu3 %v4719_v2  ;;  %v4635_v30 = vmul.f32 0.5, %v4603_v27 }
 0xdda   : > { %v4477_v58 = vmul.f32 0.044715, %v4445_v36 }
 0xddb   : > { %v4364_v23 = vpop.f32.mrf.mxu3  ;;  %v4667_v48 = vmul.f32 %v4635_v30, %v7610_v42 }
 0xddc   : > { %v4509_v28 = vadd.f32 %v4477_v58, %v4362_v57  ;;  %v7653_v8 = vadd.f32 %v4364_v23, %v7361_v54  ;;  %v7939_v54 = vpack.c.bf16 %v7536_v44, %v7529_v62 }
 0xddd   : > { %4813 = vmatpush.bf16.msra.mxu3 %v4718_v10  ;;  %v7655_v35 = vmul.f32 %v4667_v48, %v4277_v1  ;;  %v5477_v48 = vld [vmem:[%s7882_s16 + $0x10] sm:$0xf] }
 0xdde   : > { %v5802_v47 = vpop.eup %5801  ;;  %v4541_v45 = vmul.f32 0.7978846, %v4509_v28  ;;  %v4414_v7 = vmul.f32 %v7653_v8, %v7653_v8  ;;  %v5599_v28 = vld [vmem:[%s7882_s16 + $0x14] sm:$0xf0] }
 0xddf   : > { %v4604_v63 = vadd.f32 1.0, %v5802_v47  ;;  %v4722_v25 = vpack.c.bf16 %v7655_v35, %v7646_v52  ;;  %v5487_v52 = vld [vmem:[%s7882_s16 + $0x28] sm:$0xf0] }
 0xde0   : > { %5803 = vtanh.f32 %v4541_v45  ;;  %v4446_v42 = vmul.f32 %v4414_v7, %v7653_v8  ;;  %v4284_v43 = vpop.f32.mrf.mxu2 }
 0xde1   : > { %4814 = vmatpush.bf16.msra.mxu3 %v7939_v54  ;;  %v4636_v3 = vmul.f32 0.5, %v4604_v63 }
 0xde2   : > { %v4478_v32 = vmul.f32 0.044715, %v4446_v42 }
 0xde3   : > { %v4366_v53 = vpop.f32.mrf.mxu3  ;;  %v4668_v11 = vmul.f32 %v4636_v3, %v7626_v19  ;;  %v3747_v19 = vpop.permute.xlu2 %3746  ;;  %v5478_v3 = vor.u32 %v5599_v28, %v5477_v48 }
 0xde4   : > { %v4510_v33 = vadd.f32 %v4478_v32, %v7653_v8  ;;  %v4367_v16 = vadd.f32 %v4366_v53, %v7397_v9  ;;  %v5469_v9 = vld [vmem:[%s7882_s16] sm:$0xf]  ;;  %v4282_v38 = vadd.f32 %v4281_v17, %v3747_v19 }
 0xde5   : > { %4815 = vmatpush.bf16.msra.mxu3 %v7940_v6  ;;  %v7671_v59 = vmul.f32 %v4668_v11, %v4280_v49  ;;  %v5470_v5 = vor.u32 %v5597_v55, %v5469_v9 }
 0xde6   : > { %v5804_v60 = vpop.eup %5803  ;;  %v4542_v20 = vmul.f32 0.7978846, %v4510_v33  ;;  %v4415_v62 = vmul.f32 %v4367_v16, %v4367_v16 }
 0xde7   : > { %v4605_v44 = vadd.f32 1.0, %v5804_v60 }
 0xde8   : > { %5805 = vtanh.f32 %v4542_v20  ;;  %v4447_v26 = vmul.f32 %v4415_v62, %v4367_v16  ;;  %v5485_v62 = vld [vmem:[%s7882_s16 + $0x20] sm:$0xf] }
 0xde9   : > { %4816 = vmatpush.bf16.msra.mxu3 %v7941_v56  ;;  %v4637_v22 = vmul.f32 0.5, %v4605_v44  ;;  %v5601_v44 = vld [vmem:[%s7882_s16 + $0x24] sm:$0xf0] }
 0xdea   : > { %v4479_v14 = vmul.f32 0.044715, %v4447_v26 }
 0xdeb   : > { %v4369_v40 = vpop.f32.mrf.mxu3  ;;  %v4669_v4 = vmul.f32 %v4637_v22, %v4362_v57 }
 0xdec   : > { %v4511_v51 = vadd.f32 %v4479_v14, %v4367_v16  ;;  %v4370_v15 = vadd.f32 %v4369_v40, %v7343_v46  ;;  %v4286_v46 = vpop.f32.mrf.mxu2 }
 0xded   : > { %4817 = vmatpush.bf16.msra.mxu3 %v7942_v18  ;;  %v7686_v37 = vmul.f32 %v4669_v4, %v4282_v38  ;;  %v4287_v63 = vadd.f32 %v4286_v46, %v7614_v21  ;;  %v5486_v38 = vor.u32 %v5601_v44, %v5485_v62  ;;  %v7948_v62 = vld [vmem:[#allocation31_spill] sm:$0xff]  ;;  %v7949_v44 = vld [vmem:[#allocation18_spill] sm:$0xff] }
 0xdee   : > { %v5806_v0 = vpop.eup %5805  ;;  %v4543_v50 = vmul.f32 0.7978846, %v4511_v51  ;;  %v4416_v31 = vmul.f32 %v4370_v15, %v4370_v15 }
 0xdef   : > { %v4723_v2 = vpack.c.bf16 %v7686_v37, %v7671_v59  ;;  %v4606_v57 = vadd.f32 1.0, %v5806_v0  ;;  %v5479_v59 = vld [vmem:[%s7882_s16 + $0x18] sm:$0xf0] }
 0xdf0   : > { %5807 = vtanh.f32 %v4543_v50  ;;  %v4448_v29 = vmul.f32 %v4416_v31, %v4370_v15  ;;  %4818 = vmatmul.bf16.vlgmr.msra.gmra.mxu3 %v5470_v5  ;;  %v7944_v50 = vld [vmem:[#allocation14_spill] sm:$0xff] }
 0xdf1   : > { %v4638_v34 = vmul.f32 0.5, %v4606_v57 }
 0xdf2   : > { %v4480_v27 = vmul.f32 0.044715, %v4448_v29 }
 0xdf3   : > { %v4371_v36 = vpop.f32.mrf.mxu3  ;;  %v4670_v45 = vmul.f32 %v4638_v34, %v7653_v8  ;;  %v7945_v34 = vld [vmem:[#allocation15_spill] sm:$0xff] }
 0xdf4   : > { %v4512_v30 = vadd.f32 %v4480_v27, %v4370_v15  ;;  %v4372_v13 = vadd.f32 %v4371_v36, %v7371_v41  ;;  %v4285_v41 = vadd.f32 %v4284_v43, %v3752_v24  ;;  %v4289_v11 = vpop.f32.mrf.mxu2  ;;  %v7943_v43 = vld [vmem:[#allocation12_spill] sm:$0xff]  ;;  %v5603_v36 = vld [vmem:[%s7882_s16 + $0x34] sm:$0xf0] }
 0xdf5   : > { %v4290_v9 = vadd.f32 %v4289_v11, %v7468_v61  ;;  %v5493_v27 = vld [vmem:[%s7882_s16 + $0x30] sm:$0xf] }
 0xdf6   : > { %v5808_v12 = vpop.eup %5807  ;;  %v4544_v58 = vmul.f32 0.7978846, %v4512_v30  ;;  %v4417_v1 = vmul.f32 %v4372_v13, %v4372_v13  ;;  %v7701_v32 = vmul.f32 %v4670_v45, %v4285_v41  ;;  %v7946_v41 = vld [vmem:[#allocation11_spill] sm:$0xff] }
 0xdf7   : > { %v4607_v23 = vadd.f32 1.0, %v5808_v12 }
 0xdf8   : > { %5809 = vtanh.f32 %v4544_v58  ;;  %v4449_v10 = vmul.f32 %v4417_v1, %v4372_v13  ;;  %v5494_v58 = vor.u32 %v5603_v36, %v5493_v27 }
 0xdf9   : > { %v4639_v47 = vmul.f32 0.5, %v4607_v23 }
 0xdfa   : > { %v4481_v7 = vmul.f32 0.044715, %v4449_v10 }
 0xdfb   : > { %v7699_v17 = vpop.f32.mrf.mxu3  ;;  %v4671_v42 = vmul.f32 %v4639_v47, %v4367_v16 }
 0xdfc   : > { %v4513_v54 = vadd.f32 %v4481_v7, %v4372_v13  ;;  %v4291_v16 = vpop.f32.mrf.mxu2 }
 0xdfd   : > { %v7703_v49 = vmul.f32 %v4671_v42, %v4287_v63  ;;  %v4292_v55 = vadd.f32 %v4291_v16, %v7648_v39 }
 0xdfe   : > { %v5810_v53 = vpop.eup %5809  ;;  %v4545_v33 = vmul.f32 0.7978846, %v4513_v54 }
 0xdff   : > { %v4724_v6 = vpack.c.bf16 %v7703_v49, %v7701_v32  ;;  %v4608_v8 = vadd.f32 1.0, %v5810_v53  ;;  %v5598_v32 = vld [vmem:[%s7882_s16 + $0x14] sm:$0xf]  ;;  %v5495_v49 = vld [vmem:[%s7882_s16 + $0x38] sm:$0xf0] }
 0xe00   : > { %5811 = vtanh.f32 %v4545_v33  ;;  %4823 = vmatmul.bf16.gmra.mxu3 %v5478_v3  ;;  %v5482_v37 = vor.u32 %v5598_v32, %v5479_v59 }
 0xe01   : > { %v4640_v21 = vmul.f32 0.5, %v4608_v8 }
 0xe03   : > { %v4376_v24 = vpop.f32.mrf.mxu3  ;;  %v4672_v56 = vmul.f32 %v4640_v21, %v4370_v15 }
 0xe05   : > { %v7716_v40 = vmul.f32 %v4672_v56, %v4290_v9  ;;  %v7950_v56 = vld [vmem:[#allocation27_spill] sm:$0xff]  ;;  %v7951_v9 = vld [vmem:[#allocation20_spill] sm:$0xff] }
 0xe06   : > { %v5812_v60 = vpop.eup %5811 }
 0xe07   : > { %v4609_v20 = vadd.f32 1.0, %v5812_v60  ;;  %v7947_v60 = vld [vmem:[#allocation17_spill] sm:$0xff] }
 0xe09   : > { %v4641_v26 = vmul.f32 0.5, %v4609_v20  ;;  %v7732_v20 = vadd.f32 %v4376_v24, %v7947_v60 }
 0xe0b   : > { %v4379_v22 = vpop.f32.mrf.mxu3  ;;  %v4673_v19 = vmul.f32 %v4641_v26, %v4372_v13  ;;  %v4300_v26 = vadd.f32 %v7949_v44, %v7948_v62 }
 0xe0c   : > { %v4380_v14 = vadd.f32 %v4379_v22, %v7943_v43  ;;  %v7952_v43 = vld [vmem:[#allocation16_spill] sm:$0xff] }
 0xe0d   : > { %v7718_v4 = vmul.f32 %v4673_v19, %v4292_v55  ;;  %v4302_v55 = vadd.f32 %v7951_v9, %v7950_v56 }
 0xe0e   : > { %v4420_v51 = vmul.f32 %v4380_v14, %v4380_v14 }
 0xe0f   : > { %v4725_v5 = vpack.c.bf16 %v7718_v4, %v7716_v40  ;;  %v4763_v40 = vpop.permute.xlu2 %4762 }
 0xe10   : > { %v4452_v18 = vmul.f32 %v4420_v51, %v4380_v14  ;;  %4828 = vmatmul.bf16.gmra.mxu3 %v5486_v38  ;;  %v7740_v38 = vadd.f32 %v7699_v17, %v7952_v43 }
 0xe12   : > { %v4484_v15 = vmul.f32 0.044715, %v4452_v18  ;;  %v7953_v18 = vld [vmem:[#allocation10_spill] sm:$0xff]  ;;  %v4418_v17 = vmul.f32 %v7740_v38, %v7740_v38 }
 0xe13   : > { %v4381_v0 = vpop.f32.mrf.mxu3 }
 0xe14   : > { %v4516_v61 = vadd.f32 %v4484_v15, %v4380_v14  ;;  %v4382_v39 = vadd.f32 %v4381_v0, %v7944_v50 }
 0xe16   : > { %v4548_v31 = vmul.f32 0.7978846, %v4516_v61  ;;  %v4421_v29 = vmul.f32 %v4382_v39, %v4382_v39  ;;  %v4419_v61 = vmul.f32 %v7732_v20, %v7732_v20 }
 0xe18   : > { %5813 = vtanh.f32 %v4548_v31  ;;  %v4453_v57 = vmul.f32 %v4421_v29, %v4382_v39  ;;  %v4451_v27 = vmul.f32 %v4419_v61, %v7732_v20 }
 0xe1a   : > { %v4485_v46 = vmul.f32 0.044715, %v4453_v57 }
 0xe1b   : > { %v4384_v30 = vpop.f32.mrf.mxu3 }
 0xe1c   : > { %v4517_v13 = vadd.f32 %v4485_v46, %v4382_v39  ;;  %v4385_v12 = vadd.f32 %v4384_v30, %v7945_v34  ;;  %v4450_v30 = vmul.f32 %v4418_v17, %v7740_v38  ;;  %v7954_v34 = vld [vmem:[#allocation13_spill] sm:$0xff] }
 0xe1e   : > { %v5814_v1 = vpop.eup %5813  ;;  %v4549_v23 = vmul.f32 0.7978846, %v4517_v13  ;;  %v4422_v10 = vmul.f32 %v4385_v12, %v4385_v12 }
 0xe1f   : > { %v4612_v28 = vadd.f32 1.0, %v5814_v1 }
 0xe20   : > { %5815 = vtanh.f32 %v4549_v23  ;;  %v4454_v48 = vmul.f32 %v4422_v10, %v4385_v12  ;;  %4833 = vmatmul.bf16.gmra.mxu3 %v5494_v58  ;;  %v4483_v10 = vmul.f32 0.044715, %v4451_v27 }
 0xe21   : > { %v4644_v42 = vmul.f32 0.5, %v4612_v28 }
 0xe22   : > { %v4486_v47 = vmul.f32 0.044715, %v4454_v48 }
 0xe23   : > { %v4386_v45 = vpop.f32.mrf.mxu3  ;;  %v4676_v21 = vmul.f32 %v4644_v42, %v4380_v14 }
 0xe24   : > { %v4518_v7 = vadd.f32 %v4486_v47, %v4385_v12  ;;  %v4387_v63 = vadd.f32 %v4386_v45, %v7946_v41  ;;  %v4482_v45 = vmul.f32 0.044715, %v4450_v30 }
 0xe25   : > { %v7743_v14 = vmul.f32 %v4676_v21, %v4300_v26  ;;  %v7958_v21 = vld [vmem:[#allocation23_spill] sm:$0xff] }
 0xe26   : > { %v5816_v54 = vpop.eup %5815  ;;  %v4550_v3 = vmul.f32 0.7978846, %v4518_v7  ;;  %v4423_v53 = vmul.f32 %v4387_v63, %v4387_v63  ;;  %v4514_v62 = vadd.f32 %v4482_v45, %v7740_v38 }
 0xe27   : > { %v4613_v11 = vadd.f32 1.0, %v5816_v54  ;;  %v4515_v54 = vadd.f32 %v4483_v10, %v7732_v20 }
 0xe28   : > { %5817 = vtanh.f32 %v4550_v3  ;;  %v4455_v33 = vmul.f32 %v4423_v53, %v4387_v63  ;;  %v7955_v53 = vld [vmem:[#allocation28_spill] sm:$0xff] }
 0xe29   : > { %v4645_v8 = vmul.f32 0.5, %v4613_v11  ;;  %v7956_v11 = vld [vmem:[#allocation21_spill] sm:$0xff] }
 0xe2a   : > { %v4487_v16 = vmul.f32 0.044715, %v4455_v33  ;;  %v4305_v33 = vadd.f32 %v7956_v11, %v7955_v53 }
 0xe2b   : > { %v4389_v22 = vpop.f32.mrf.mxu3  ;;  %v4677_v19 = vmul.f32 %v4645_v8, %v4382_v39  ;;  %v7957_v8 = vld [vmem:[#allocation22_spill] sm:$0xff] }
 0xe2c   : > { %v4519_v51 = vadd.f32 %v4487_v16, %v4387_v63  ;;  %v4390_v15 = vadd.f32 %v4389_v22, %v7953_v18  ;;  %v4307_v60 = vadd.f32 %v7958_v21, %v7957_v8 }
 0xe2d   : > { %v7745_v24 = vmul.f32 %v4677_v19, %v4302_v55  ;;  %v4547_v55 = vmul.f32 0.7978846, %v4515_v54  ;;  %v7964_v54 = vld [vmem:[#allocation29_spill] sm:$0xff] }
 0xe2e   : > { %v5818_v0 = vpop.eup %5817  ;;  %v4551_v50 = vmul.f32 0.7978846, %v4519_v51  ;;  %v4424_v31 = vmul.f32 %v4390_v15, %v4390_v15 }
 0xe2f   : > { %v4727_v39 = vpack.c.bf16 %v7745_v24, %v7743_v14  ;;  %v4614_v57 = vadd.f32 1.0, %v5818_v0 }
 0xe30   : > { %5819 = vtanh.f32 %v4551_v50  ;;  %v4456_v29 = vmul.f32 %v4424_v31, %v4390_v15  ;;  %v4294_v50 = vpop.f32.mrf.mxu2 }
 0xe31   : > { %v4646_v1 = vmul.f32 0.5, %v4614_v57  ;;  %v7960_v57 = vld [vmem:[#allocation25_spill] sm:$0xff] }
 0xe32   : > { %v4488_v36 = vmul.f32 0.044715, %v4456_v29  ;;  %v7959_v29 = vld [vmem:[#allocation24_spill] sm:$0xff] }
 0xe33   : > { %v4391_v46 = vpop.f32.mrf.mxu3  ;;  %v4678_v42 = vmul.f32 %v4646_v1, %v4385_v12  ;;  %v4546_v12 = vmul.f32 0.7978846, %v4514_v62  ;;  %v4310_v27 = vadd.f32 %v7960_v57, %v7959_v29 }
 0xe34   : > { %v4520_v13 = vadd.f32 %v4488_v36, %v4390_v15  ;;  %v4392_v58 = vadd.f32 %v4391_v46, %v7954_v34  ;;  %v7961_v36 = vld [vmem:[#allocation19_spill] sm:$0xff]  ;;  %v7962_v46 = vld [vmem:[#allocation26_spill] sm:$0xff] }
 0xe35   : > { %v4710_v26 = vmul.f32 %v4678_v42, %v4305_v33  ;;  %v4312_v30 = vadd.f32 %v7962_v46, %v7961_v36 }
 0xe36   : > { %v5820_v23 = vpop.eup %5819  ;;  %v4552_v48 = vmul.f32 0.7978846, %v4520_v13  ;;  %v4425_v28 = vmul.f32 %v4392_v58, %v4392_v58 }
 0xe37   : > { %v4615_v47 = vadd.f32 1.0, %v5820_v23 }
 0xe38   : > { %5821 = vtanh.f32 %v4552_v48  ;;  %v4457_v7 = vmul.f32 %v4425_v28, %v4392_v58  ;;  %v4296_v45 = vpop.f32.mrf.mxu2 }
 0xe39   : > { %v4647_v41 = vmul.f32 0.5, %v4615_v47 }
 0xe3a   : > { %v4489_v3 = vmul.f32 0.044715, %v4457_v7  ;;  %v7963_v7 = vld [vmem:[#allocation30_spill] sm:$0xff] }
 0xe3b   : > { %v4679_v16 = vmul.f32 %v4647_v41, %v4387_v63  ;;  %v4297_v41 = vadd.f32 %v4296_v45, %v7963_v7 }
 0xe3c   : > { %v4521_v44 = vadd.f32 %v4489_v3, %v4392_v58  ;;  %v4295_v3 = vadd.f32 %v4294_v50, %v7964_v54 }
 0xe3d   : > { %v4711_v56 = vmul.f32 %v4679_v16, %v4307_v60 }
 0xe3e   : > { %v5822_v9 = vpop.eup %5821  ;;  %v4553_v22 = vmul.f32 0.7978846, %v4521_v44 }
 0xe3f   : > { %v4728_v19 = vpack.c.bf16 %v4711_v56, %v4710_v26  ;;  %v4616_v43 = vadd.f32 1.0, %v5822_v9 }
 0xe40   : > { %5823 = vtanh.f32 %v4553_v22 }
 0xe41   : > { %5825 = vtanh.f32 %v4547_v55  ;;  %v4648_v51 = vmul.f32 0.5, %v4616_v43  ;;  %v4753_v43 = vpop.permute.xlu0 %4752 }
 0xe42   : > { %5827 = vtanh.f32 %v4546_v12 }
 0xe43   : > { %v4680_v63 = vmul.f32 %v4648_v51, %v4390_v15 }
 0xe45   : > { %v4712_v1 = vmul.f32 %v4680_v63, %v4310_v27 }
 0xe46   : > { %v5824_v18 = vpop.eup %5823 }
 0xe47   : > { %v4617_v0 = vadd.f32 1.0, %v5824_v18  ;;  %v5826_v61 = vpop.eup %5825 }
 0xe48   : > { %v5828_v17 = vpop.eup %5827  ;;  %v4611_v34 = vadd.f32 1.0, %v5826_v61 }
 0xe49   : > { %v4649_v31 = vmul.f32 0.5, %v4617_v0  ;;  %v4610_v10 = vadd.f32 1.0, %v5828_v17  ;;  %v4748_v36 = vpop.permute.xlu0 %4747 }
 0xe4a   : > { %v4643_v28 = vmul.f32 0.5, %v4611_v34 }
 0xe4b   : > { %v4681_v13 = vmul.f32 %v4649_v31, %v4392_v58  ;;  %v4642_v47 = vmul.f32 0.5, %v4610_v10 }
 0xe4c   : > { %v4675_v15 = vmul.f32 %v4643_v28, %v7732_v20  ;;  %v5596_v20 = vld [vmem:[%s7882_s16 + $0x4] sm:$0xf]  ;;  %v7967_v28 = vld [vmem:[#allocation7_spill] sm:$0xff] }
 0xe4d   : > { %v4713_v23 = vmul.f32 %v4681_v13, %v4312_v30  ;;  %v4674_v42 = vmul.f32 %v4642_v47, %v7740_v38  ;;  %v5471_v38 = vld [vmem:[%s7882_s16 + $0x8] sm:$0xf0]  ;;  %v7965_v13 = vld [vmem:[#allocation8_spill] sm:$0xff] }
 0xe4e   : > { %v4707_v53 = vmul.f32 %v4675_v15, %v4297_v41  ;;  %v5474_v14 = vor.u32 %v5596_v20, %v5471_v38  ;;  %v7970_v20 = vld [vmem:[#allocation4_spill] sm:$0xff] }
 0xe4f   : > { %v4729_v48 = vpack.c.bf16 %v4713_v23, %v4712_v1  ;;  %v4706_v58 = vmul.f32 %v4674_v42, %v4295_v3  ;;  %v7966_v1 = vld [vmem:[#allocation9_spill] sm:$0xff]  ;;  %v7968_v42 = vld [vmem:[#allocation6_spill] sm:$0xff] }
 0xe51   : > { %4839 = vmatpush.bf16.msrb.mxu0 %v4729_v48  ;;  %v4726_v11 = vpack.c.bf16 %v4707_v53, %v4706_v58  ;;  %v7969_v53 = vld [vmem:[#allocation5_spill] sm:$0xff] }
 0xe55   : > { %4840 = vmatpush.bf16.msrb.mxu0 %v4728_v19  ;;  %v4768_v19 = vpop.permute.xlu1 %4767 }
 0xe59   : > { %4841 = vmatpush.bf16.msrb.mxu0 %v4727_v39 }
 0xe5d   : > { %4842 = vmatpush.bf16.msrb.mxu0 %v4726_v11  ;;  %v4743_v18 = vpop.permute.xlu1 %4742 }
 0xe61   : > { %4843 = vmatpush.bf16.msrb.mxu0 %v4725_v5  ;;  %v4758_v5 = vpop.permute.xlu2 %4757 }
 0xe65   : > { %4844 = vmatpush.bf16.msrb.mxu0 %v4724_v6  ;;  %v4738_v15 = vpop.permute.xlu1 %4737 }
 0xe69   : > { %4845 = vmatpush.bf16.msrb.mxu0 %v4723_v2  ;;  %v5600_v2 = vld [vmem:[%s7882_s16 + $0x24] sm:$0xf]  ;;  %v4733_v39 = vpop.permute.xlu2 %4732 }
 0xe6a   : > { %v5490_v35 = vor.u32 %v5600_v2, %v5487_v52 }
 0xe6d   : > { %4846 = vmatpush.bf16.msrb.mxu0 %v4722_v25  ;;  %v5602_v25 = vld [vmem:[%s7882_s16 + $0x34] sm:$0xf] }
 0xe6e   : > { %v5498_v6 = vor.u32 %v5602_v25, %v5495_v49  ;;  %v5605_v25 = vld [vmem:[%s7884_s18 + $0x8] sm:$0xff]  ;;  %v5606_v49 = vld [vmem:[%s7884_s18 + $0x10] sm:$0xff] }
 0xe70   : > { %4847 = vmatmul.bf16.vlgmr.msrb.gmra.mxu0 %v5474_v14  ;;  %v7971_v14 = vld [vmem:[#allocation2_spill] sm:$0xff] }
 0xe73   : > { %v4819_v4 = vpop.f32.mrf.mxu3 }
 0xe74   : > { %v4820_v33 = vadd.f32 %v4819_v4, %v4733_v39 }
 0xe7b   : > { %v4821_v24 = vpop.f32.mrf.mxu3 }
 0xe7c   : > { %v4822_v7 = vadd.f32 %v4821_v24, %v4738_v15  ;;  %v5829_v24 = vld [vmem:[%s5966_s3] sm:$0xff] }
 0xe80   : > { %4852 = vmatmul.bf16.gmra.mxu0 %v5482_v37  ;;  %v7972_v37 = vld [vmem:[#allocation3_spill] sm:$0xff] }
 0xe83   : > { %v4824_v60 = vpop.f32.mrf.mxu3 }
 0xe84   : > { %v4825_v10 = vadd.f32 %v4824_v60, %v4743_v18  ;;  %v5830_v60 = vld [vmem:[%s5966_s3 + $0x8] sm:$0xff] }
 0xe8b   : > { %v4826_v62 = vpop.f32.mrf.mxu3 }
 0xe8c   : > { %v4827_v46 = vadd.f32 %v4826_v62, %v4748_v36  ;;  %v4893_v62 = vpop.permute.xlu1 %4892 }
 0xe90   : > { %4857 = vmatmul.bf16.gmra.mxu0 %v5490_v35  ;;  %v5604_v35 = vld [vmem:[%s7884_s18] sm:$0xff] }
 0xe93   : > { %v4829_v26 = vpop.f32.mrf.mxu3 }
 0xe94   : > { %v4830_v29 = vadd.f32 %v4829_v26, %v4753_v43 }
 0xe9b   : > { %v4831_v9 = vpop.f32.mrf.mxu3 }
 0xe9c   : > { %v4832_v50 = vadd.f32 %v4831_v9, %v4758_v5 }
 0xea0   : > { %4862 = vmatmul.bf16.gmra.mxu0 %v5498_v6  ;;  %v5607_v6 = vld [vmem:[%s7884_s18 + $0x18] sm:$0xff] }
 0xea3   : > { %v4834_v12 = vpop.f32.mrf.mxu3 }
 0xea4   : > { %v4835_v61 = vadd.f32 %v4834_v12, %v4763_v40  ;;  %v4883_v40 = vpop.permute.xlu0 %4882  ;;  %v5832_v12 = vld [vmem:[%s5966_s3 + $0x18] sm:$0xff] }
 0xeab   : > { %v4836_v0 = vpop.f32.mrf.mxu3 }
 0xeac   : > { %v4837_v63 = vadd.f32 %v4836_v0, %v4768_v19 }
 0xeed   : > { %v4848_v8 = vpop.f32.mrf.mxu0 }
 0xeee   : > { %v4849_v21 = vadd.f32 %v4848_v8, %v4820_v33  ;;  %v4888_v33 = vpop.permute.xlu2 %4887 }
 0xef0   : > { %v4868_v2 = vadd.f32 %v4849_v21, %v7972_v37 }
 0xef5   : > { %v4850_v16 = vpop.f32.mrf.mxu0 }
 0xef6   : > { %v4851_v3 = vadd.f32 %v4850_v16, %v4822_v7 }
 0xef8   : > { %v4869_v32 = vadd.f32 %v4851_v3, %v7971_v14 }
 0xefa   : > { %v4876_v52 = vpack.c.bf16 %v4869_v32, %v4868_v2 }
 0xefd   : > { %v4853_v44 = vpop.f32.mrf.mxu0 }
 0xefe   : > { %v4854_v41 = vadd.f32 %v4853_v44, %v4825_v10  ;;  %v5836_v10 = vld [vmem:[%s5966_s3 + $0x38] sm:$0xff] }
 0xf00   : > { %v4870_v38 = vadd.f32 %v4854_v41, %v7970_v20 }
 0xf05   : > { %v4855_v56 = vpop.f32.mrf.mxu0 }
 0xf06   : > { %v4856_v48 = vadd.f32 %v4855_v56, %v4827_v46  ;;  %v5831_v56 = vld [vmem:[%s5966_s3 + $0x10] sm:$0xff] }
 0xf08   : > { %v4871_v58 = vadd.f32 %v4856_v48, %v7969_v53 }
 0xf0a   : > { %v4877_v59 = vpack.c.bf16 %v4871_v58, %v4870_v38 }
 0xf0d   : > { %v4858_v55 = vpop.f32.mrf.mxu0 }
 0xf0e   : > { %v4859_v30 = vadd.f32 %v4858_v55, %v4830_v29  ;;  %v4898_v55 = vpop.permute.xlu0 %4897  ;;  %v5834_v29 = vld [vmem:[%s5966_s3 + $0x28] sm:$0xff] }
 0xf10   : > { %v4872_v54 = vadd.f32 %v4859_v30, %v7968_v42  ;;  %v5835_v30 = vld [vmem:[%s5966_s3 + $0x30] sm:$0xff] }
 0xf15   : > { %v4860_v22 = vpop.f32.mrf.mxu0 }
 0xf16   : > { %v4861_v57 = vadd.f32 %v4860_v22, %v4832_v50 }
 0xf18   : > { %v4873_v47 = vadd.f32 %v4861_v57, %v7967_v28 }
 0xf1a   : > { %v4878_v11 = vpack.c.bf16 %v4873_v47, %v4872_v54 }
 0xf1d   : > { %v4863_v51 = vpop.f32.mrf.mxu0 }
 0xf1e   : > { %v4864_v31 = vadd.f32 %v4863_v51, %v4835_v61  ;;  %v4903_v51 = vpop.permute.xlu2 %4902  ;;  %v5833_v61 = vld [vmem:[%s5966_s3 + $0x20] sm:$0xff] }
 0xf20   : > { %v4874_v34 = vadd.f32 %v4864_v31, %v7965_v13 }
 0xf25   : > { %v4865_v17 = vpop.f32.mrf.mxu0 }
 0xf26   : > { %v4866_v27 = vadd.f32 %v4865_v17, %v4837_v63  ;;  %v4908_v63 = vpop.permute.xlu1 %4907 }
 0xf28   : > { %v4875_v23 = vadd.f32 %v4866_v27, %v7966_v1  ;;  %v4913_v27 = vpop.permute.xlu0 %4912 }
 0xf2a   : > { %v4879_v45 = vpack.c.bf16 %v4875_v23, %v4874_v34  ;;  %v4918_v34 = vpop.permute.xlu2 %4917 }
 0xf2c   : > { %4956 = vmatpush.bf16.msrb.mxu1 %v4879_v45 }
 0xf30   : > { %4957 = vmatpush.bf16.msrb.mxu1 %v4878_v11 }
 0xf34   : > { %4958 = vmatpush.bf16.msrb.mxu1 %v4877_v59 }
 0xf38   : > { %4959 = vmatpush.bf16.msrb.mxu1 %v4876_v52 }
 0xf3b   : > { %5515 = vmatmul.msk.bf16.vlgmr.msrb.gmra.mxu1 %vm963_vm0, %v5604_v35 }
 0xf4b   : > { %5516 = vmatmul.msk.bf16.gmra.mxu1 %vm963_vm0, %v5605_v25 }
 0xf5b   : > { %5517 = vmatmul.msk.bf16.gmra.mxu1 %vm963_vm0, %v5606_v49 }
 0xf6b   : > { %5518 = vmatmul.msk.bf16.gmra.mxu1 %vm963_vm0, %v5607_v6 }
 0xfb8   : > { %v4961_v4 = vpop.f32.mrf.mxu1 }
 0xfb9   : > { %v4962_v5 = vadd.f32 %v4961_v4, %v4883_v40 }
 0xfbb   : > { %v4981_v39 = vadd.f32 %v5829_v24, %v4962_v5 }
 0xfbd   : > { %4989 = vst.msk [vmem:[%s7837_s0] sm:$0xff] %vm963_vm0, %v4981_v39 }
 0xfc0   : > { %v4963_v8 = vpop.f32.mrf.mxu1 }
 0xfc1   : > { %v4964_v21 = vadd.f32 %v4963_v8, %v4888_v33 }
 0xfc3   : > { %v4982_v16 = vadd.f32 %v5830_v60, %v4964_v21 }
 0xfc5   : > { %4990 = vst.msk [vmem:[%s7837_s0 + $0x8] sm:$0xff] %vm963_vm0, %v4982_v16 }
 0xfc8   : > { %v4966_v44 = vpop.f32.mrf.mxu1 }
 0xfc9   : > { %v4967_v26 = vadd.f32 %v4966_v44, %v4893_v62 }
 0xfcb   : > { %v4983_v9 = vadd.f32 %v5831_v56, %v4967_v26 }
 0xfcd   : > { %4991 = vst.msk [vmem:[%s7837_s0 + $0x10] sm:$0xff] %vm963_vm0, %v4983_v9 }
 0xfd0   : > { %v4968_v22 = vpop.f32.mrf.mxu1 }
 0xfd1   : > { %v4969_v19 = vadd.f32 %v4968_v22, %v4898_v55 }
 0xfd3   : > { %v4984_v43 = vadd.f32 %v5832_v12, %v4969_v19 }
 0xfd5   : > { %4992 = vst.msk [vmem:[%s7837_s0 + $0x18] sm:$0xff] %vm963_vm0, %v4984_v43 }
 0xfd8   : > { %v4971_v18 = vpop.f32.mrf.mxu1 }
 0xfd9   : > { %v4972_v0 = vadd.f32 %v4971_v18, %v4903_v51 }
 0xfdb   : > { %v4985_v50 = vadd.f32 %v5833_v61, %v4972_v0 }
 0xfdd   : > { %4993 = vst.msk [vmem:[%s7837_s0 + $0x20] sm:$0xff] %vm963_vm0, %v4985_v50 }
 0xfe0   : > { %v4973_v31 = vpop.f32.mrf.mxu1 }
 0xfe1   : > { %v4974_v17 = vadd.f32 %v4973_v31, %v4908_v63 }
 0xfe3   : > { %v4986_v57 = vadd.f32 %v5834_v29, %v4974_v17 }
 0xfe5   : > { %4994 = vst.msk [vmem:[%s7837_s0 + $0x28] sm:$0xff] %vm963_vm0, %v4986_v57 }
 0xfe8   : > { %v4976_v36 = vpop.f32.mrf.mxu1 }
 0xfe9   : > { %v4977_v46 = vadd.f32 %v4976_v36, %v4913_v27 }
 0xfeb   : > { %v4987_v13 = vadd.f32 %v5835_v30, %v4977_v46 }
 0xfed   : > { %4995 = vst.msk [vmem:[%s7837_s0 + $0x30] sm:$0xff] %vm963_vm0, %v4987_v13 }
 0xff0   : > { %v4978_v1 = vpop.f32.mrf.mxu1 }
 0xff1   : > { %v4979_v23 = vadd.f32 %v4978_v1, %v4918_v34 }
 0xff3   : > { %v4988_v48 = vadd.f32 %v5836_v10, %v4979_v23 }
 0xff5   : > { %4996 = vst.msk [vmem:[%s7837_s0 + $0x38] sm:$0xff] %vm963_vm0, %v4988_v48 }
 0xff6 PF: > { %s30_s1 = sadd.s32 1, %s5843_s1  }
 0xff7   : > { %p27_p4 = scmp.ge.s32.totalorder %s30_s1, 4  }
 0xff9   :  { %29 = sbr.rel (!%p27_p4) target bundleno = 6 (0x6), region = 133 }

</bundles_post_ra>
